<compile_context>
chip_gen: v6e
topology: v6e:2x2x1
jax: 0.10.0
libtpu: 0.0.40
codegen_flags: <defaults>
</compile_context>

<pallas_src>
import jax
import jax.numpy as jnp
from jax.experimental import pallas as pl
from jax.experimental.pallas import tpu as pltpu

# ----------------------- model config (small, synthetic) -----------------------
VOCAB = 100
TYPE_VOCAB = 2
SEQ = 8
HIDDEN = 32
N_HEADS = 4
HEAD_DIM = HIDDEN // N_HEADS
N_LAYERS = 2
INTERMEDIATE = 64
NUM_CLASSES = 1
BATCH = 2
N_TOWERS = 2            # context / response
LN_EPS = 1e-12


# --------------------------- fused BERT-tower kernel ----------------------------
def _encoder_kernel(x_ref, mask_ref,
                    emb_g_ref, emb_b_ref,
                    wqkv_ref, bqkv_ref, wo_ref, bo_ref,
                    ln1_g_ref, ln1_b_ref,
                    w1_ref, b1_ref, w2_ref, b2_ref,
                    ln2_g_ref, ln2_b_ref,
                    pool_w_ref, pool_b_ref,
                    out_ref):
    """One grid step == one full BERT tower (all layers), fully VMEM-resident."""
    f32 = jnp.float32
    scale = 1.0 / (HEAD_DIM ** 0.5)

    def layer_norm(x, g, b):
        mu = jnp.mean(x, axis=-1, keepdims=True)
        var = jnp.mean(jnp.square(x - mu), axis=-1, keepdims=True)
        return (x - mu) * jax.lax.rsqrt(var + LN_EPS) * g + b

    # Embedding LayerNorm (no fake zero residual).
    h = layer_norm(x_ref[0], emb_g_ref[0], emb_b_ref[0])          # (B*S, HIDDEN)

    # Additive key-position bias, shared across heads and query rows: (B, 1, S)
    bias = ((1.0 - mask_ref[0]) * -1e9)[:, None, :]

    for l in range(N_LAYERS):                                     # static unroll
        # ---- fused QKV projection ----
        qkv = jnp.dot(h, wqkv_ref[0, l], preferred_element_type=f32) + bqkv_ref[0, l]
        qkv3 = qkv.reshape(BATCH, SEQ, 3 * HIDDEN)

        # ---- multi-head attention, all heads in-kernel ----
        attn_out = jnp.zeros((BATCH * SEQ, HIDDEN), f32)
        for hd in range(N_HEADS):
            q = qkv3[:, :, hd * HEAD_DIM:(hd + 1) * HEAD_DIM]                         # (B,S,Dh)
            k = qkv3[:, :, HIDDEN + hd * HEAD_DIM:HIDDEN + (hd + 1) * HEAD_DIM]       # (B,S,Dh)
            v = qkv3[:, :, 2 * HIDDEN + hd * HEAD_DIM:2 * HIDDEN + (hd + 1) * HEAD_DIM]

            s = jnp.einsum('bqd,bkd->bqk', q, k,
                           preferred_element_type=f32) * scale + bias                 # (B,S,S)
            s = s - jnp.max(s, axis=-1, keepdims=True)
            p = jnp.exp(s)
            p = p / jnp.sum(p, axis=-1, keepdims=True)
            ctx = jnp.einsum('bqk,bkd->bqd', p, v,
                             preferred_element_type=f32)                              # (B,S,Dh)
            ctx = ctx.reshape(BATCH * SEQ, HEAD_DIM)
            # Accumulate per-head slice of Wo (== concat(heads) @ Wo) -> no lane concat.
            attn_out = attn_out + jnp.dot(
                ctx, wo_ref[0, l, hd * HEAD_DIM:(hd + 1) * HEAD_DIM, :],
                preferred_element_type=f32)
        attn_out = attn_out + bo_ref[0, l]

        h = layer_norm(attn_out + h, ln1_g_ref[0, l], ln1_b_ref[0, l])

        # ---- feed-forward ----
        ffn = jnp.dot(h, w1_ref[0, l], preferred_element_type=f32) + b1_ref[0, l]
        # TODO(synk): PyTorch nn.GELU default is the exact erf form; tanh approx
        # used here differs by ~1e-3.
        ffn = jax.nn.gelu(ffn, approximate=True)
        ffn = jnp.dot(ffn, w2_ref[0, l], preferred_element_type=f32) + b2_ref[0, l]
        h = layer_norm(ffn + h, ln2_g_ref[0, l], ln2_b_ref[0, l])

    # ---- pooler: tanh(W @ h[CLS]) ----
    cls = h.reshape(BATCH, SEQ, HIDDEN)[:, 0, :]                  # (B, HIDDEN)
    pooled = jnp.tanh(jnp.dot(cls, pool_w_ref[0], preferred_element_type=f32)
                      + pool_b_ref[0])
    out_ref[0] = pooled.astype(out_ref.dtype)


def encode_towers(params, x_emb, masks):
    """Run both BERT towers; grid axis = tower (parallel -> 2 TCs on v7x)."""
    def tspec(arr):
        zeros = (0,) * (arr.ndim - 1)
        return pl.BlockSpec((1,) + tuple(arr.shape[1:]),
                            lambda t, _z=zeros: (t,) + _z)

    ops = [x_emb, masks,
           params["emb_ln_g"], params["emb_ln_b"],
           params["wqkv"], params["bqkv"], params["wo"], params["bo"],
           params["ln1_g"], params["ln1_b"],
           params["w1"], params["b1"], params["w2"], params["b2"],
           params["ln2_g"], params["ln2_b"],
           params["pool_w"], params["pool_b"]]

    return pl.pallas_call(
        _encoder_kernel,
        out_shape=jax.ShapeDtypeStruct((N_TOWERS, BATCH, HIDDEN), jnp.float32),
        grid=(N_TOWERS,),
        in_specs=[tspec(a) for a in ops],
        out_specs=pl.BlockSpec((1, BATCH, HIDDEN), lambda t: (t, 0, 0)),
        compiler_params=pltpu.CompilerParams(
            dimension_semantics=("parallel",)),   # independent towers
    )(*ops)


# ------------------------------ classifier kernel -------------------------------
def _classifier_kernel(pooled_ref, w_ref, b_ref, o_ref):
    # concat(pooled_cnt, pooled_rsp) @ W + b  ==  split-W sum (no lane concat)
    logits = (jnp.dot(pooled_ref[0], w_ref[:HIDDEN, :], preferred_element_type=jnp.float32)
              + jnp.dot(pooled_ref[1], w_ref[HIDDEN:, :], preferred_element_type=jnp.float32)
              + b_ref[...])
    o_ref[...] = jax.nn.sigmoid(logits).astype(o_ref.dtype)


def classify(pooled, cls_w, cls_b):
    return pl.pallas_call(
        _classifier_kernel,
        out_shape=jax.ShapeDtypeStruct((BATCH, NUM_CLASSES), jnp.float32),
    )(pooled, cls_w, cls_b)


# ------------------------------- parameter init ---------------------------------
def init_biencoder_params(key):
    keys = iter(jax.random.split(key, 16))

    def nrm(shape):
        return 0.02 * jax.random.normal(next(keys), shape, jnp.float32)

    T, L = N_TOWERS, N_LAYERS
    return dict(
        # embeddings (per tower)
        word_emb=nrm((T, VOCAB, HIDDEN)),
        seg_emb=nrm((T, TYPE_VOCAB, HIDDEN)),
        pos_emb=nrm((T, SEQ, HIDDEN)),
        emb_ln_g=jnp.ones((T, 1, HIDDEN), jnp.float32),
        emb_ln_b=jnp.zeros((T, 1, HIDDEN), jnp.float32),
        # transformer layers, stacked (tower, layer, ...) -- QKV fused
        wqkv=nrm((T, L, HIDDEN, 3 * HIDDEN)),
        bqkv=jnp.zeros((T, L, 1, 3 * HIDDEN), jnp.float32),
        wo=nrm((T, L, HIDDEN, HIDDEN)),
        bo=jnp.zeros((T, L, 1, HIDDEN), jnp.float32),
        ln1_g=jnp.ones((T, L, 1, HIDDEN), jnp.float32),
        ln1_b=jnp.zeros((T, L, 1, HIDDEN), jnp.float32),
        w1=nrm((T, L, HIDDEN, INTERMEDIATE)),
        b1=jnp.zeros((T, L, 1, INTERMEDIATE), jnp.float32),
        w2=nrm((T, L, INTERMEDIATE, HIDDEN)),
        b2=jnp.zeros((T, L, 1, HIDDEN), jnp.float32),
        ln2_g=jnp.ones((T, L, 1, HIDDEN), jnp.float32),
        ln2_b=jnp.zeros((T, L, 1, HIDDEN), jnp.float32),
        # pooler (per tower)
        pool_w=nrm((T, HIDDEN, HIDDEN)),
        pool_b=jnp.zeros((T, 1, HIDDEN), jnp.float32),
        # classifier on concat(pooled_cnt, pooled_rsp)
        cls_w=nrm((2 * HIDDEN, NUM_CLASSES)),
        cls_b=jnp.zeros((1, NUM_CLASSES), jnp.float32),
    )


# --------------------------------- forward pass ----------------------------------
def gen_attention_mask(token_ids, valid_length):
    # attention_mask[i, :valid_length[i]] = 1, else 0  (same as the PyTorch loop)
    S = token_ids.shape[1]
    return (jnp.arange(S)[None, :] < valid_length[:, None]).astype(jnp.float32)


def biencoder_forward(params, token_ids_cnt, segment_ids_cnt, valid_length_cnt,
                      token_ids_rsp, segment_ids_rsp, valid_length_rsp):
    token_ids = jnp.stack([token_ids_cnt, token_ids_rsp])      # (2, B, S)
    segment_ids = jnp.stack([segment_ids_cnt, segment_ids_rsp])
    masks = jnp.stack([gen_attention_mask(token_ids_cnt, valid_length_cnt),
                       gen_attention_mask(token_ids_rsp, valid_length_rsp)])  # (2, B, S)

    # Embedding lookups are data-dependent gathers -> plain-JAX glue.
    x_list = []
    for t in range(N_TOWERS):
        x = (params["word_emb"][t][token_ids[t]]
             + params["seg_emb"][t][segment_ids[t]]
             + params["pos_emb"][t][None, :SEQ, :])
        x_list.append(x.reshape(BATCH * SEQ, HIDDEN))
    x_emb = jnp.stack(x_list)                                   # (2, B*S, HIDDEN)

    pooled = encode_towers(params, x_emb, masks)                # (2, B, HIDDEN)

    # dr_rate=None (constructor default) -> no dropout at inference.
    return classify(pooled, params["cls_w"], params["cls_b"])   # (B, 1), sigmoid


# -------------------------------------- main --------------------------------------
if __name__ == "__main__":
    key = jax.random.PRNGKey(0)
    kp, k1, k2 = jax.random.split(key, 3)

    params = init_biencoder_params(kp)

    token_ids_cnt = jax.random.randint(k1, (BATCH, SEQ), 0, VOCAB, jnp.int32)
    segment_ids_cnt = jnp.zeros((BATCH, SEQ), jnp.int32)
    valid_length_cnt = jnp.array([5, SEQ], jnp.int32)

    token_ids_rsp = jax.random.randint(k2, (BATCH, SEQ), 0, VOCAB, jnp.int32)
    segment_ids_rsp = jnp.zeros((BATCH, SEQ), jnp.int32)
    valid_length_rsp = jnp.array([SEQ, 3], jnp.int32)

    out = biencoder_forward(params, token_ids_cnt, segment_ids_cnt, valid_length_cnt,
                            token_ids_rsp, segment_ids_rsp, valid_length_rsp)
    out = jax.block_until_ready(out)

    assert out.shape == (BATCH, NUM_CLASSES)
    assert bool(jnp.all(jnp.isfinite(out)))
    assert bool(jnp.all((out >= 0.0) & (out <= 1.0)))   # sigmoid range
    print("KERNEL_OK")
</pallas_src>

<mosaic_0001>
module attributes {stable_mosaic.version = 11 : i64} {
  func.func @_encoder_kernel(%arg0: i32, %arg1: memref<1x16x32xf32, #tpu.memory_space<vmem>>, %arg2: memref<1x2x8xf32, #tpu.memory_space<vmem>>, %arg3: memref<1x1x32xf32, #tpu.memory_space<vmem>>, %arg4: memref<1x1x32xf32, #tpu.memory_space<vmem>>, %arg5: memref<1x2x32x96xf32, #tpu.memory_space<vmem>>, %arg6: memref<1x2x1x96xf32, #tpu.memory_space<vmem>>, %arg7: memref<1x2x32x32xf32, #tpu.memory_space<vmem>>, %arg8: memref<1x2x1x32xf32, #tpu.memory_space<vmem>>, %arg9: memref<1x2x1x32xf32, #tpu.memory_space<vmem>>, %arg10: memref<1x2x1x32xf32, #tpu.memory_space<vmem>>, %arg11: memref<1x2x32x64xf32, #tpu.memory_space<vmem>>, %arg12: memref<1x2x1x64xf32, #tpu.memory_space<vmem>>, %arg13: memref<1x2x64x32xf32, #tpu.memory_space<vmem>>, %arg14: memref<1x2x1x32xf32, #tpu.memory_space<vmem>>, %arg15: memref<1x2x1x32xf32, #tpu.memory_space<vmem>>, %arg16: memref<1x2x1x32xf32, #tpu.memory_space<vmem>>, %arg17: memref<1x32x32xf32, #tpu.memory_space<vmem>>, %arg18: memref<1x1x32xf32, #tpu.memory_space<vmem>>, %arg19: memref<1x2x32xf32, #tpu.memory_space<vmem>>) attributes {dimension_semantics = [#tpu.dimension_semantics<parallel>], iteration_bounds = array<i64: 2>, scalar_prefetch = 0 : i64, scratch_operands = 0 : i64, tpu.core_type = #tpu.core_type<tc>, window_params = [{transform_indices = @transform_0, window_bounds = array<i64: 1, 16, 32>}, {transform_indices = @transform_1, window_bounds = array<i64: 1, 2, 8>}, {transform_indices = @transform_2, window_bounds = array<i64: 1, 1, 32>}, {transform_indices = @transform_3, window_bounds = array<i64: 1, 1, 32>}, {transform_indices = @transform_4, window_bounds = array<i64: 1, 2, 32, 96>}, {transform_indices = @transform_5, window_bounds = array<i64: 1, 2, 1, 96>}, {transform_indices = @transform_6, window_bounds = array<i64: 1, 2, 32, 32>}, {transform_indices = @transform_7, window_bounds = array<i64: 1, 2, 1, 32>}, {transform_indices = @transform_8, window_bounds = array<i64: 1, 2, 1, 32>}, {transform_indices = @transform_9, window_bounds = array<i64: 1, 2, 1, 32>}, {transform_indices = @transform_10, window_bounds = array<i64: 1, 2, 32, 64>}, {transform_indices = @transform_11, window_bounds = array<i64: 1, 2, 1, 64>}, {transform_indices = @transform_12, window_bounds = array<i64: 1, 2, 64, 32>}, {transform_indices = @transform_13, window_bounds = array<i64: 1, 2, 1, 32>}, {transform_indices = @transform_14, window_bounds = array<i64: 1, 2, 1, 32>}, {transform_indices = @transform_15, window_bounds = array<i64: 1, 2, 1, 32>}, {transform_indices = @transform_16, window_bounds = array<i64: 1, 32, 32>}, {transform_indices = @transform_17, window_bounds = array<i64: 1, 1, 32>}, {transform_indices = @transform_18, window_bounds = array<i64: 1, 2, 32>}]} {
    %c0 = arith.constant 0 : index
    %c0_0 = arith.constant 0 : index
    %c0_1 = arith.constant 0 : index
    %0 = vector.load %arg1[%c0, %c0_0, %c0_1] : memref<1x16x32xf32, #tpu.memory_space<vmem>>, vector<1x16x32xf32>
    %1 = vector.shape_cast %0 : vector<1x16x32xf32> to vector<16x32xf32>
    %c0_2 = arith.constant 0 : index
    %c0_3 = arith.constant 0 : index
    %c0_4 = arith.constant 0 : index
    %2 = vector.load %arg3[%c0_2, %c0_3, %c0_4] : memref<1x1x32xf32, #tpu.memory_space<vmem>>, vector<1x1x32xf32>
    %3 = vector.shape_cast %2 : vector<1x1x32xf32> to vector<1x32xf32>
    %c0_5 = arith.constant 0 : index
    %c0_6 = arith.constant 0 : index
    %c0_7 = arith.constant 0 : index
    %4 = vector.load %arg4[%c0_5, %c0_6, %c0_7] : memref<1x1x32xf32, #tpu.memory_space<vmem>>, vector<1x1x32xf32>
    %5 = vector.shape_cast %4 : vector<1x1x32xf32> to vector<1x32xf32>
    %cst = arith.constant dense<0.000000e+00> : vector<16xf32>
    %6 = vector.multi_reduction <add>, %1, %cst [1] : vector<16x32xf32> to vector<16xf32>
    %7 = vector.shape_cast %6 : vector<16xf32> to vector<16x1xf32>
    %cst_8 = arith.constant 3.200000e+01 : f32
    %8 = vector.broadcast %cst_8 : f32 to vector<16x1xf32>
    %9 = arith.divf %7, %8 : vector<16x1xf32>
    %10 = vector.broadcast %9 : vector<16x1xf32> to vector<16x32xf32>
    %11 = arith.subf %1, %10 : vector<16x32xf32>
    %12 = arith.mulf %11, %11 : vector<16x32xf32>
    %cst_9 = arith.constant dense<0.000000e+00> : vector<16xf32>
    %13 = vector.multi_reduction <add>, %12, %cst_9 [1] : vector<16x32xf32> to vector<16xf32>
    %14 = vector.shape_cast %13 : vector<16xf32> to vector<16x1xf32>
    %cst_10 = arith.constant 3.200000e+01 : f32
    %15 = vector.broadcast %cst_10 : f32 to vector<16x1xf32>
    %16 = arith.divf %14, %15 : vector<16x1xf32>
    %17 = vector.broadcast %9 : vector<16x1xf32> to vector<16x32xf32>
    %18 = arith.subf %1, %17 : vector<16x32xf32>
    %cst_11 = arith.constant 9.99999996E-13 : f32
    %19 = vector.broadcast %cst_11 : f32 to vector<16x1xf32>
    %20 = arith.addf %16, %19 : vector<16x1xf32>
    %21 = math.rsqrt %20 : vector<16x1xf32>
    %22 = vector.broadcast %21 : vector<16x1xf32> to vector<16x32xf32>
    %23 = arith.mulf %18, %22 : vector<16x32xf32>
    %24 = vector.broadcast %3 : vector<1x32xf32> to vector<16x32xf32>
    %25 = arith.mulf %23, %24 : vector<16x32xf32>
    %26 = vector.broadcast %5 : vector<1x32xf32> to vector<16x32xf32>
    %27 = arith.addf %25, %26 : vector<16x32xf32>
    %c0_12 = arith.constant 0 : index
    %c0_13 = arith.constant 0 : index
    %c0_14 = arith.constant 0 : index
    %28 = vector.load %arg2[%c0_12, %c0_13, %c0_14] : memref<1x2x8xf32, #tpu.memory_space<vmem>>, vector<1x2x8xf32>
    %29 = vector.shape_cast %28 : vector<1x2x8xf32> to vector<2x8xf32>
    %cst_15 = arith.constant 1.000000e+00 : f32
    %30 = vector.broadcast %cst_15 : f32 to vector<2x8xf32>
    %31 = arith.subf %30, %29 : vector<2x8xf32>
    %cst_16 = arith.constant -1.000000e+09 : f32
    %32 = vector.broadcast %cst_16 : f32 to vector<2x8xf32>
    %33 = arith.mulf %31, %32 : vector<2x8xf32>
    %34 = vector.shape_cast %33 : vector<2x8xf32> to vector<2x1x8xf32>
    %c0_17 = arith.constant 0 : index
    %c0_18 = arith.constant 0 : index
    %c0_19 = arith.constant 0 : index
    %c0_20 = arith.constant 0 : index
    %35 = vector.load %arg5[%c0_17, %c0_18, %c0_19, %c0_20] : memref<1x2x32x96xf32, #tpu.memory_space<vmem>>, vector<1x1x32x96xf32>
    %36 = vector.shape_cast %35 : vector<1x1x32x96xf32> to vector<32x96xf32>
    %cst_21 = arith.constant dense<0.000000e+00> : vector<16x96xf32>
    %37 = tpu.matmul %27, %36, %cst_21 {dimension_numbers = #tpu.dot_dimension_numbers<[1], [0], [0], [1], [0, 0, 1, 1], [], []>} : vector<16x32xf32>, vector<32x96xf32>, vector<16x96xf32> -> vector<16x96xf32>
    %c0_22 = arith.constant 0 : index
    %c0_23 = arith.constant 0 : index
    %c0_24 = arith.constant 0 : index
    %c0_25 = arith.constant 0 : index
    %38 = vector.load %arg6[%c0_22, %c0_23, %c0_24, %c0_25] : memref<1x2x1x96xf32, #tpu.memory_space<vmem>>, vector<1x1x1x96xf32>
    %39 = vector.shape_cast %38 : vector<1x1x1x96xf32> to vector<1x96xf32>
    %40 = vector.broadcast %39 : vector<1x96xf32> to vector<16x96xf32>
    %41 = arith.addf %37, %40 : vector<16x96xf32>
    %42 = vector.shape_cast %41 : vector<16x96xf32> to vector<2x8x96xf32>
    %cst_26 = arith.constant 0.000000e+00 : f32
    %43 = vector.broadcast %cst_26 : f32 to vector<16x32xf32>
    %44 = vector.extract_strided_slice %42 {offsets = [0, 0, 0], sizes = [2, 8, 8], strides = [1, 1, 1]} : vector<2x8x96xf32> to vector<2x8x8xf32>
    %45 = vector.extract_strided_slice %42 {offsets = [0, 0, 32], sizes = [2, 8, 8], strides = [1, 1, 1]} : vector<2x8x96xf32> to vector<2x8x8xf32>
    %46 = vector.extract_strided_slice %42 {offsets = [0, 0, 64], sizes = [2, 8, 8], strides = [1, 1, 1]} : vector<2x8x96xf32> to vector<2x8x8xf32>
    "tpu.trace_start"() <{level = 10 : i32, message = "bqd,bkd->bqk"}> : () -> ()
    %cst_27 = arith.constant dense<0.000000e+00> : vector<2x8x8xf32>
    %47 = tpu.matmul %44, %45, %cst_27 {dimension_numbers = #tpu.dot_dimension_numbers<[2], [2], [1], [1], [0, 0, 0, 1, 1, 1], [0], [0]>} : vector<2x8x8xf32>, vector<2x8x8xf32>, vector<2x8x8xf32> -> vector<2x8x8xf32>
    "tpu.trace_stop"() : () -> ()
    %cst_28 = arith.constant 0.353553385 : f32
    %48 = vector.broadcast %cst_28 : f32 to vector<2x8x8xf32>
    %49 = arith.mulf %47, %48 : vector<2x8x8xf32>
    %50 = vector.broadcast %34 : vector<2x1x8xf32> to vector<2x8x8xf32>
    %51 = arith.addf %49, %50 : vector<2x8x8xf32>
    %cst_29 = arith.constant dense<0xFF800000> : vector<2x8xf32>
    %52 = vector.multi_reduction <maximumf>, %51, %cst_29 [2] : vector<2x8x8xf32> to vector<2x8xf32>
    %53 = vector.shape_cast %52 : vector<2x8xf32> to vector<2x8x1xf32>
    %54 = vector.broadcast %53 : vector<2x8x1xf32> to vector<2x8x8xf32>
    %55 = arith.subf %51, %54 : vector<2x8x8xf32>
    %56 = math.exp %55 : vector<2x8x8xf32>
    %cst_30 = arith.constant dense<0.000000e+00> : vector<2x8xf32>
    %57 = vector.multi_reduction <add>, %56, %cst_30 [2] : vector<2x8x8xf32> to vector<2x8xf32>
    %58 = vector.shape_cast %57 : vector<2x8xf32> to vector<2x8x1xf32>
    %59 = vector.broadcast %58 : vector<2x8x1xf32> to vector<2x8x8xf32>
    %60 = arith.divf %56, %59 : vector<2x8x8xf32>
    "tpu.trace_start"() <{level = 10 : i32, message = "bqk,bkd->bqd"}> : () -> ()
    %cst_31 = arith.constant dense<0.000000e+00> : vector<2x8x8xf32>
    %61 = tpu.matmul %60, %46, %cst_31 {dimension_numbers = #tpu.dot_dimension_numbers<[2], [1], [1], [2], [0, 0, 0, 1, 1, 2], [0], [0]>} : vector<2x8x8xf32>, vector<2x8x8xf32>, vector<2x8x8xf32> -> vector<2x8x8xf32>
    "tpu.trace_stop"() : () -> ()
    %62 = vector.shape_cast %61 : vector<2x8x8xf32> to vector<16x8xf32>
    %c0_32 = arith.constant 0 : index
    %c0_33 = arith.constant 0 : index
    %c0_34 = arith.constant 0 : index
    %c0_35 = arith.constant 0 : index
    %63 = vector.load %arg7[%c0_32, %c0_33, %c0_34, %c0_35] : memref<1x2x32x32xf32, #tpu.memory_space<vmem>>, vector<1x1x8x32xf32>
    %64 = vector.shape_cast %63 : vector<1x1x8x32xf32> to vector<8x32xf32>
    %cst_36 = arith.constant dense<0.000000e+00> : vector<16x32xf32>
    %65 = tpu.matmul %62, %64, %cst_36 {dimension_numbers = #tpu.dot_dimension_numbers<[1], [0], [0], [1], [0, 0, 1, 1], [], []>} : vector<16x8xf32>, vector<8x32xf32>, vector<16x32xf32> -> vector<16x32xf32>
    %66 = arith.addf %43, %65 : vector<16x32xf32>
    %67 = vector.extract_strided_slice %42 {offsets = [0, 0, 8], sizes = [2, 8, 8], strides = [1, 1, 1]} : vector<2x8x96xf32> to vector<2x8x8xf32>
    %68 = vector.extract_strided_slice %42 {offsets = [0, 0, 40], sizes = [2, 8, 8], strides = [1, 1, 1]} : vector<2x8x96xf32> to vector<2x8x8xf32>
    %69 = vector.extract_strided_slice %42 {offsets = [0, 0, 72], sizes = [2, 8, 8], strides = [1, 1, 1]} : vector<2x8x96xf32> to vector<2x8x8xf32>
    "tpu.trace_start"() <{level = 10 : i32, message = "bqd,bkd->bqk"}> : () -> ()
    %cst_37 = arith.constant dense<0.000000e+00> : vector<2x8x8xf32>
    %70 = tpu.matmul %67, %68, %cst_37 {dimension_numbers = #tpu.dot_dimension_numbers<[2], [2], [1], [1], [0, 0, 0, 1, 1, 1], [0], [0]>} : vector<2x8x8xf32>, vector<2x8x8xf32>, vector<2x8x8xf32> -> vector<2x8x8xf32>
    "tpu.trace_stop"() : () -> ()
    %cst_38 = arith.constant 0.353553385 : f32
    %71 = vector.broadcast %cst_38 : f32 to vector<2x8x8xf32>
    %72 = arith.mulf %70, %71 : vector<2x8x8xf32>
    %73 = vector.broadcast %34 : vector<2x1x8xf32> to vector<2x8x8xf32>
    %74 = arith.addf %72, %73 : vector<2x8x8xf32>
    %cst_39 = arith.constant dense<0xFF800000> : vector<2x8xf32>
    %75 = vector.multi_reduction <maximumf>, %74, %cst_39 [2] : vector<2x8x8xf32> to vector<2x8xf32>
    %76 = vector.shape_cast %75 : vector<2x8xf32> to vector<2x8x1xf32>
    %77 = vector.broadcast %76 : vector<2x8x1xf32> to vector<2x8x8xf32>
    %78 = arith.subf %74, %77 : vector<2x8x8xf32>
    %79 = math.exp %78 : vector<2x8x8xf32>
    %cst_40 = arith.constant dense<0.000000e+00> : vector<2x8xf32>
    %80 = vector.multi_reduction <add>, %79, %cst_40 [2] : vector<2x8x8xf32> to vector<2x8xf32>
    %81 = vector.shape_cast %80 : vector<2x8xf32> to vector<2x8x1xf32>
    %82 = vector.broadcast %81 : vector<2x8x1xf32> to vector<2x8x8xf32>
    %83 = arith.divf %79, %82 : vector<2x8x8xf32>
    "tpu.trace_start"() <{level = 10 : i32, message = "bqk,bkd->bqd"}> : () -> ()
    %cst_41 = arith.constant dense<0.000000e+00> : vector<2x8x8xf32>
    %84 = tpu.matmul %83, %69, %cst_41 {dimension_numbers = #tpu.dot_dimension_numbers<[2], [1], [1], [2], [0, 0, 0, 1, 1, 2], [0], [0]>} : vector<2x8x8xf32>, vector<2x8x8xf32>, vector<2x8x8xf32> -> vector<2x8x8xf32>
    "tpu.trace_stop"() : () -> ()
    %85 = vector.shape_cast %84 : vector<2x8x8xf32> to vector<16x8xf32>
    %c0_42 = arith.constant 0 : index
    %c0_43 = arith.constant 0 : index
    %c8 = arith.constant 8 : index
    %c0_44 = arith.constant 0 : index
    %86 = vector.load %arg7[%c0_42, %c0_43, %c8, %c0_44] : memref<1x2x32x32xf32, #tpu.memory_space<vmem>>, vector<1x1x8x32xf32>
    %87 = vector.shape_cast %86 : vector<1x1x8x32xf32> to vector<8x32xf32>
    %cst_45 = arith.constant dense<0.000000e+00> : vector<16x32xf32>
    %88 = tpu.matmul %85, %87, %cst_45 {dimension_numbers = #tpu.dot_dimension_numbers<[1], [0], [0], [1], [0, 0, 1, 1], [], []>} : vector<16x8xf32>, vector<8x32xf32>, vector<16x32xf32> -> vector<16x32xf32>
    %89 = arith.addf %66, %88 : vector<16x32xf32>
    %90 = vector.extract_strided_slice %42 {offsets = [0, 0, 16], sizes = [2, 8, 8], strides = [1, 1, 1]} : vector<2x8x96xf32> to vector<2x8x8xf32>
    %91 = vector.extract_strided_slice %42 {offsets = [0, 0, 48], sizes = [2, 8, 8], strides = [1, 1, 1]} : vector<2x8x96xf32> to vector<2x8x8xf32>
    %92 = vector.extract_strided_slice %42 {offsets = [0, 0, 80], sizes = [2, 8, 8], strides = [1, 1, 1]} : vector<2x8x96xf32> to vector<2x8x8xf32>
    "tpu.trace_start"() <{level = 10 : i32, message = "bqd,bkd->bqk"}> : () -> ()
    %cst_46 = arith.constant dense<0.000000e+00> : vector<2x8x8xf32>
    %93 = tpu.matmul %90, %91, %cst_46 {dimension_numbers = #tpu.dot_dimension_numbers<[2], [2], [1], [1], [0, 0, 0, 1, 1, 1], [0], [0]>} : vector<2x8x8xf32>, vector<2x8x8xf32>, vector<2x8x8xf32> -> vector<2x8x8xf32>
    "tpu.trace_stop"() : () -> ()
    %cst_47 = arith.constant 0.353553385 : f32
    %94 = vector.broadcast %cst_47 : f32 to vector<2x8x8xf32>
    %95 = arith.mulf %93, %94 : vector<2x8x8xf32>
    %96 = vector.broadcast %34 : vector<2x1x8xf32> to vector<2x8x8xf32>
    %97 = arith.addf %95, %96 : vector<2x8x8xf32>
    %cst_48 = arith.constant dense<0xFF800000> : vector<2x8xf32>
    %98 = vector.multi_reduction <maximumf>, %97, %cst_48 [2] : vector<2x8x8xf32> to vector<2x8xf32>
    %99 = vector.shape_cast %98 : vector<2x8xf32> to vector<2x8x1xf32>
    %100 = vector.broadcast %99 : vector<2x8x1xf32> to vector<2x8x8xf32>
    %101 = arith.subf %97, %100 : vector<2x8x8xf32>
    %102 = math.exp %101 : vector<2x8x8xf32>
    %cst_49 = arith.constant dense<0.000000e+00> : vector<2x8xf32>
    %103 = vector.multi_reduction <add>, %102, %cst_49 [2] : vector<2x8x8xf32> to vector<2x8xf32>
    %104 = vector.shape_cast %103 : vector<2x8xf32> to vector<2x8x1xf32>
    %105 = vector.broadcast %104 : vector<2x8x1xf32> to vector<2x8x8xf32>
    %106 = arith.divf %102, %105 : vector<2x8x8xf32>
    "tpu.trace_start"() <{level = 10 : i32, message = "bqk,bkd->bqd"}> : () -> ()
    %cst_50 = arith.constant dense<0.000000e+00> : vector<2x8x8xf32>
    %107 = tpu.matmul %106, %92, %cst_50 {dimension_numbers = #tpu.dot_dimension_numbers<[2], [1], [1], [2], [0, 0, 0, 1, 1, 2], [0], [0]>} : vector<2x8x8xf32>, vector<2x8x8xf32>, vector<2x8x8xf32> -> vector<2x8x8xf32>
    "tpu.trace_stop"() : () -> ()
    %108 = vector.shape_cast %107 : vector<2x8x8xf32> to vector<16x8xf32>
    %c0_51 = arith.constant 0 : index
    %c0_52 = arith.constant 0 : index
    %c16 = arith.constant 16 : index
    %c0_53 = arith.constant 0 : index
    %109 = vector.load %arg7[%c0_51, %c0_52, %c16, %c0_53] : memref<1x2x32x32xf32, #tpu.memory_space<vmem>>, vector<1x1x8x32xf32>
    %110 = vector.shape_cast %109 : vector<1x1x8x32xf32> to vector<8x32xf32>
    %cst_54 = arith.constant dense<0.000000e+00> : vector<16x32xf32>
    %111 = tpu.matmul %108, %110, %cst_54 {dimension_numbers = #tpu.dot_dimension_numbers<[1], [0], [0], [1], [0, 0, 1, 1], [], []>} : vector<16x8xf32>, vector<8x32xf32>, vector<16x32xf32> -> vector<16x32xf32>
    %112 = arith.addf %89, %111 : vector<16x32xf32>
    %113 = vector.extract_strided_slice %42 {offsets = [0, 0, 24], sizes = [2, 8, 8], strides = [1, 1, 1]} : vector<2x8x96xf32> to vector<2x8x8xf32>
    %114 = vector.extract_strided_slice %42 {offsets = [0, 0, 56], sizes = [2, 8, 8], strides = [1, 1, 1]} : vector<2x8x96xf32> to vector<2x8x8xf32>
    %115 = vector.extract_strided_slice %42 {offsets = [0, 0, 88], sizes = [2, 8, 8], strides = [1, 1, 1]} : vector<2x8x96xf32> to vector<2x8x8xf32>
    "tpu.trace_start"() <{level = 10 : i32, message = "bqd,bkd->bqk"}> : () -> ()
    %cst_55 = arith.constant dense<0.000000e+00> : vector<2x8x8xf32>
    %116 = tpu.matmul %113, %114, %cst_55 {dimension_numbers = #tpu.dot_dimension_numbers<[2], [2], [1], [1], [0, 0, 0, 1, 1, 1], [0], [0]>} : vector<2x8x8xf32>, vector<2x8x8xf32>, vector<2x8x8xf32> -> vector<2x8x8xf32>
    "tpu.trace_stop"() : () -> ()
    %cst_56 = arith.constant 0.353553385 : f32
    %117 = vector.broadcast %cst_56 : f32 to vector<2x8x8xf32>
    %118 = arith.mulf %116, %117 : vector<2x8x8xf32>
    %119 = vector.broadcast %34 : vector<2x1x8xf32> to vector<2x8x8xf32>
    %120 = arith.addf %118, %119 : vector<2x8x8xf32>
    %cst_57 = arith.constant dense<0xFF800000> : vector<2x8xf32>
    %121 = vector.multi_reduction <maximumf>, %120, %cst_57 [2] : vector<2x8x8xf32> to vector<2x8xf32>
    %122 = vector.shape_cast %121 : vector<2x8xf32> to vector<2x8x1xf32>
    %123 = vector.broadcast %122 : vector<2x8x1xf32> to vector<2x8x8xf32>
    %124 = arith.subf %120, %123 : vector<2x8x8xf32>
    %125 = math.exp %124 : vector<2x8x8xf32>
    %cst_58 = arith.constant dense<0.000000e+00> : vector<2x8xf32>
    %126 = vector.multi_reduction <add>, %125, %cst_58 [2] : vector<2x8x8xf32> to vector<2x8xf32>
    %127 = vector.shape_cast %126 : vector<2x8xf32> to vector<2x8x1xf32>
    %128 = vector.broadcast %127 : vector<2x8x1xf32> to vector<2x8x8xf32>
    %129 = arith.divf %125, %128 : vector<2x8x8xf32>
    "tpu.trace_start"() <{level = 10 : i32, message = "bqk,bkd->bqd"}> : () -> ()
    %cst_59 = arith.constant dense<0.000000e+00> : vector<2x8x8xf32>
    %130 = tpu.matmul %129, %115, %cst_59 {dimension_numbers = #tpu.dot_dimension_numbers<[2], [1], [1], [2], [0, 0, 0, 1, 1, 2], [0], [0]>} : vector<2x8x8xf32>, vector<2x8x8xf32>, vector<2x8x8xf32> -> vector<2x8x8xf32>
    "tpu.trace_stop"() : () -> ()
    %131 = vector.shape_cast %130 : vector<2x8x8xf32> to vector<16x8xf32>
    %c0_60 = arith.constant 0 : index
    %c0_61 = arith.constant 0 : index
    %c24 = arith.constant 24 : index
    %c0_62 = arith.constant 0 : index
    %132 = vector.load %arg7[%c0_60, %c0_61, %c24, %c0_62] : memref<1x2x32x32xf32, #tpu.memory_space<vmem>>, vector<1x1x8x32xf32>
    %133 = vector.shape_cast %132 : vector<1x1x8x32xf32> to vector<8x32xf32>
    %cst_63 = arith.constant dense<0.000000e+00> : vector<16x32xf32>
    %134 = tpu.matmul %131, %133, %cst_63 {dimension_numbers = #tpu.dot_dimension_numbers<[1], [0], [0], [1], [0, 0, 1, 1], [], []>} : vector<16x8xf32>, vector<8x32xf32>, vector<16x32xf32> -> vector<16x32xf32>
    %135 = arith.addf %112, %134 : vector<16x32xf32>
    %c0_64 = arith.constant 0 : index
    %c0_65 = arith.constant 0 : index
    %c0_66 = arith.constant 0 : index
    %c0_67 = arith.constant 0 : index
    %136 = vector.load %arg8[%c0_64, %c0_65, %c0_66, %c0_67] : memref<1x2x1x32xf32, #tpu.memory_space<vmem>>, vector<1x1x1x32xf32>
    %137 = vector.shape_cast %136 : vector<1x1x1x32xf32> to vector<1x32xf32>
    %138 = vector.broadcast %137 : vector<1x32xf32> to vector<16x32xf32>
    %139 = arith.addf %135, %138 : vector<16x32xf32>
    %140 = arith.addf %139, %27 : vector<16x32xf32>
    %c0_68 = arith.constant 0 : index
    %c0_69 = arith.constant 0 : index
    %c0_70 = arith.constant 0 : index
    %c0_71 = arith.constant 0 : index
    %141 = vector.load %arg9[%c0_68, %c0_69, %c0_70, %c0_71] : memref<1x2x1x32xf32, #tpu.memory_space<vmem>>, vector<1x1x1x32xf32>
    %142 = vector.shape_cast %141 : vector<1x1x1x32xf32> to vector<1x32xf32>
    %c0_72 = arith.constant 0 : index
    %c0_73 = arith.constant 0 : index
    %c0_74 = arith.constant 0 : index
    %c0_75 = arith.constant 0 : index
    %143 = vector.load %arg10[%c0_72, %c0_73, %c0_74, %c0_75] : memref<1x2x1x32xf32, #tpu.memory_space<vmem>>, vector<1x1x1x32xf32>
    %144 = vector.shape_cast %143 : vector<1x1x1x32xf32> to vector<1x32xf32>
    %cst_76 = arith.constant dense<0.000000e+00> : vector<16xf32>
    %145 = vector.multi_reduction <add>, %140, %cst_76 [1] : vector<16x32xf32> to vector<16xf32>
    %146 = vector.shape_cast %145 : vector<16xf32> to vector<16x1xf32>
    %cst_77 = arith.constant 3.200000e+01 : f32
    %147 = vector.broadcast %cst_77 : f32 to vector<16x1xf32>
    %148 = arith.divf %146, %147 : vector<16x1xf32>
    %149 = vector.broadcast %148 : vector<16x1xf32> to vector<16x32xf32>
    %150 = arith.subf %140, %149 : vector<16x32xf32>
    %151 = arith.mulf %150, %150 : vector<16x32xf32>
    %cst_78 = arith.constant dense<0.000000e+00> : vector<16xf32>
    %152 = vector.multi_reduction <add>, %151, %cst_78 [1] : vector<16x32xf32> to vector<16xf32>
    %153 = vector.shape_cast %152 : vector<16xf32> to vector<16x1xf32>
    %cst_79 = arith.constant 3.200000e+01 : f32
    %154 = vector.broadcast %cst_79 : f32 to vector<16x1xf32>
    %155 = arith.divf %153, %154 : vector<16x1xf32>
    %156 = vector.broadcast %148 : vector<16x1xf32> to vector<16x32xf32>
    %157 = arith.subf %140, %156 : vector<16x32xf32>
    %cst_80 = arith.constant 9.99999996E-13 : f32
    %158 = vector.broadcast %cst_80 : f32 to vector<16x1xf32>
    %159 = arith.addf %155, %158 : vector<16x1xf32>
    %160 = math.rsqrt %159 : vector<16x1xf32>
    %161 = vector.broadcast %160 : vector<16x1xf32> to vector<16x32xf32>
    %162 = arith.mulf %157, %161 : vector<16x32xf32>
    %163 = vector.broadcast %142 : vector<1x32xf32> to vector<16x32xf32>
    %164 = arith.mulf %162, %163 : vector<16x32xf32>
    %165 = vector.broadcast %144 : vector<1x32xf32> to vector<16x32xf32>
    %166 = arith.addf %164, %165 : vector<16x32xf32>
    %c0_81 = arith.constant 0 : index
    %c0_82 = arith.constant 0 : index
    %c0_83 = arith.constant 0 : index
    %c0_84 = arith.constant 0 : index
    %167 = vector.load %arg11[%c0_81, %c0_82, %c0_83, %c0_84] : memref<1x2x32x64xf32, #tpu.memory_space<vmem>>, vector<1x1x32x64xf32>
    %168 = vector.shape_cast %167 : vector<1x1x32x64xf32> to vector<32x64xf32>
    %cst_85 = arith.constant dense<0.000000e+00> : vector<16x64xf32>
    %169 = tpu.matmul %166, %168, %cst_85 {dimension_numbers = #tpu.dot_dimension_numbers<[1], [0], [0], [1], [0, 0, 1, 1], [], []>} : vector<16x32xf32>, vector<32x64xf32>, vector<16x64xf32> -> vector<16x64xf32>
    %c0_86 = arith.constant 0 : index
    %c0_87 = arith.constant 0 : index
    %c0_88 = arith.constant 0 : index
    %c0_89 = arith.constant 0 : index
    %170 = vector.load %arg12[%c0_86, %c0_87, %c0_88, %c0_89] : memref<1x2x1x64xf32, #tpu.memory_space<vmem>>, vector<1x1x1x64xf32>
    %171 = vector.shape_cast %170 : vector<1x1x1x64xf32> to vector<1x64xf32>
    %172 = vector.broadcast %171 : vector<1x64xf32> to vector<16x64xf32>
    %173 = arith.addf %169, %172 : vector<16x64xf32>
    %174 = arith.mulf %173, %173 : vector<16x64xf32>
    %175 = arith.mulf %173, %174 : vector<16x64xf32>
    %cst_90 = arith.constant 4.471500e-02 : f32
    %176 = vector.broadcast %cst_90 : f32 to vector<16x64xf32>
    %177 = arith.mulf %176, %175 : vector<16x64xf32>
    %178 = arith.addf %173, %177 : vector<16x64xf32>
    %cst_91 = arith.constant 0.797884583 : f32
    %179 = vector.broadcast %cst_91 : f32 to vector<16x64xf32>
    %180 = arith.mulf %179, %178 : vector<16x64xf32>
    %181 = math.tanh %180 : vector<16x64xf32>
    %cst_92 = arith.constant 1.000000e+00 : f32
    %182 = vector.broadcast %cst_92 : f32 to vector<16x64xf32>
    %183 = arith.addf %182, %181 : vector<16x64xf32>
    %cst_93 = arith.constant 5.000000e-01 : f32
    %184 = vector.broadcast %cst_93 : f32 to vector<16x64xf32>
    %185 = arith.mulf %184, %183 : vector<16x64xf32>
    %186 = arith.mulf %173, %185 : vector<16x64xf32>
    %c0_94 = arith.constant 0 : index
    %c0_95 = arith.constant 0 : index
    %c0_96 = arith.constant 0 : index
    %c0_97 = arith.constant 0 : index
    %187 = vector.load %arg13[%c0_94, %c0_95, %c0_96, %c0_97] : memref<1x2x64x32xf32, #tpu.memory_space<vmem>>, vector<1x1x64x32xf32>
    %188 = vector.shape_cast %187 : vector<1x1x64x32xf32> to vector<64x32xf32>
    %cst_98 = arith.constant dense<0.000000e+00> : vector<16x32xf32>
    %189 = tpu.matmul %186, %188, %cst_98 {dimension_numbers = #tpu.dot_dimension_numbers<[1], [0], [0], [1], [0, 0, 1, 1], [], []>} : vector<16x64xf32>, vector<64x32xf32>, vector<16x32xf32> -> vector<16x32xf32>
    %c0_99 = arith.constant 0 : index
    %c0_100 = arith.constant 0 : index
    %c0_101 = arith.constant 0 : index
    %c0_102 = arith.constant 0 : index
    %190 = vector.load %arg14[%c0_99, %c0_100, %c0_101, %c0_102] : memref<1x2x1x32xf32, #tpu.memory_space<vmem>>, vector<1x1x1x32xf32>
    %191 = vector.shape_cast %190 : vector<1x1x1x32xf32> to vector<1x32xf32>
    %192 = vector.broadcast %191 : vector<1x32xf32> to vector<16x32xf32>
    %193 = arith.addf %189, %192 : vector<16x32xf32>
    %194 = arith.addf %193, %166 : vector<16x32xf32>
    %c0_103 = arith.constant 0 : index
    %c0_104 = arith.constant 0 : index
    %c0_105 = arith.constant 0 : index
    %c0_106 = arith.constant 0 : index
    %195 = vector.load %arg15[%c0_103, %c0_104, %c0_105, %c0_106] : memref<1x2x1x32xf32, #tpu.memory_space<vmem>>, vector<1x1x1x32xf32>
    %196 = vector.shape_cast %195 : vector<1x1x1x32xf32> to vector<1x32xf32>
    %c0_107 = arith.constant 0 : index
    %c0_108 = arith.constant 0 : index
    %c0_109 = arith.constant 0 : index
    %c0_110 = arith.constant 0 : index
    %197 = vector.load %arg16[%c0_107, %c0_108, %c0_109, %c0_110] : memref<1x2x1x32xf32, #tpu.memory_space<vmem>>, vector<1x1x1x32xf32>
    %198 = vector.shape_cast %197 : vector<1x1x1x32xf32> to vector<1x32xf32>
    %cst_111 = arith.constant dense<0.000000e+00> : vector<16xf32>
    %199 = vector.multi_reduction <add>, %194, %cst_111 [1] : vector<16x32xf32> to vector<16xf32>
    %200 = vector.shape_cast %199 : vector<16xf32> to vector<16x1xf32>
    %cst_112 = arith.constant 3.200000e+01 : f32
    %201 = vector.broadcast %cst_112 : f32 to vector<16x1xf32>
    %202 = arith.divf %200, %201 : vector<16x1xf32>
    %203 = vector.broadcast %202 : vector<16x1xf32> to vector<16x32xf32>
    %204 = arith.subf %194, %203 : vector<16x32xf32>
    %205 = arith.mulf %204, %204 : vector<16x32xf32>
    %cst_113 = arith.constant dense<0.000000e+00> : vector<16xf32>
    %206 = vector.multi_reduction <add>, %205, %cst_113 [1] : vector<16x32xf32> to vector<16xf32>
    %207 = vector.shape_cast %206 : vector<16xf32> to vector<16x1xf32>
    %cst_114 = arith.constant 3.200000e+01 : f32
    %208 = vector.broadcast %cst_114 : f32 to vector<16x1xf32>
    %209 = arith.divf %207, %208 : vector<16x1xf32>
    %210 = vector.broadcast %202 : vector<16x1xf32> to vector<16x32xf32>
    %211 = arith.subf %194, %210 : vector<16x32xf32>
    %cst_115 = arith.constant 9.99999996E-13 : f32
    %212 = vector.broadcast %cst_115 : f32 to vector<16x1xf32>
    %213 = arith.addf %209, %212 : vector<16x1xf32>
    %214 = math.rsqrt %213 : vector<16x1xf32>
    %215 = vector.broadcast %214 : vector<16x1xf32> to vector<16x32xf32>
    %216 = arith.mulf %211, %215 : vector<16x32xf32>
    %217 = vector.broadcast %196 : vector<1x32xf32> to vector<16x32xf32>
    %218 = arith.mulf %216, %217 : vector<16x32xf32>
    %219 = vector.broadcast %198 : vector<1x32xf32> to vector<16x32xf32>
    %220 = arith.addf %218, %219 : vector<16x32xf32>
    %c0_116 = arith.constant 0 : index
    %c1 = arith.constant 1 : index
    %c0_117 = arith.constant 0 : index
    %c0_118 = arith.constant 0 : index
    %221 = vector.load %arg5[%c0_116, %c1, %c0_117, %c0_118] : memref<1x2x32x96xf32, #tpu.memory_space<vmem>>, vector<1x1x32x96xf32>
    %222 = vector.shape_cast %221 : vector<1x1x32x96xf32> to vector<32x96xf32>
    %cst_119 = arith.constant dense<0.000000e+00> : vector<16x96xf32>
    %223 = tpu.matmul %220, %222, %cst_119 {dimension_numbers = #tpu.dot_dimension_numbers<[1], [0], [0], [1], [0, 0, 1, 1], [], []>} : vector<16x32xf32>, vector<32x96xf32>, vector<16x96xf32> -> vector<16x96xf32>
    %c0_120 = arith.constant 0 : index
    %c1_121 = arith.constant 1 : index
    %c0_122 = arith.constant 0 : index
    %c0_123 = arith.constant 0 : index
    %224 = vector.load %arg6[%c0_120, %c1_121, %c0_122, %c0_123] : memref<1x2x1x96xf32, #tpu.memory_space<vmem>>, vector<1x1x1x96xf32>
    %225 = vector.shape_cast %224 : vector<1x1x1x96xf32> to vector<1x96xf32>
    %226 = vector.broadcast %225 : vector<1x96xf32> to vector<16x96xf32>
    %227 = arith.addf %223, %226 : vector<16x96xf32>
    %228 = vector.shape_cast %227 : vector<16x96xf32> to vector<2x8x96xf32>
    %cst_124 = arith.constant 0.000000e+00 : f32
    %229 = vector.broadcast %cst_124 : f32 to vector<16x32xf32>
    %230 = vector.extract_strided_slice %228 {offsets = [0, 0, 0], sizes = [2, 8, 8], strides = [1, 1, 1]} : vector<2x8x96xf32> to vector<2x8x8xf32>
    %231 = vector.extract_strided_slice %228 {offsets = [0, 0, 32], sizes = [2, 8, 8], strides = [1, 1, 1]} : vector<2x8x96xf32> to vector<2x8x8xf32>
    %232 = vector.extract_strided_slice %228 {offsets = [0, 0, 64], sizes = [2, 8, 8], strides = [1, 1, 1]} : vector<2x8x96xf32> to vector<2x8x8xf32>
    "tpu.trace_start"() <{level = 10 : i32, message = "bqd,bkd->bqk"}> : () -> ()
    %cst_125 = arith.constant dense<0.000000e+00> : vector<2x8x8xf32>
    %233 = tpu.matmul %230, %231, %cst_125 {dimension_numbers = #tpu.dot_dimension_numbers<[2], [2], [1], [1], [0, 0, 0, 1, 1, 1], [0], [0]>} : vector<2x8x8xf32>, vector<2x8x8xf32>, vector<2x8x8xf32> -> vector<2x8x8xf32>
    "tpu.trace_stop"() : () -> ()
    %cst_126 = arith.constant 0.353553385 : f32
    %234 = vector.broadcast %cst_126 : f32 to vector<2x8x8xf32>
    %235 = arith.mulf %233, %234 : vector<2x8x8xf32>
    %236 = vector.broadcast %34 : vector<2x1x8xf32> to vector<2x8x8xf32>
    %237 = arith.addf %235, %236 : vector<2x8x8xf32>
    %cst_127 = arith.constant dense<0xFF800000> : vector<2x8xf32>
    %238 = vector.multi_reduction <maximumf>, %237, %cst_127 [2] : vector<2x8x8xf32> to vector<2x8xf32>
    %239 = vector.shape_cast %238 : vector<2x8xf32> to vector<2x8x1xf32>
    %240 = vector.broadcast %239 : vector<2x8x1xf32> to vector<2x8x8xf32>
    %241 = arith.subf %237, %240 : vector<2x8x8xf32>
    %242 = math.exp %241 : vector<2x8x8xf32>
    %cst_128 = arith.constant dense<0.000000e+00> : vector<2x8xf32>
    %243 = vector.multi_reduction <add>, %242, %cst_128 [2] : vector<2x8x8xf32> to vector<2x8xf32>
    %244 = vector.shape_cast %243 : vector<2x8xf32> to vector<2x8x1xf32>
    %245 = vector.broadcast %244 : vector<2x8x1xf32> to vector<2x8x8xf32>
    %246 = arith.divf %242, %245 : vector<2x8x8xf32>
    "tpu.trace_start"() <{level = 10 : i32, message = "bqk,bkd->bqd"}> : () -> ()
    %cst_129 = arith.constant dense<0.000000e+00> : vector<2x8x8xf32>
    %247 = tpu.matmul %246, %232, %cst_129 {dimension_numbers = #tpu.dot_dimension_numbers<[2], [1], [1], [2], [0, 0, 0, 1, 1, 2], [0], [0]>} : vector<2x8x8xf32>, vector<2x8x8xf32>, vector<2x8x8xf32> -> vector<2x8x8xf32>
    "tpu.trace_stop"() : () -> ()
    %248 = vector.shape_cast %247 : vector<2x8x8xf32> to vector<16x8xf32>
    %c0_130 = arith.constant 0 : index
    %c1_131 = arith.constant 1 : index
    %c0_132 = arith.constant 0 : index
    %c0_133 = arith.constant 0 : index
    %249 = vector.load %arg7[%c0_130, %c1_131, %c0_132, %c0_133] : memref<1x2x32x32xf32, #tpu.memory_space<vmem>>, vector<1x1x8x32xf32>
    %250 = vector.shape_cast %249 : vector<1x1x8x32xf32> to vector<8x32xf32>
    %cst_134 = arith.constant dense<0.000000e+00> : vector<16x32xf32>
    %251 = tpu.matmul %248, %250, %cst_134 {dimension_numbers = #tpu.dot_dimension_numbers<[1], [0], [0], [1], [0, 0, 1, 1], [], []>} : vector<16x8xf32>, vector<8x32xf32>, vector<16x32xf32> -> vector<16x32xf32>
    %252 = arith.addf %229, %251 : vector<16x32xf32>
    %253 = vector.extract_strided_slice %228 {offsets = [0, 0, 8], sizes = [2, 8, 8], strides = [1, 1, 1]} : vector<2x8x96xf32> to vector<2x8x8xf32>
    %254 = vector.extract_strided_slice %228 {offsets = [0, 0, 40], sizes = [2, 8, 8], strides = [1, 1, 1]} : vector<2x8x96xf32> to vector<2x8x8xf32>
    %255 = vector.extract_strided_slice %228 {offsets = [0, 0, 72], sizes = [2, 8, 8], strides = [1, 1, 1]} : vector<2x8x96xf32> to vector<2x8x8xf32>
    "tpu.trace_start"() <{level = 10 : i32, message = "bqd,bkd->bqk"}> : () -> ()
    %cst_135 = arith.constant dense<0.000000e+00> : vector<2x8x8xf32>
    %256 = tpu.matmul %253, %254, %cst_135 {dimension_numbers = #tpu.dot_dimension_numbers<[2], [2], [1], [1], [0, 0, 0, 1, 1, 1], [0], [0]>} : vector<2x8x8xf32>, vector<2x8x8xf32>, vector<2x8x8xf32> -> vector<2x8x8xf32>
    "tpu.trace_stop"() : () -> ()
    %cst_136 = arith.constant 0.353553385 : f32
    %257 = vector.broadcast %cst_136 : f32 to vector<2x8x8xf32>
    %258 = arith.mulf %256, %257 : vector<2x8x8xf32>
    %259 = vector.broadcast %34 : vector<2x1x8xf32> to vector<2x8x8xf32>
    %260 = arith.addf %258, %259 : vector<2x8x8xf32>
    %cst_137 = arith.constant dense<0xFF800000> : vector<2x8xf32>
    %261 = vector.multi_reduction <maximumf>, %260, %cst_137 [2] : vector<2x8x8xf32> to vector<2x8xf32>
    %262 = vector.shape_cast %261 : vector<2x8xf32> to vector<2x8x1xf32>
    %263 = vector.broadcast %262 : vector<2x8x1xf32> to vector<2x8x8xf32>
    %264 = arith.subf %260, %263 : vector<2x8x8xf32>
    %265 = math.exp %264 : vector<2x8x8xf32>
    %cst_138 = arith.constant dense<0.000000e+00> : vector<2x8xf32>
    %266 = vector.multi_reduction <add>, %265, %cst_138 [2] : vector<2x8x8xf32> to vector<2x8xf32>
    %267 = vector.shape_cast %266 : vector<2x8xf32> to vector<2x8x1xf32>
    %268 = vector.broadcast %267 : vector<2x8x1xf32> to vector<2x8x8xf32>
    %269 = arith.divf %265, %268 : vector<2x8x8xf32>
    "tpu.trace_start"() <{level = 10 : i32, message = "bqk,bkd->bqd"}> : () -> ()
    %cst_139 = arith.constant dense<0.000000e+00> : vector<2x8x8xf32>
    %270 = tpu.matmul %269, %255, %cst_139 {dimension_numbers = #tpu.dot_dimension_numbers<[2], [1], [1], [2], [0, 0, 0, 1, 1, 2], [0], [0]>} : vector<2x8x8xf32>, vector<2x8x8xf32>, vector<2x8x8xf32> -> vector<2x8x8xf32>
    "tpu.trace_stop"() : () -> ()
    %271 = vector.shape_cast %270 : vector<2x8x8xf32> to vector<16x8xf32>
    %c0_140 = arith.constant 0 : index
    %c1_141 = arith.constant 1 : index
    %c8_142 = arith.constant 8 : index
    %c0_143 = arith.constant 0 : index
    %272 = vector.load %arg7[%c0_140, %c1_141, %c8_142, %c0_143] : memref<1x2x32x32xf32, #tpu.memory_space<vmem>>, vector<1x1x8x32xf32>
    %273 = vector.shape_cast %272 : vector<1x1x8x32xf32> to vector<8x32xf32>
    %cst_144 = arith.constant dense<0.000000e+00> : vector<16x32xf32>
    %274 = tpu.matmul %271, %273, %cst_144 {dimension_numbers = #tpu.dot_dimension_numbers<[1], [0], [0], [1], [0, 0, 1, 1], [], []>} : vector<16x8xf32>, vector<8x32xf32>, vector<16x32xf32> -> vector<16x32xf32>
    %275 = arith.addf %252, %274 : vector<16x32xf32>
    %276 = vector.extract_strided_slice %228 {offsets = [0, 0, 16], sizes = [2, 8, 8], strides = [1, 1, 1]} : vector<2x8x96xf32> to vector<2x8x8xf32>
    %277 = vector.extract_strided_slice %228 {offsets = [0, 0, 48], sizes = [2, 8, 8], strides = [1, 1, 1]} : vector<2x8x96xf32> to vector<2x8x8xf32>
    %278 = vector.extract_strided_slice %228 {offsets = [0, 0, 80], sizes = [2, 8, 8], strides = [1, 1, 1]} : vector<2x8x96xf32> to vector<2x8x8xf32>
    "tpu.trace_start"() <{level = 10 : i32, message = "bqd,bkd->bqk"}> : () -> ()
    %cst_145 = arith.constant dense<0.000000e+00> : vector<2x8x8xf32>
    %279 = tpu.matmul %276, %277, %cst_145 {dimension_numbers = #tpu.dot_dimension_numbers<[2], [2], [1], [1], [0, 0, 0, 1, 1, 1], [0], [0]>} : vector<2x8x8xf32>, vector<2x8x8xf32>, vector<2x8x8xf32> -> vector<2x8x8xf32>
    "tpu.trace_stop"() : () -> ()
    %cst_146 = arith.constant 0.353553385 : f32
    %280 = vector.broadcast %cst_146 : f32 to vector<2x8x8xf32>
    %281 = arith.mulf %279, %280 : vector<2x8x8xf32>
    %282 = vector.broadcast %34 : vector<2x1x8xf32> to vector<2x8x8xf32>
    %283 = arith.addf %281, %282 : vector<2x8x8xf32>
    %cst_147 = arith.constant dense<0xFF800000> : vector<2x8xf32>
    %284 = vector.multi_reduction <maximumf>, %283, %cst_147 [2] : vector<2x8x8xf32> to vector<2x8xf32>
    %285 = vector.shape_cast %284 : vector<2x8xf32> to vector<2x8x1xf32>
    %286 = vector.broadcast %285 : vector<2x8x1xf32> to vector<2x8x8xf32>
    %287 = arith.subf %283, %286 : vector<2x8x8xf32>
    %288 = math.exp %287 : vector<2x8x8xf32>
    %cst_148 = arith.constant dense<0.000000e+00> : vector<2x8xf32>
    %289 = vector.multi_reduction <add>, %288, %cst_148 [2] : vector<2x8x8xf32> to vector<2x8xf32>
    %290 = vector.shape_cast %289 : vector<2x8xf32> to vector<2x8x1xf32>
    %291 = vector.broadcast %290 : vector<2x8x1xf32> to vector<2x8x8xf32>
    %292 = arith.divf %288, %291 : vector<2x8x8xf32>
    "tpu.trace_start"() <{level = 10 : i32, message = "bqk,bkd->bqd"}> : () -> ()
    %cst_149 = arith.constant dense<0.000000e+00> : vector<2x8x8xf32>
    %293 = tpu.matmul %292, %278, %cst_149 {dimension_numbers = #tpu.dot_dimension_numbers<[2], [1], [1], [2], [0, 0, 0, 1, 1, 2], [0], [0]>} : vector<2x8x8xf32>, vector<2x8x8xf32>, vector<2x8x8xf32> -> vector<2x8x8xf32>
    "tpu.trace_stop"() : () -> ()
    %294 = vector.shape_cast %293 : vector<2x8x8xf32> to vector<16x8xf32>
    %c0_150 = arith.constant 0 : index
    %c1_151 = arith.constant 1 : index
    %c16_152 = arith.constant 16 : index
    %c0_153 = arith.constant 0 : index
    %295 = vector.load %arg7[%c0_150, %c1_151, %c16_152, %c0_153] : memref<1x2x32x32xf32, #tpu.memory_space<vmem>>, vector<1x1x8x32xf32>
    %296 = vector.shape_cast %295 : vector<1x1x8x32xf32> to vector<8x32xf32>
    %cst_154 = arith.constant dense<0.000000e+00> : vector<16x32xf32>
    %297 = tpu.matmul %294, %296, %cst_154 {dimension_numbers = #tpu.dot_dimension_numbers<[1], [0], [0], [1], [0, 0, 1, 1], [], []>} : vector<16x8xf32>, vector<8x32xf32>, vector<16x32xf32> -> vector<16x32xf32>
    %298 = arith.addf %275, %297 : vector<16x32xf32>
    %299 = vector.extract_strided_slice %228 {offsets = [0, 0, 24], sizes = [2, 8, 8], strides = [1, 1, 1]} : vector<2x8x96xf32> to vector<2x8x8xf32>
    %300 = vector.extract_strided_slice %228 {offsets = [0, 0, 56], sizes = [2, 8, 8], strides = [1, 1, 1]} : vector<2x8x96xf32> to vector<2x8x8xf32>
    %301 = vector.extract_strided_slice %228 {offsets = [0, 0, 88], sizes = [2, 8, 8], strides = [1, 1, 1]} : vector<2x8x96xf32> to vector<2x8x8xf32>
    "tpu.trace_start"() <{level = 10 : i32, message = "bqd,bkd->bqk"}> : () -> ()
    %cst_155 = arith.constant dense<0.000000e+00> : vector<2x8x8xf32>
    %302 = tpu.matmul %299, %300, %cst_155 {dimension_numbers = #tpu.dot_dimension_numbers<[2], [2], [1], [1], [0, 0, 0, 1, 1, 1], [0], [0]>} : vector<2x8x8xf32>, vector<2x8x8xf32>, vector<2x8x8xf32> -> vector<2x8x8xf32>
    "tpu.trace_stop"() : () -> ()
    %cst_156 = arith.constant 0.353553385 : f32
    %303 = vector.broadcast %cst_156 : f32 to vector<2x8x8xf32>
    %304 = arith.mulf %302, %303 : vector<2x8x8xf32>
    %305 = vector.broadcast %34 : vector<2x1x8xf32> to vector<2x8x8xf32>
    %306 = arith.addf %304, %305 : vector<2x8x8xf32>
    %cst_157 = arith.constant dense<0xFF800000> : vector<2x8xf32>
    %307 = vector.multi_reduction <maximumf>, %306, %cst_157 [2] : vector<2x8x8xf32> to vector<2x8xf32>
    %308 = vector.shape_cast %307 : vector<2x8xf32> to vector<2x8x1xf32>
    %309 = vector.broadcast %308 : vector<2x8x1xf32> to vector<2x8x8xf32>
    %310 = arith.subf %306, %309 : vector<2x8x8xf32>
    %311 = math.exp %310 : vector<2x8x8xf32>
    %cst_158 = arith.constant dense<0.000000e+00> : vector<2x8xf32>
    %312 = vector.multi_reduction <add>, %311, %cst_158 [2] : vector<2x8x8xf32> to vector<2x8xf32>
    %313 = vector.shape_cast %312 : vector<2x8xf32> to vector<2x8x1xf32>
    %314 = vector.broadcast %313 : vector<2x8x1xf32> to vector<2x8x8xf32>
    %315 = arith.divf %311, %314 : vector<2x8x8xf32>
    "tpu.trace_start"() <{level = 10 : i32, message = "bqk,bkd->bqd"}> : () -> ()
    %cst_159 = arith.constant dense<0.000000e+00> : vector<2x8x8xf32>
    %316 = tpu.matmul %315, %301, %cst_159 {dimension_numbers = #tpu.dot_dimension_numbers<[2], [1], [1], [2], [0, 0, 0, 1, 1, 2], [0], [0]>} : vector<2x8x8xf32>, vector<2x8x8xf32>, vector<2x8x8xf32> -> vector<2x8x8xf32>
    "tpu.trace_stop"() : () -> ()
    %317 = vector.shape_cast %316 : vector<2x8x8xf32> to vector<16x8xf32>
    %c0_160 = arith.constant 0 : index
    %c1_161 = arith.constant 1 : index
    %c24_162 = arith.constant 24 : index
    %c0_163 = arith.constant 0 : index
    %318 = vector.load %arg7[%c0_160, %c1_161, %c24_162, %c0_163] : memref<1x2x32x32xf32, #tpu.memory_space<vmem>>, vector<1x1x8x32xf32>
    %319 = vector.shape_cast %318 : vector<1x1x8x32xf32> to vector<8x32xf32>
    %cst_164 = arith.constant dense<0.000000e+00> : vector<16x32xf32>
    %320 = tpu.matmul %317, %319, %cst_164 {dimension_numbers = #tpu.dot_dimension_numbers<[1], [0], [0], [1], [0, 0, 1, 1], [], []>} : vector<16x8xf32>, vector<8x32xf32>, vector<16x32xf32> -> vector<16x32xf32>
    %321 = arith.addf %298, %320 : vector<16x32xf32>
    %c0_165 = arith.constant 0 : index
    %c1_166 = arith.constant 1 : index
    %c0_167 = arith.constant 0 : index
    %c0_168 = arith.constant 0 : index
    %322 = vector.load %arg8[%c0_165, %c1_166, %c0_167, %c0_168] : memref<1x2x1x32xf32, #tpu.memory_space<vmem>>, vector<1x1x1x32xf32>
    %323 = vector.shape_cast %322 : vector<1x1x1x32xf32> to vector<1x32xf32>
    %324 = vector.broadcast %323 : vector<1x32xf32> to vector<16x32xf32>
    %325 = arith.addf %321, %324 : vector<16x32xf32>
    %326 = arith.addf %325, %220 : vector<16x32xf32>
    %c0_169 = arith.constant 0 : index
    %c1_170 = arith.constant 1 : index
    %c0_171 = arith.constant 0 : index
    %c0_172 = arith.constant 0 : index
    %327 = vector.load %arg9[%c0_169, %c1_170, %c0_171, %c0_172] : memref<1x2x1x32xf32, #tpu.memory_space<vmem>>, vector<1x1x1x32xf32>
    %328 = vector.shape_cast %327 : vector<1x1x1x32xf32> to vector<1x32xf32>
    %c0_173 = arith.constant 0 : index
    %c1_174 = arith.constant 1 : index
    %c0_175 = arith.constant 0 : index
    %c0_176 = arith.constant 0 : index
    %329 = vector.load %arg10[%c0_173, %c1_174, %c0_175, %c0_176] : memref<1x2x1x32xf32, #tpu.memory_space<vmem>>, vector<1x1x1x32xf32>
    %330 = vector.shape_cast %329 : vector<1x1x1x32xf32> to vector<1x32xf32>
    %cst_177 = arith.constant dense<0.000000e+00> : vector<16xf32>
    %331 = vector.multi_reduction <add>, %326, %cst_177 [1] : vector<16x32xf32> to vector<16xf32>
    %332 = vector.shape_cast %331 : vector<16xf32> to vector<16x1xf32>
    %cst_178 = arith.constant 3.200000e+01 : f32
    %333 = vector.broadcast %cst_178 : f32 to vector<16x1xf32>
    %334 = arith.divf %332, %333 : vector<16x1xf32>
    %335 = vector.broadcast %334 : vector<16x1xf32> to vector<16x32xf32>
    %336 = arith.subf %326, %335 : vector<16x32xf32>
    %337 = arith.mulf %336, %336 : vector<16x32xf32>
    %cst_179 = arith.constant dense<0.000000e+00> : vector<16xf32>
    %338 = vector.multi_reduction <add>, %337, %cst_179 [1] : vector<16x32xf32> to vector<16xf32>
    %339 = vector.shape_cast %338 : vector<16xf32> to vector<16x1xf32>
    %cst_180 = arith.constant 3.200000e+01 : f32
    %340 = vector.broadcast %cst_180 : f32 to vector<16x1xf32>
    %341 = arith.divf %339, %340 : vector<16x1xf32>
    %342 = vector.broadcast %334 : vector<16x1xf32> to vector<16x32xf32>
    %343 = arith.subf %326, %342 : vector<16x32xf32>
    %cst_181 = arith.constant 9.99999996E-13 : f32
    %344 = vector.broadcast %cst_181 : f32 to vector<16x1xf32>
    %345 = arith.addf %341, %344 : vector<16x1xf32>
    %346 = math.rsqrt %345 : vector<16x1xf32>
    %347 = vector.broadcast %346 : vector<16x1xf32> to vector<16x32xf32>
    %348 = arith.mulf %343, %347 : vector<16x32xf32>
    %349 = vector.broadcast %328 : vector<1x32xf32> to vector<16x32xf32>
    %350 = arith.mulf %348, %349 : vector<16x32xf32>
    %351 = vector.broadcast %330 : vector<1x32xf32> to vector<16x32xf32>
    %352 = arith.addf %350, %351 : vector<16x32xf32>
    %c0_182 = arith.constant 0 : index
    %c1_183 = arith.constant 1 : index
    %c0_184 = arith.constant 0 : index
    %c0_185 = arith.constant 0 : index
    %353 = vector.load %arg11[%c0_182, %c1_183, %c0_184, %c0_185] : memref<1x2x32x64xf32, #tpu.memory_space<vmem>>, vector<1x1x32x64xf32>
    %354 = vector.shape_cast %353 : vector<1x1x32x64xf32> to vector<32x64xf32>
    %cst_186 = arith.constant dense<0.000000e+00> : vector<16x64xf32>
    %355 = tpu.matmul %352, %354, %cst_186 {dimension_numbers = #tpu.dot_dimension_numbers<[1], [0], [0], [1], [0, 0, 1, 1], [], []>} : vector<16x32xf32>, vector<32x64xf32>, vector<16x64xf32> -> vector<16x64xf32>
    %c0_187 = arith.constant 0 : index
    %c1_188 = arith.constant 1 : index
    %c0_189 = arith.constant 0 : index
    %c0_190 = arith.constant 0 : index
    %356 = vector.load %arg12[%c0_187, %c1_188, %c0_189, %c0_190] : memref<1x2x1x64xf32, #tpu.memory_space<vmem>>, vector<1x1x1x64xf32>
    %357 = vector.shape_cast %356 : vector<1x1x1x64xf32> to vector<1x64xf32>
    %358 = vector.broadcast %357 : vector<1x64xf32> to vector<16x64xf32>
    %359 = arith.addf %355, %358 : vector<16x64xf32>
    %360 = arith.mulf %359, %359 : vector<16x64xf32>
    %361 = arith.mulf %359, %360 : vector<16x64xf32>
    %cst_191 = arith.constant 4.471500e-02 : f32
    %362 = vector.broadcast %cst_191 : f32 to vector<16x64xf32>
    %363 = arith.mulf %362, %361 : vector<16x64xf32>
    %364 = arith.addf %359, %363 : vector<16x64xf32>
    %cst_192 = arith.constant 0.797884583 : f32
    %365 = vector.broadcast %cst_192 : f32 to vector<16x64xf32>
    %366 = arith.mulf %365, %364 : vector<16x64xf32>
    %367 = math.tanh %366 : vector<16x64xf32>
    %cst_193 = arith.constant 1.000000e+00 : f32
    %368 = vector.broadcast %cst_193 : f32 to vector<16x64xf32>
    %369 = arith.addf %368, %367 : vector<16x64xf32>
    %cst_194 = arith.constant 5.000000e-01 : f32
    %370 = vector.broadcast %cst_194 : f32 to vector<16x64xf32>
    %371 = arith.mulf %370, %369 : vector<16x64xf32>
    %372 = arith.mulf %359, %371 : vector<16x64xf32>
    %c0_195 = arith.constant 0 : index
    %c1_196 = arith.constant 1 : index
    %c0_197 = arith.constant 0 : index
    %c0_198 = arith.constant 0 : index
    %373 = vector.load %arg13[%c0_195, %c1_196, %c0_197, %c0_198] : memref<1x2x64x32xf32, #tpu.memory_space<vmem>>, vector<1x1x64x32xf32>
    %374 = vector.shape_cast %373 : vector<1x1x64x32xf32> to vector<64x32xf32>
    %cst_199 = arith.constant dense<0.000000e+00> : vector<16x32xf32>
    %375 = tpu.matmul %372, %374, %cst_199 {dimension_numbers = #tpu.dot_dimension_numbers<[1], [0], [0], [1], [0, 0, 1, 1], [], []>} : vector<16x64xf32>, vector<64x32xf32>, vector<16x32xf32> -> vector<16x32xf32>
    %c0_200 = arith.constant 0 : index
    %c1_201 = arith.constant 1 : index
    %c0_202 = arith.constant 0 : index
    %c0_203 = arith.constant 0 : index
    %376 = vector.load %arg14[%c0_200, %c1_201, %c0_202, %c0_203] : memref<1x2x1x32xf32, #tpu.memory_space<vmem>>, vector<1x1x1x32xf32>
    %377 = vector.shape_cast %376 : vector<1x1x1x32xf32> to vector<1x32xf32>
    %378 = vector.broadcast %377 : vector<1x32xf32> to vector<16x32xf32>
    %379 = arith.addf %375, %378 : vector<16x32xf32>
    %380 = arith.addf %379, %352 : vector<16x32xf32>
    %c0_204 = arith.constant 0 : index
    %c1_205 = arith.constant 1 : index
    %c0_206 = arith.constant 0 : index
    %c0_207 = arith.constant 0 : index
    %381 = vector.load %arg15[%c0_204, %c1_205, %c0_206, %c0_207] : memref<1x2x1x32xf32, #tpu.memory_space<vmem>>, vector<1x1x1x32xf32>
    %382 = vector.shape_cast %381 : vector<1x1x1x32xf32> to vector<1x32xf32>
    %c0_208 = arith.constant 0 : index
    %c1_209 = arith.constant 1 : index
    %c0_210 = arith.constant 0 : index
    %c0_211 = arith.constant 0 : index
    %383 = vector.load %arg16[%c0_208, %c1_209, %c0_210, %c0_211] : memref<1x2x1x32xf32, #tpu.memory_space<vmem>>, vector<1x1x1x32xf32>
    %384 = vector.shape_cast %383 : vector<1x1x1x32xf32> to vector<1x32xf32>
    %cst_212 = arith.constant dense<0.000000e+00> : vector<16xf32>
    %385 = vector.multi_reduction <add>, %380, %cst_212 [1] : vector<16x32xf32> to vector<16xf32>
    %386 = vector.shape_cast %385 : vector<16xf32> to vector<16x1xf32>
    %cst_213 = arith.constant 3.200000e+01 : f32
    %387 = vector.broadcast %cst_213 : f32 to vector<16x1xf32>
    %388 = arith.divf %386, %387 : vector<16x1xf32>
    %389 = vector.broadcast %388 : vector<16x1xf32> to vector<16x32xf32>
    %390 = arith.subf %380, %389 : vector<16x32xf32>
    %391 = arith.mulf %390, %390 : vector<16x32xf32>
    %cst_214 = arith.constant dense<0.000000e+00> : vector<16xf32>
    %392 = vector.multi_reduction <add>, %391, %cst_214 [1] : vector<16x32xf32> to vector<16xf32>
    %393 = vector.shape_cast %392 : vector<16xf32> to vector<16x1xf32>
    %cst_215 = arith.constant 3.200000e+01 : f32
    %394 = vector.broadcast %cst_215 : f32 to vector<16x1xf32>
    %395 = arith.divf %393, %394 : vector<16x1xf32>
    %396 = vector.broadcast %388 : vector<16x1xf32> to vector<16x32xf32>
    %397 = arith.subf %380, %396 : vector<16x32xf32>
    %cst_216 = arith.constant 9.99999996E-13 : f32
    %398 = vector.broadcast %cst_216 : f32 to vector<16x1xf32>
    %399 = arith.addf %395, %398 : vector<16x1xf32>
    %400 = math.rsqrt %399 : vector<16x1xf32>
    %401 = vector.broadcast %400 : vector<16x1xf32> to vector<16x32xf32>
    %402 = arith.mulf %397, %401 : vector<16x32xf32>
    %403 = vector.broadcast %382 : vector<1x32xf32> to vector<16x32xf32>
    %404 = arith.mulf %402, %403 : vector<16x32xf32>
    %405 = vector.broadcast %384 : vector<1x32xf32> to vector<16x32xf32>
    %406 = arith.addf %404, %405 : vector<16x32xf32>
    %407 = vector.shape_cast %406 : vector<16x32xf32> to vector<2x8x32xf32>
    %408 = vector.extract_strided_slice %407 {offsets = [0, 0, 0], sizes = [2, 1, 32], strides = [1, 1, 1]} : vector<2x8x32xf32> to vector<2x1x32xf32>
    %409 = vector.shape_cast %408 : vector<2x1x32xf32> to vector<2x32xf32>
    %c0_217 = arith.constant 0 : index
    %c0_218 = arith.constant 0 : index
    %c0_219 = arith.constant 0 : index
    %410 = vector.load %arg17[%c0_217, %c0_218, %c0_219] : memref<1x32x32xf32, #tpu.memory_space<vmem>>, vector<1x32x32xf32>
    %411 = vector.shape_cast %410 : vector<1x32x32xf32> to vector<32x32xf32>
    %cst_220 = arith.constant dense<0.000000e+00> : vector<2x32xf32>
    %412 = tpu.matmul %409, %411, %cst_220 {dimension_numbers = #tpu.dot_dimension_numbers<[1], [0], [0], [1], [0, 0, 1, 1], [], []>} : vector<2x32xf32>, vector<32x32xf32>, vector<2x32xf32> -> vector<2x32xf32>
    %c0_221 = arith.constant 0 : index
    %c0_222 = arith.constant 0 : index
    %c0_223 = arith.constant 0 : index
    %413 = vector.load %arg18[%c0_221, %c0_222, %c0_223] : memref<1x1x32xf32, #tpu.memory_space<vmem>>, vector<1x1x32xf32>
    %414 = vector.shape_cast %413 : vector<1x1x32xf32> to vector<1x32xf32>
    %415 = vector.broadcast %414 : vector<1x32xf32> to vector<2x32xf32>
    %416 = arith.addf %412, %415 : vector<2x32xf32>
    %417 = math.tanh %416 : vector<2x32xf32>
    %c0_224 = arith.constant 0 : index
    %c0_225 = arith.constant 0 : index
    %c0_226 = arith.constant 0 : index
    %418 = vector.load %arg19[%c0_224, %c0_225, %c0_226] : memref<1x2x32xf32, #tpu.memory_space<vmem>>, vector<1x2x32xf32>
    %419 = vector.shape_cast %418 : vector<1x2x32xf32> to vector<2x32xf32>
    %420 = vector.shape_cast %417 : vector<2x32xf32> to vector<1x2x32xf32>
    tpu.vector_store %arg19[%c0_224, %c0_225, %c0_226], %420 {strides = array<i32>} : memref<1x2x32xf32, #tpu.memory_space<vmem>>, vector<1x2x32xf32>,
    return
  }
  func.func @transform_0(%arg0: i32) -> (i32, i32, i32) {
    %c0_i32 = arith.constant 0 : i32
    %c0_i32_0 = arith.constant 0 : i32
    %c0_i32_1 = arith.constant 0 : i32
    return %arg0, %c0_i32, %c0_i32_0 : i32, i32, i32
  }
  func.func @transform_1(%arg0: i32) -> (i32, i32, i32) {
    %c0_i32 = arith.constant 0 : i32
    %c0_i32_0 = arith.constant 0 : i32
    %c0_i32_1 = arith.constant 0 : i32
    return %arg0, %c0_i32, %c0_i32_0 : i32, i32, i32
  }
  func.func @transform_2(%arg0: i32) -> (i32, i32, i32) {
    %c0_i32 = arith.constant 0 : i32
    %c0_i32_0 = arith.constant 0 : i32
    %c0_i32_1 = arith.constant 0 : i32
    return %arg0, %c0_i32, %c0_i32_0 : i32, i32, i32
  }
  func.func @transform_3(%arg0: i32) -> (i32, i32, i32) {
    %c0_i32 = arith.constant 0 : i32
    %c0_i32_0 = arith.constant 0 : i32
    %c0_i32_1 = arith.constant 0 : i32
    return %arg0, %c0_i32, %c0_i32_0 : i32, i32, i32
  }
  func.func @transform_4(%arg0: i32) -> (i32, i32, i32, i32) {
    %c0_i32 = arith.constant 0 : i32
    %c0_i32_0 = arith.constant 0 : i32
    %c0_i32_1 = arith.constant 0 : i32
    %c0_i32_2 = arith.constant 0 : i32
    return %arg0, %c0_i32, %c0_i32_0, %c0_i32_1 : i32, i32, i32, i32
  }
  func.func @transform_5(%arg0: i32) -> (i32, i32, i32, i32) {
    %c0_i32 = arith.constant 0 : i32
    %c0_i32_0 = arith.constant 0 : i32
    %c0_i32_1 = arith.constant 0 : i32
    %c0_i32_2 = arith.constant 0 : i32
    return %arg0, %c0_i32, %c0_i32_0, %c0_i32_1 : i32, i32, i32, i32
  }
  func.func @transform_6(%arg0: i32) -> (i32, i32, i32, i32) {
    %c0_i32 = arith.constant 0 : i32
    %c0_i32_0 = arith.constant 0 : i32
    %c0_i32_1 = arith.constant 0 : i32
    %c0_i32_2 = arith.constant 0 : i32
    return %arg0, %c0_i32, %c0_i32_0, %c0_i32_1 : i32, i32, i32, i32
  }
  func.func @transform_7(%arg0: i32) -> (i32, i32, i32, i32) {
    %c0_i32 = arith.constant 0 : i32
    %c0_i32_0 = arith.constant 0 : i32
    %c0_i32_1 = arith.constant 0 : i32
    %c0_i32_2 = arith.constant 0 : i32
    return %arg0, %c0_i32, %c0_i32_0, %c0_i32_1 : i32, i32, i32, i32
  }
  func.func @transform_8(%arg0: i32) -> (i32, i32, i32, i32) {
    %c0_i32 = arith.constant 0 : i32
    %c0_i32_0 = arith.constant 0 : i32
    %c0_i32_1 = arith.constant 0 : i32
    %c0_i32_2 = arith.constant 0 : i32
    return %arg0, %c0_i32, %c0_i32_0, %c0_i32_1 : i32, i32, i32, i32
  }
  func.func @transform_9(%arg0: i32) -> (i32, i32, i32, i32) {
    %c0_i32 = arith.constant 0 : i32
    %c0_i32_0 = arith.constant 0 : i32
    %c0_i32_1 = arith.constant 0 : i32
    %c0_i32_2 = arith.constant 0 : i32
    return %arg0, %c0_i32, %c0_i32_0, %c0_i32_1 : i32, i32, i32, i32
  }
  func.func @transform_10(%arg0: i32) -> (i32, i32, i32, i32) {
    %c0_i32 = arith.constant 0 : i32
    %c0_i32_0 = arith.constant 0 : i32
    %c0_i32_1 = arith.constant 0 : i32
    %c0_i32_2 = arith.constant 0 : i32
    return %arg0, %c0_i32, %c0_i32_0, %c0_i32_1 : i32, i32, i32, i32
  }
  func.func @transform_11(%arg0: i32) -> (i32, i32, i32, i32) {
    %c0_i32 = arith.constant 0 : i32
    %c0_i32_0 = arith.constant 0 : i32
    %c0_i32_1 = arith.constant 0 : i32
    %c0_i32_2 = arith.constant 0 : i32
    return %arg0, %c0_i32, %c0_i32_0, %c0_i32_1 : i32, i32, i32, i32
  }
  func.func @transform_12(%arg0: i32) -> (i32, i32, i32, i32) {
    %c0_i32 = arith.constant 0 : i32
    %c0_i32_0 = arith.constant 0 : i32
    %c0_i32_1 = arith.constant 0 : i32
    %c0_i32_2 = arith.constant 0 : i32
    return %arg0, %c0_i32, %c0_i32_0, %c0_i32_1 : i32, i32, i32, i32
  }
  func.func @transform_13(%arg0: i32) -> (i32, i32, i32, i32) {
    %c0_i32 = arith.constant 0 : i32
    %c0_i32_0 = arith.constant 0 : i32
    %c0_i32_1 = arith.constant 0 : i32
    %c0_i32_2 = arith.constant 0 : i32
    return %arg0, %c0_i32, %c0_i32_0, %c0_i32_1 : i32, i32, i32, i32
  }
  func.func @transform_14(%arg0: i32) -> (i32, i32, i32, i32) {
    %c0_i32 = arith.constant 0 : i32
    %c0_i32_0 = arith.constant 0 : i32
    %c0_i32_1 = arith.constant 0 : i32
    %c0_i32_2 = arith.constant 0 : i32
    return %arg0, %c0_i32, %c0_i32_0, %c0_i32_1 : i32, i32, i32, i32
  }
  func.func @transform_15(%arg0: i32) -> (i32, i32, i32, i32) {
    %c0_i32 = arith.constant 0 : i32
    %c0_i32_0 = arith.constant 0 : i32
    %c0_i32_1 = arith.constant 0 : i32
    %c0_i32_2 = arith.constant 0 : i32
    return %arg0, %c0_i32, %c0_i32_0, %c0_i32_1 : i32, i32, i32, i32
  }
  func.func @transform_16(%arg0: i32) -> (i32, i32, i32) {
    %c0_i32 = arith.constant 0 : i32
    %c0_i32_0 = arith.constant 0 : i32
    %c0_i32_1 = arith.constant 0 : i32
    return %arg0, %c0_i32, %c0_i32_0 : i32, i32, i32
  }
  func.func @transform_17(%arg0: i32) -> (i32, i32, i32) {
    %c0_i32 = arith.constant 0 : i32
    %c0_i32_0 = arith.constant 0 : i32
    %c0_i32_1 = arith.constant 0 : i32
    return %arg0, %c0_i32, %c0_i32_0 : i32, i32, i32
  }
  func.func @transform_18(%arg0: i32) -> (i32, i32, i32) {
    %c0_i32 = arith.constant 0 : i32
    %c0_i32_0 = arith.constant 0 : i32
    %c0_i32_1 = arith.constant 0 : i32
    return %arg0, %c0_i32, %c0_i32_0 : i32, i32, i32
  }
}

</mosaic_0001>

<bundles_post_ra>
// kernel: tpu_custom_call.1
= control target key start
LH: loop header
LB: loop body
LE: loop exit
PB: predicated region body
PF: predicated region fallthrough
CT: control target
= control target key end

     0   :  { %s7762_s0 = inlined_call_operand.hbm [shape: f32[2,16,32], index: 0, kind: input, shape index: {}]   ;;  %s7763_s1 = inlined_call_operand.hbm [shape: f32[2,2,8], index: 1, kind: input, shape index: {}]   ;;  %s7764_s2 = inlined_call_operand.hbm [shape: f32[2,1,32], index: 2, kind: input, shape index: {}]   ;;  %s7765_s3 = inlined_call_operand.hbm [shape: f32[2,1,32], index: 3, kind: input, shape index: {}]   ;;  %s7766_s4 = inlined_call_operand.vmem [shape: f32[2,2,32,96], index: 4, kind: input, shape index: {}]   ;;  %s7767_s5 = inlined_call_operand.vmem [shape: f32[2,2,1,96], index: 5, kind: input, shape index: {}]   ;;  %s7768_s6 = inlined_call_operand.vmem [shape: f32[2,2,32,32], index: 6, kind: input, shape index: {}]   ;;  %s7769_s7 = inlined_call_operand.vmem [shape: f32[2,2,1,32], index: 7, kind: input, shape index: {}]   ;;  %s7770_s8 = inlined_call_operand.hbm [shape: f32[2,2,1,32], index: 8, kind: input, shape index: {}]   ;;  %s7771_s9 = inlined_call_operand.vmem [shape: f32[2,2,1,32], index: 9, kind: input, shape index: {}]   ;;  %s7772_s10 = inlined_call_operand.vmem [shape: f32[2,2,32,64], index: 10, kind: input, shape index: {}]   ;;  %s7773_s11 = inlined_call_operand.vmem [shape: f32[2,2,1,64], index: 11, kind: input, shape index: {}]   ;;  %s7774_s12 = inlined_call_operand.vmem [shape: f32[2,2,64,32], index: 12, kind: input, shape index: {}]   ;;  %s7775_s13 = inlined_call_operand.vmem [shape: f32[2,2,1,32], index: 13, kind: input, shape index: {}]   ;;  %s7776_s14 = inlined_call_operand.hbm [shape: f32[2,2,1,32], index: 14, kind: input, shape index: {}]   ;;  %s7777_s15 = inlined_call_operand.vmem [shape: f32[2,2,1,32], index: 15, kind: input, shape index: {}]   ;;  %s7778_s16 = inlined_call_operand.hbm [shape: f32[2,32,32], index: 16, kind: input, shape index: {}]   ;;  %s7779_s17 = inlined_call_operand.vmem [shape: f32[2,1,32], index: 17, kind: input, shape index: {}]   ;;  %s7780_s18 = inlined_call_operand.hbm [shape: f32[2,2,32], index: 18, kind: output, shape index: {}]  }
   0x1   :  { %7809 = sst [smem:[#allocation26_spill]] %s7762_s0 }
   0x2   :  { %7810 = sst [smem:[#allocation27_spill]] %s7763_s1 }
   0x3   :  { %7811 = sst [smem:[#allocation28_spill]] %s7764_s2 }
   0x4   :  { %7812 = sst [smem:[#allocation29_spill]] %s7765_s3 }
   0x5   :  { %7813 = sst [smem:[#allocation30_spill]] %s7766_s4 }
   0x6   :  { %7814 = sst [smem:[#allocation31_spill]] %s7767_s5 }
   0x7   :  { %7815 = sst [smem:[#allocation32_spill]] %s7768_s6 }
   0x8   :  { %7816 = sst [smem:[#allocation33_spill]] %s7769_s7 }
   0x9   :  { %7817 = sst [smem:[#allocation34_spill]] %s7771_s9 }
   0xa   :  { %7818 = sst [smem:[#allocation35_spill]] %s7772_s10 }
   0xb   :  { %7819 = sst [smem:[#allocation36_spill]] %s7773_s11 }
   0xc   :  { %7820 = sst [smem:[#allocation37_spill]] %s7774_s12 }
   0xd   :  { %7821 = sst [smem:[#allocation38_spill]] %s7775_s13 }
   0xe   :  { %7822 = sst [smem:[#allocation39_spill]] %s7777_s15 }
   0xf   :  { %7823 = sst [smem:[#allocation40_spill]] %s7779_s17 }
  0x10   :  { %7824 = sst [smem:[#allocation41_spill]] %s7780_s18 }
  0x11   :  { %23 = vsyncpa [#allocation3], 0 }
  0x12   :  { %25 = vsyncpa [#allocation3 + $0x1], 0 }
  0x13   :  { %26 = vsyncpa [#allocation6], 0 }
  0x14   :  { %28 = vsyncpa [#allocation6 + $0x1], 0 }
  0x15   :  { %29 = vsyncpa [#allocation9], 0 }
  0x16   :  { %31 = vsyncpa [#allocation9 + $0x1], 0 }
  0x17   :  { %32 = vsyncpa [#allocation12], 0 }
  0x18   :  { %34 = vsyncpa [#allocation12 + $0x1], 0 }
  0x19   :  { %35 = vsyncpa [#allocation4], 0 }
  0x1a   :  { %37 = vsyncpa [#allocation4 + $0x1], 0  ;;  %s6850_s27 = smov 0   ;;  %s6852_s28 = smov 0  }
  0x1b   :  { %s6854_s29 = smov 0   ;;  %s6856_s30 = smov 0  }
  0x1c LB: > { %7825 = sst [smem:[#allocation20_spill]] %s6715_s27  ;;  %s6871_s0 = sadd.s32 4294967295, %s6727_s30   ;;  %s6727_s30 = sphi %s6856_s30, %s7874_s30   ;;  %s6723_s29 = sphi %s6854_s29, %s7876_s29   ;;  %s6719_s28 = sphi %s6852_s28, %s7878_s28   ;;  %s6715_s27 = sphi %s6850_s27, %s7877_s27  }
  0x1d   : > { %7826 = sst [smem:[#allocation21_spill]] %s6723_s29  ;;  %s5661_s19 = sadd.s32 4294967294, %s6727_s30  }
  0x1e   : > { %s6875_s1 = sadd.s32 1, %s6727_s30   ;;  %s50_s20 = sadd.s32 1, %s6723_s29 }
  0x1f   : > { %7827 = sst [smem:[#allocation22_spill]] %s6875_s1  ;;  %s47_s21 = ssub.s32 %s6727_s30, %s6875_s1 }
  0x20   : > { %p57_p0 = scmp.ne.s32.totalorder %s6723_s29, %s6719_s28  ;;  %p48_p1 = scmp.eq.s32.totalorder %s47_s21, 0 }
  0x21   : > { %p58_p2 = scmp.eq.s32.totalorder %s6727_s30, 0  ;;  %p63_p3 = scmp.ne.s32.totalorder %s6719_s28, %s6715_s27 }
  0x22   : > { %p64_p4 = scmp.eq.s32.totalorder %s6871_s0, 0  ;;  %p529_p7 = scmp.eq.s32.totalorder %s6871_s0, 1 }
  0x23   : > { %s6887_s22 = scalar_select %p48_p1, %s6723_s29, %s50_s20  }
  0x24   : > { %p59_p5 = por %p58_p2, %p57_p0  ;;  %p6889_p6 = por %p64_p4, %p63_p3 }
  0x25   : > { %7828 = sst [smem:[#allocation23_spill]] %s6887_s22  ;;  %p535_p8 = scmp.eq.s32.totalorder %s5661_s19, 1 }
  0x26   : > { %s7829_s2 = scalar_select %p6889_p6, 1, 0 }
  0x27   : > { %p6309_p10 = scmp.lt.s32.totalorder %s6727_s30, 2  ;;  %p6896_p11 = por %p529_p7, %p57_p0 }
  0x28   : > { %p6900_p12 = por %p535_p8, %p63_p3  ;;  %s6905_s25 = sand.u32 1, %s6723_s29  }
  0x29   : > { %s7830_s23 = scalar_select %p6896_p11, 1, 0 }
  0x2a   : > { %s7832_s24 = scalar_select %p6900_p12, 1, 0 }
  0x2b   : > { %7831 = sst [smem:[#allocation24_spill]] %s7830_s23  ;;  %p6907_p13 = pnand %p6309_p10, %p59_p5 }
  0x2c   : > { %7833 = sst [smem:[#allocation25_spill]] %s7832_s24  ;;  %s6912_s20 = sand.u32 1, %s6727_s30  }
  0x2d   : > { %s6915_s19 = sshll.u32 %s6905_s25, 1  ;;  %s6918_s21 = sshll.u32 %s6727_s30, 5 }
  0x2e   : > { %s7835_s24 = sld [smem:[#allocation27_spill]]  ;;  %s580_s27 = scalar_lea.vmem [#allocation5], %s6915_s19 }
  0x2f   : > { %s587_s18 = sshll.u32 %s580_s27, 4  ;;  %p6932_p1 = pneg %p6907_p13  ;;  %s588_s18 = int_to_ptr.vmem [resolvable:$true] %s587_s18 }
  0x34   : > { %s6924_s29 = scalar_lea.hbm %s7835_s24, %s6918_s21  ;;  %s6460_s13 = scalar_lea.hbm %s7835_s24, 64 }
  0x35   : > { %s6455_s17 = scalar_lea.hbm %s6924_s29, 32  ;;  %p6461_p4 = scmp.lt.s32.totalorder %s6924_s29, %s7835_s24 }
  0x36   : > { %p6456_p0 = scmp.ne.s32.totalorder %s6924_s29, %s6455_s17  ;;  %p6462_p5 = scmp.lt.s32.totalorder %s6460_s13, %s6455_s17 }
  0x38   : > { %p6458_p2 = pnand %p6932_p1, %p6456_p0  ;;  %p6463_p7 = por %p6462_p5, %p6461_p4 }
  0x3a   : > { %p6459_p3 = pneg %p6458_p2 }
  0x3c   : > { %p6464_p8 = pnand %p6463_p7, %p6459_p3 }
  0x3e   : > { %6467 = shalt.err (!%p6464_p8)
}
  0x3f   : > { %s6468_s27 = scalar_lea.vmem %s588_s18, 32  ;;  %s6729_s23 = smov [#allocation5]  }
  0x40   : > { %p6469_p10 = scmp.ne.s32.totalorder %s588_s18, %s6468_s27  ;;  %s6473_s9 = sshll.u32 %s6729_s23, 4  ;;  %s6474_s9 = int_to_ptr.vmem [resolvable:$false] %s6473_s9 }
  0x41   : > { %s6475_s10 = scalar_lea.vmem %s6474_s9, 64  ;;  %p6476_p0 = scmp.lt.s32.totalorder %s588_s18, %s6474_s9 }
  0x42   : > { %p6471_p9 = pnand %p6469_p10, %p6932_p1  ;;  %p6477_p2 = scmp.lt.s32.totalorder %s6475_s10, %s6468_s27 }
  0x44   : > { %p6472_p12 = pneg %p6471_p9  ;;  %p6478_p11 = por %p6477_p2, %p6476_p0 }
  0x46   : > { %p6479_p6 = pnand %p6478_p11, %p6472_p12 }
  0x48   : > { %6482 = shalt.err (!%p6479_p6)
}
  0x49   : > { %s7837_s11 = scalar_lea.sflag [#allocation6], %s6912_s20  ;;  %s6956_s10 = scalar_lea.hbm %s7770_s8, %s6918_s21 }
  0x4a   : > { %6289 = dma.hbm_to_vmem [thread:$0]  (!%p6907_p13), %s6924_s29, 32, %s588_s18, %s7837_s11  }
  0x4b   : > { %s662_s13 = scalar_lea.vmem [#allocation10], %s6915_s19  ;;  %s6965_s22 = scalar_lea.hbm %s7776_s14, %s6918_s21 }
  0x4c   : > { %s669_s17 = sshll.u32 %s662_s13, 4  ;;  %p5680_p6 = scmp.ge.s32.totalorder %s6727_s30, 1  ;;  %s6959_s17 = int_to_ptr.vmem [resolvable:$true] %s669_s17 }
  0x4d   : > { %p769_p9 = scmp.lt.s32.totalorder %s6727_s30, 3  ;;  %s5669_s27 = sshll.u32 %s6727_s30, 4 }
  0x4e   : > { %s7839_s12 = sld [smem:[#allocation28_spill]]  ;;  %s614_s21 = scalar_lea.vmem [#allocation8], %s6905_s25 }
  0x4f   : > { %p6970_p11 = pnand %p5680_p6, %p769_p9  ;;  %s7840_s3 = sld [smem:[#allocation29_spill]] }
  0x50   : > { %s621_s23 = sshll.u32 %s614_s21, 4  ;;  %s622_s23 = int_to_ptr.vmem [resolvable:$true] %s621_s23 }
  0x51   : > { %s7838_s18 = scalar_select %p6970_p11, 1, 0 }
  0x54   : > { %s6977_s9 = scalar_lea.hbm %s7839_s12, %s5669_s27 }
  0x55   : > { %s6982_s7 = scalar_lea.hbm %s7840_s3, %s5669_s27  ;;  %s6488_s5 = scalar_lea.hbm %s7840_s3, 32 }
  0x56   : > { %s6483_s6 = scalar_lea.hbm %s6982_s7, 16  ;;  %p6489_p5 = scmp.lt.s32.totalorder %s6982_s7, %s7840_s3 }
  0x57   : > { %p6484_p12 = scmp.ne.s32.totalorder %s6982_s7, %s6483_s6  ;;  %p6490_p7 = scmp.lt.s32.totalorder %s6488_s5, %s6483_s6 }
  0x59   : > { %p6486_p3 = pnand %p6484_p12, %p6932_p1  ;;  %p6491_p8 = por %p6490_p7, %p6489_p5 }
  0x5b   : > { %p6487_p4 = pneg %p6486_p3 }
  0x5d   : > { %p6492_p10 = pnand %p6491_p8, %p6487_p4 }
  0x5f   : > { %6495 = shalt.err (!%p6492_p10)
}
  0x60   : > { %s6496_s27 = scalar_lea.vmem %s622_s23, 16  ;;  %s6730_s13 = smov [#allocation8]  }
  0x61   : > { %p6497_p0 = scmp.ne.s32.totalorder %s622_s23, %s6496_s27  ;;  %s6501_s21 = sshll.u32 %s6730_s13, 4  ;;  %s6502_s21 = int_to_ptr.vmem [resolvable:$false] %s6501_s21 }
  0x62   : > { %s6503_s1 = scalar_lea.vmem %s6502_s21, 32  ;;  %p6504_p9 = scmp.lt.s32.totalorder %s622_s23, %s6502_s21 }
  0x63   : > { %p6499_p2 = pnand %p6497_p0, %p6932_p1  ;;  %p6505_p12 = scmp.lt.s32.totalorder %s6503_s1, %s6496_s27 }
  0x65   : > { %p6500_p6 = pneg %p6499_p2  ;;  %p6506_p3 = por %p6505_p12, %p6504_p9 }
  0x67   : > { %p6507_p11 = pnand %p6506_p3, %p6500_p6 }
  0x69   : > { %6510 = shalt.err (!%p6507_p11)
}
  0x6a   : > { %s7841_s4 = scalar_lea.sflag [#allocation9], %s6912_s20  ;;  %s720_s5 = scalar_lea.vmem [#allocation11], %s6915_s19 }
  0x6b   : > { %6295 = dma.hbm_to_vmem [thread:$0]  (!%p6907_p13), %s6982_s7, 16, %s622_s23, %s7841_s4  }
  0x6c   : > { %s727_s6 = sshll.u32 %s720_s5, 4  ;;  %s5664_s1 = sshll.u32 %s6905_s25, 4  ;;  %s7005_s6 = int_to_ptr.vmem [resolvable:$true] %s727_s6 }
  0x6d   : > { %s7795_s29 = scalar_lea.sflag [#allocation12], %s6912_s20  ;;  %s6511_s11 = scalar_lea.hbm %s6965_s22, 32 }
  0x6e   : > { %p6512_p11 = scmp.ne.s32.totalorder %s6965_s22, %s6511_s11  ;;  %s6516_s13 = scalar_lea.hbm %s7776_s14, 64 }
  0x6f   : > { %p6517_p7 = scmp.lt.s32.totalorder %s6965_s22, %s7776_s14  ;;  %p6518_p8 = scmp.lt.s32.totalorder %s6516_s13, %s6511_s11 }
  0x70   : > { %p6514_p4 = pnand %p6512_p11, %p6932_p1 }
  0x71   : > { %p6519_p10 = por %p6518_p8, %p6517_p7 }
  0x72   : > { %p6515_p5 = pneg %p6514_p4 }
  0x74   : > { %p6520_p0 = pnand %p6519_p10, %p6515_p5 }
  0x76   : > { %6523 = shalt.err (!%p6520_p0)
}
  0x77   : > { %s6524_s7 = scalar_lea.vmem %s7005_s6, 32  ;;  %s6731_s19 = smov [#allocation11]  }
  0x78   : > { %p6525_p2 = scmp.ne.s32.totalorder %s7005_s6, %s6524_s7  ;;  %s6529_s23 = sshll.u32 %s6731_s19, 4  ;;  %s6530_s23 = int_to_ptr.vmem [resolvable:$false] %s6529_s23 }
  0x79   : > { %s6531_s4 = scalar_lea.vmem %s6530_s23, 64  ;;  %p6532_p12 = scmp.lt.s32.totalorder %s7005_s6, %s6530_s23 }
  0x7a   : > { %p6527_p6 = pnand %p6525_p2, %p6932_p1  ;;  %p6533_p3 = scmp.lt.s32.totalorder %s6531_s4, %s6524_s7 }
  0x7c   : > { %p6528_p9 = pneg %p6527_p6  ;;  %p6534_p11 = por %p6533_p3, %p6532_p12 }
  0x7e   : > { %p6535_p4 = pnand %p6534_p11, %p6528_p9 }
  0x80   : > { %6538 = shalt.err (!%p6535_p4)
}
  0x81   : > { %s7796_s3 = smov 16   ;;  %s7797_s5 = smov 1  }
  0x82   : > { %6301 = dma.hbm_to_vmem [thread:$0]  (!%p6907_p13), %s6965_s22, 32, %s7005_s6, %s7795_s29, %s7796_s3, %s7796_s3, %s7797_s5  }
  0x83   : > { %s5829_s11 = sshll.u32 %s6727_s30, 8  ;;  %s7842_s13 = sld [smem:[#allocation26_spill]] }
  0x84   : > { %s559_s7 = scalar_lea.vmem [#allocation2], %s5664_s1  ;;  %s556_s23 = scalar_lea.sflag [#allocation3], %s6905_s25 }
  0x85   : > { %s566_s19 = sshll.u32 %s559_s7, 4  ;;  %s7042_s19 = int_to_ptr.vmem [resolvable:$true] %s566_s19 }
  0x89   : > { %s7038_s21 = scalar_lea.hbm %s7842_s13, %s5829_s11  ;;  %s6544_s24 = scalar_lea.hbm %s7842_s13, 512 }
  0x8a   : > { %s6539_s4 = scalar_lea.hbm %s7038_s21, 256  ;;  %p6545_p10 = scmp.lt.s32.totalorder %s7038_s21, %s7842_s13 }
  0x8b   : > { %p6540_p5 = scmp.ne.s32.totalorder %s7038_s21, %s6539_s4  ;;  %p6546_p0 = scmp.lt.s32.totalorder %s6544_s24, %s6539_s4 }
  0x8d   : > { %p6542_p7 = pnand %p6540_p5, %p6932_p1  ;;  %p6547_p2 = por %p6546_p0, %p6545_p10 }
  0x8f   : > { %p6543_p8 = pneg %p6542_p7 }
  0x91   : > { %p6548_p6 = pnand %p6547_p2, %p6543_p8 }
  0x93   : > { %6551 = shalt.err (!%p6548_p6)
}
  0x94   : > { %s6552_s1 = scalar_lea.vmem %s7042_s19, 256  ;;  %s6734_s7 = smov [#allocation2]  }
  0x95   : > { %p6553_p9 = scmp.ne.s32.totalorder %s7042_s19, %s6552_s1  ;;  %s6557_s22 = sshll.u32 %s6734_s7, 4  ;;  %s6558_s22 = int_to_ptr.vmem [resolvable:$false] %s6557_s22 }
  0x96   : > { %s6559_s6 = scalar_lea.vmem %s6558_s22, 512  ;;  %p6560_p11 = scmp.lt.s32.totalorder %s7042_s19, %s6558_s22 }
  0x97   : > { %p6555_p12 = pnand %p6553_p9, %p6932_p1  ;;  %p6561_p4 = scmp.lt.s32.totalorder %s6559_s6, %s6552_s1 }
  0x99   : > { %p6556_p3 = pneg %p6555_p12  ;;  %p6562_p5 = por %p6561_p4, %p6560_p11 }
  0x9b   : > { %p6563_p7 = pnand %p6562_p5, %p6556_p3 }
  0x9d   : > { %6566 = shalt.err (!%p6563_p7)
}
  0x9e   : > { %s6735_s4 = smov 128   ;;  %s6736_s24 = smov 8  }
  0x9f   : > { %6286 = dma.hbm_to_vmem [thread:$0]  (!%p6907_p13), %s7038_s21, 256, %s7042_s19, %s556_s23, %s6735_s4, %s6735_s4, %s6736_s24  }
  0xa0   : > { %s597_s11 = scalar_lea.vmem [#allocation7], %s6905_s25  ;;  %s5677_s1 = sshll.u32 %s6905_s25, 5 }
  0xa1   : > { %s604_s27 = sshll.u32 %s597_s11, 4  ;;  %s6567_s7 = scalar_lea.hbm %s6977_s9, 16  ;;  %s605_s27 = int_to_ptr.vmem [resolvable:$true] %s604_s27 }
  0xa2   : > { %p6568_p8 = scmp.ne.s32.totalorder %s6977_s9, %s6567_s7  ;;  %s6572_s29 = scalar_lea.hbm %s7839_s12, 32 }
  0xa3   : > { %p6573_p2 = scmp.lt.s32.totalorder %s6977_s9, %s7839_s12  ;;  %p6574_p6 = scmp.lt.s32.totalorder %s6572_s29, %s6567_s7 }
  0xa4   : > { %p6570_p10 = pnand %p6568_p8, %p6932_p1 }
  0xa5   : > { %p6575_p9 = por %p6574_p6, %p6573_p2 }
  0xa6   : > { %p6571_p0 = pneg %p6570_p10 }
  0xa8   : > { %p6576_p12 = pnand %p6575_p9, %p6571_p0 }
  0xaa   : > { %6579 = shalt.err (!%p6576_p12)
}
  0xab   : > { %s6580_s21 = scalar_lea.vmem %s605_s27, 16  ;;  %s6737_s19 = smov [#allocation7]  }
  0xac   : > { %p6581_p3 = scmp.ne.s32.totalorder %s605_s27, %s6580_s21  ;;  %s6585_s23 = sshll.u32 %s6737_s19, 4  ;;  %s6586_s23 = int_to_ptr.vmem [resolvable:$false] %s6585_s23 }
  0xad   : > { %s6587_s11 = scalar_lea.vmem %s6586_s23, 32  ;;  %p6588_p5 = scmp.lt.s32.totalorder %s605_s27, %s6586_s23 }
  0xae   : > { %p6583_p11 = pnand %p6581_p3, %p6932_p1  ;;  %p6589_p7 = scmp.lt.s32.totalorder %s6587_s11, %s6580_s21 }
  0xb0   : > { %p6584_p4 = pneg %p6583_p11  ;;  %p6590_p8 = por %p6589_p7, %p6588_p5 }
  0xb2   : > { %p6591_p10 = pnand %p6590_p8, %p6584_p4 }
  0xb4   : > { %6594 = shalt.err (!%p6591_p10)
}
  0xb5   : > { %s7843_s29 = scalar_lea.sflag [#allocation6], %s6912_s20  ;;  %s6595_s3 = scalar_lea.hbm %s6956_s10, 32 }
  0xb6   : > { %6292 = dma.hbm_to_vmem [thread:$0]  (!%p6907_p13), %s6977_s9, 16, %s605_s27, %s7843_s29  }
  0xb7   : > { %p6596_p0 = scmp.ne.s32.totalorder %s6956_s10, %s6595_s3  ;;  %s6600_s22 = scalar_lea.hbm %s7770_s8, 64 }
  0xb8   : > { %p6601_p9 = scmp.lt.s32.totalorder %s6956_s10, %s7770_s8  ;;  %p6602_p12 = scmp.lt.s32.totalorder %s6600_s22, %s6595_s3 }
  0xb9   : > { %p6598_p2 = pnand %p6596_p0, %p6932_p1 }
  0xba   : > { %p6603_p3 = por %p6602_p12, %p6601_p9 }
  0xbb   : > { %p6599_p6 = pneg %p6598_p2 }
  0xbd   : > { %p6604_p11 = pnand %p6603_p3, %p6599_p6 }
  0xbf   : > { %6607 = shalt.err (!%p6604_p11)
}
  0xc0   : > { %s6608_s9 = scalar_lea.vmem %s6959_s17, 32  ;;  %s6738_s27 = smov [#allocation10]  }
  0xc1   : > { %p6609_p4 = scmp.ne.s32.totalorder %s6959_s17, %s6608_s9  ;;  %s6613_s19 = sshll.u32 %s6738_s27, 4  ;;  %s6614_s19 = int_to_ptr.vmem [resolvable:$false] %s6613_s19 }
  0xc2   : > { %s6615_s23 = scalar_lea.vmem %s6614_s19, 64  ;;  %p6616_p8 = scmp.lt.s32.totalorder %s6959_s17, %s6614_s19 }
  0xc3   : > { %p6611_p5 = pnand %p6609_p4, %p6932_p1  ;;  %p6617_p10 = scmp.lt.s32.totalorder %s6615_s23, %s6608_s9 }
  0xc5   : > { %p6612_p7 = pneg %p6611_p5  ;;  %p6618_p0 = por %p6617_p10, %p6616_p8 }
  0xc7   : > { %p6619_p2 = pnand %p6618_p0, %p6612_p7 }
  0xc9   : > { %6622 = shalt.err (!%p6619_p2)
}
  0xca   : > { %s7844_s11 = smov 1   ;;  %s7845_s29 = smov 16  }
  0xcb   : > { %s7846_s3 = scalar_lea.sflag [#allocation9], %s6912_s20  ;;  %s5832_s5 = sshll.u32 %s6727_s30, 9 }
  0xcc   : > { %6298 = dma.hbm_to_vmem [thread:$0]  (!%p6907_p13), %s6956_s10, 32, %s6959_s17, %s7846_s3, %s7845_s29, %s7845_s29, %s7844_s11  }
  0xcd   : > { %s748_s7 = scalar_lea.vmem [#allocation13], %s5677_s1  ;;  %s7121_s9 = scalar_lea.hbm %s7778_s16, %s5832_s5 }
  0xce   : > { %s755_s22 = sshll.u32 %s748_s7, 4  ;;  %s6623_s27 = scalar_lea.hbm %s7121_s9, 512  ;;  %s756_s22 = int_to_ptr.vmem [resolvable:$true] %s755_s22 }
  0xcf   : > { %p6624_p6 = scmp.ne.s32.totalorder %s7121_s9, %s6623_s27  ;;  %s6628_s25 = scalar_lea.hbm %s7778_s16, 1024 }
  0xd0   : > { %p6629_p3 = scmp.lt.s32.totalorder %s7121_s9, %s7778_s16  ;;  %p6630_p11 = scmp.lt.s32.totalorder %s6628_s25, %s6623_s27 }
  0xd1   : > { %p6626_p9 = pnand %p6624_p6, %p6932_p1 }
  0xd2   : > { %p6631_p4 = por %p6630_p11, %p6629_p3 }
  0xd3   : > { %p6627_p12 = pneg %p6626_p9 }
  0xd5   : > { %p6632_p5 = pnand %p6631_p4, %p6627_p12 }
  0xd7   : > { %6635 = shalt.err (!%p6632_p5)
}
  0xd8   : > { %s6636_s23 = scalar_lea.vmem %s756_s22, 512  ;;  %s6739_s11 = smov [#allocation13]  }
  0xd9   : > { %p6637_p7 = scmp.ne.s32.totalorder %s756_s22, %s6636_s23  ;;  %s6641_s29 = sshll.u32 %s6739_s11, 4  ;;  %s6642_s29 = int_to_ptr.vmem [resolvable:$false] %s6641_s29 }
  0xda   : > { %s6643_s3 = scalar_lea.vmem %s6642_s29, 1024  ;;  %p6644_p0 = scmp.lt.s32.totalorder %s756_s22, %s6642_s29 }
  0xdb   : > { %p6639_p8 = pnand %p6637_p7, %p6932_p1  ;;  %p6645_p2 = scmp.lt.s32.totalorder %s6643_s3, %s6636_s23 }
  0xdd   : > { %p6640_p10 = pneg %p6639_p8  ;;  %p6646_p6 = por %p6645_p2, %p6644_p0 }
  0xdf   : > { %p6647_p9 = pnand %p6646_p6, %p6640_p10 }
  0xe1   : > { %6650 = shalt.err (!%p6647_p9)
}
  0xe2   : > { %s7847_s5 = scalar_lea.sflag [#allocation12], %s6912_s20  ;;  %p7848_p1 = scmp.ne.s32.totalorder %s7838_s18, 0 }
  0xe3   : > { %6304 = dma.hbm_to_vmem [thread:$0]  (!%p6907_p13), %s7121_s9, 512, %s756_s22, %s7847_s5, %s6735_s4, %s6735_s4, %s6736_s24  }
  0xe4   : > { %773 = sbr.rel (%p7848_p1) target bundleno = 9163 (0x23cb), region = 92  ;;  %s7147_s15 = sand.u32 (!%p7848_p1), 1, %s6719_s28  }
  0xe5   : > { %s5681_s7 = sshll.u32 (!%p7848_p1), %s7147_s15, 4  ;;  %s776_s6 = scalar_lea.sflag (!%p7848_p1), [#allocation3], %s7147_s15 }
  0xe6   : > { %s779_s21 = scalar_lea.vmem (!%p7848_p1), [#allocation2], %s5681_s7  ;;  %p7849_p12 = scmp.ne.s32.totalorder (!%p7848_p1), %s7829_s2, 0 }
  0xe9   : > { %6694 = dma.done.wait (%p7849_p12), %s776_s6, 256  }
  0xea   : > { %6696 = vsyncadd (%p7849_p12), %s776_s6, 4294967040  ;;  %s784_s26 = sand.u32 1, %s6871_s0   ;;  %s7157_s20 = sshll.u32 %s7147_s15, 1 }
  0xeb   : > { %s785_s18 = scalar_lea.sflag [#allocation6], %s784_s26  ;;  %s788_s4 = scalar_lea.vmem [#allocation5], %s7157_s20 }
  0xec   : > { %6698 = dma.done.wait (%p7849_p12), %s785_s18, 48  }
  0xed   : > { %6700 = vsyncadd (%p7849_p12), %s785_s18, 4294967248  ;;  %s796_s24 = scalar_lea.vmem [#allocation7], %s7147_s15  ;;  %s802_s22 = scalar_lea.sflag [#allocation9], %s784_s26 }
  0xee   : > { %s804_s9 = scalar_lea.vmem [#allocation8], %s7147_s15 }
  0xef   : > { %6702 = dma.done.wait (%p7849_p12), %s802_s22, 48  }
  0xf0   : > { %6704 = vsyncadd (%p7849_p12), %s802_s22, 4294967248  ;;  %s7804_s27 = scalar_lea.vmem [#allocation10], %s7157_s20  ;;  %s819_s19 = scalar_lea.sflag [#allocation12], %s784_s26 }
  0xf1   : > { %s822_s10 = scalar_lea.vmem [#allocation11], %s7157_s20 }
  0xf2   : > { %6706 = dma.done.wait (%p7849_p12), %s819_s19, 544  }
  0xf3   : > { %6708 = vsyncadd (%p7849_p12), %s819_s19, 4294966752  ;;  %vm1010_vm0 = vcmask 261120   ;;  %v1006_v0 = vld [vmem:[%s779_s21] sm:$0xff]  ;;  %v1007_v1 = vld [vmem:[%s779_s21 + $0x8] sm:$0xff]  ;;  %p959_p13 = scmp.lt.s32.totalorder %s6871_s0, 1  ;;  %s7850_s23 = sld [smem:[#allocation30_spill]]  ;;  %v1061_v44 = vlaneseq }
  0xf4   : > { %v1011_v2 = vsel %vm1010_vm0, %v1006_v0, 0.0  ;;  %v1014_v3 = vsel %vm1010_vm0, %v1007_v1, 0.0  ;;  %v5701_v25 = vld [vmem:[%s796_s24] ss:$0 sm:$0xff]  ;;  %v6740_v34 = vmov 0.0   ;;  %vm6741_vm1 = vmmov 0  }
  0xf5   : > { %1012 = vadd.xlane.f32.xlu0 %v1011_v2  ;;  %s7182_s2 = scalar_select %p959_p13, %s6871_s0, 1  ;;  %v5702_v27 = vld [vmem:[%s804_s9] ss:$0 sm:$0xff]  ;;  %5985 = vmatprep.subr.mxu1 %v6740_v34  ;;  %vm1175_vm2 = vcmask 64512   ;;  %v6743_v42 = vmov 1966171168  }
  0xf6   : > { %5987 = vmatprep.mubr.msk.f32.mxu1 %vm6741_vm1, %v6740_v34  ;;  %s7851_s7 = sld [smem:[#allocation31_spill]]  ;;  %s6742_s21 = smov 96   ;;  %v1059_v43 = vunpack.c.l.s4 %v6743_v42  ;;  %v1054_v45 = vld [vmem:[%s788_s4] sm:$0x3]  ;;  %v1062_v48 = vshrl.u32 %v1061_v44, 7  ;;  %vm3029_vm3 = vcmask 523264  }
  0xf7   : > { %s7185_s25 = sshll.u32 %s7182_s2, 6  ;;  %s7212_s29 = sshll.u32 %s7182_s2, 1  ;;  %v1055_v46 = vsub.f32 1.0, %v1054_v45  ;;  %vm5248_vm4 = vcmask 1041409   ;;  %vm5323_vm5 = vcmask 254976  }
  0xf8   : > { %v1060_v47 = vunpack.c.0.s8 %v1059_v43  ;;  %v1331_v53 = vsub.s32 0, %v1062_v48  ;;  %s6744_s26 = smov 64   ;;  %s6745_s18 = smov 88  }
  0xf9   : > { %1015 = vadd.xlane.f32.xlu0 %v1014_v3  ;;  %s7191_s11 = scalar_lea.vmem %s7850_s23, %s7185_s25  ;;  %v1056_v49 = vmul.f32 -1e+09, %v1055_v46  ;;  %s6746_s4 = smov 120  }
  0xfa   : > { %v1083_v14 = vld [vmem:[%s7191_s11 + $0x18] sm:$0xff]  ;;  %v1082_v15 = vld [vmem:[%s7191_s11 + $0x10] sm:$0xff]  ;;  %v1081_v16 = vld [vmem:[%s7191_s11 + $0x8] sm:$0xff]  ;;  %v1063_v50 = vsub.s32 %v1060_v47, %v1062_v48  ;;  %s6747_s24 = smov 56   ;;  %s6748_s22 = smov 80  }
  0xfb   : > { %5974 = vmatprep.subr.mxu0 %v1083_v14  ;;  %v1080_v17 = vld [vmem:[%s7191_s11] sm:$0xff]  ;;  %s7807_s9 = smov 112   ;;  %s7852_s1 = sld [smem:[#allocation32_spill]] }
  0xfc   : > { %5975 = vmatpush3.msra.mxu0 %v1083_v14  ;;  %s7222_s6 = scalar_lea.vmem %s7851_s7, %s7212_s29  ;;  %v1064_v51 = vrot.slane %v1056_v49, %v1063_v50  ;;  %s7805_s3 = smov 48  }
  0xfd   : > { %5976 = vmatprep.subr.mxu0 %v1082_v15  ;;  %v5703_v35 = vld [vmem:[%s7222_s6] ss:$0 sm:$0xff]  ;;  %s7802_s5 = smov 72   ;;  %s7800_s7 = smov 104  }
  0xfe   : > { %5977 = vmatpush3.msra.mxu0 %v1082_v15  ;;  %v1072_v52 = vrot.slane %v1064_v51, %v1063_v50  ;;  %v1065_v54 = vcombine.high %v1064_v51, %v1064_v51  ;;  %s7798_s19 = smov 40   ;;  %s7855_s17 = sld [smem:[#allocation34_spill]] }
  0xff   : > { %5978 = vmatprep.subr.mxu0 %v1081_v16 }
 0x100   : > { %5979 = vmatpush3.msra.mxu0 %v1081_v16  ;;  %v7247_v55 = vrot.slane %v1072_v52, %v1331_v53  ;;  %v1079_v56 = vrot.slane %v1065_v54, %v1063_v50 }
 0x101   : > { %5980 = vmatprep.subr.mxu0 %v1080_v17  ;;  %s7309_s23 = scalar_lea.vmem %s7852_s1, %s7185_s25  ;;  %s7854_s1 = sld [smem:[#allocation35_spill]] }
 0x102   : > { %5981 = vmatpush3.msra.mxu0 %v1080_v17  ;;  %v7250_v61 = vrot.slane %v1079_v56, %v1331_v53 }
 0x103   : > { %5995 = vmatprep.subr.mxu0 %v6740_v34 }
 0x17e   : > { %v1013_v4 = vpop.xlane.xlu0 %1012 }
 0x17f   : > { %v1018_v5 = vmul.f32 0.03125, %v1013_v4 }
 0x181   : > { %v1020_v6 = vsub.f32 %v1006_v0, %v1018_v5 }
 0x182   : > { %v1016_v7 = vpop.xlane.xlu0 %1015 }
 0x183   : > { %v1019_v8 = vmul.f32 0.03125, %v1016_v7  ;;  %v1022_v9 = vmul.f32 %v1020_v6, %v1020_v6 }
 0x185   : > { %v1021_v10 = vsub.f32 %v1007_v1, %v1019_v8  ;;  %v1024_v11 = vsel %vm1010_vm0, %v1022_v9, 0.0 }
 0x186   : > { %1025 = vadd.xlane.f32.xlu1 %v1024_v11 }
 0x187   : > { %v1023_v12 = vmul.f32 %v1021_v10, %v1021_v10 }
 0x189   : > { %v1027_v13 = vsel %vm1010_vm0, %v1023_v12, 0.0 }
 0x18a   : > { %1028 = vadd.xlane.f32.xlu1 %v1027_v13 }
 0x20f   : > { %v1026_v18 = vpop.xlane.xlu1 %1025 }
 0x210   : > { %v1030_v19 = vmul.f32 0.03125, %v1026_v18 }
 0x212   : > { %v1032_v20 = vadd.f32 1e-12, %v1030_v19 }
 0x213   : > { %v1029_v21 = vpop.xlane.xlu1 %1028 }
 0x214   : > { %6361 = vrsqrt.f32 %v1032_v20  ;;  %v1031_v22 = vmul.f32 0.03125, %v1029_v21 }
 0x216   : > { %v1033_v23 = vadd.f32 1e-12, %v1031_v22 }
 0x218   : > { %6363 = vrsqrt.f32 %v1033_v23 }
 0x221   : > { %v6362_v24 = vpop.eup %6361 }
 0x222   : > { %v1036_v26 = vmul.f32 %v6362_v24, %v1020_v6 }
 0x224   : > { %v1044_v28 = vmul.f32 %v5701_v25, %v1036_v26 }
 0x225   : > { %v6364_v29 = vpop.eup %6363 }
 0x226   : > { %v1037_v30 = vmul.f32 %v6364_v29, %v1021_v10  ;;  %v7201_v31 = vadd.f32 %v5702_v27, %v1044_v28 }
 0x228   : > { %v1045_v32 = vmul.f32 %v5701_v25, %v1037_v30  ;;  %5982 = vmatprep.mubr.msk.f32.mxu0 %vm1010_vm0, %v7201_v31 }
 0x22a   : > { %v7205_v33 = vadd.f32 %v5702_v27, %v1045_v32 }
 0x22c   : > { %5983 = vmatmul.mubr.msk.f32.vlgmr.msra.gmra.mxu0 %vm1010_vm0, %v7205_v33 }
 0x22d   : > { %5997 = vmatprep.mubr.msk.f32.mxu0 %vm6741_vm1, %v6740_v34 }
 0x2ec   : > { %v5984_v36 = vpop.f32.mrf.mxu0 }
 0x2ed   : > { %v7225_v37 = vadd.f32 %v5984_v36, %v5703_v35 }
 0x2ee   : > { %v1163_v38 = vpop.f32.mrf.mxu0 }
 0x2ef   : > { %v7227_v39 = vadd.f32 %v5703_v35, %v1163_v38  ;;  %1251 = vrot.lane.b32.xlu1 %v7225_v37, %s6742_s21 }
 0x2f1   : > { %1173 = vrot.lane.b32.xlu0 %v7227_v39, %s6742_s21 }
 0x361   : > { %v1252_v41 = vpop.permute.xlu1 %1251 }
 0x363   : > { %v1174_v40 = vpop.permute.xlu0 %1173 }
 0x364   : > { %5986 = vmatpush3.xpose.msk.msra.mxu1 %vm1175_vm2, %v1174_v40 }
 0x365   : > { %5990 = vmatprep.subr.mxu1 %v6740_v34 }
 0x367   : > { %5988 = vmatmul.mubr.msk.f32.vlgmr.msra.gmra.mxu1 %vm1175_vm2, %v7227_v39 }
 0x368   : > { %5991 = vmatpush3.xpose.msk.msra.mxu1 %vm1175_vm2, %v1252_v41  ;;  %5992 = vmatprep.mubr.msk.f32.mxu1 %vm6741_vm1, %v6740_v34 }
 0x369   : > { %6000 = vmatprep.subr.mxu1 %v6740_v34 }
 0x36b   : > { %5993 = vmatmul.mubr.msk.f32.vlgmr.msra.gmra.mxu1 %vm1175_vm2, %v7225_v37 }
 0x36c   : > { %6002 = vmatprep.mubr.msk.f32.mxu1 %vm6741_vm1, %v6740_v34 }
 0x427   : > { %v1246_v57 = vpop.f32.mrf.mxu1 }
 0x428   : > { %v1327_v58 = vmul.f32 0.35355338, %v1246_v57  ;;  %v1515_v57 = vld [vmem:[%s7309_s23] sm:$0xff] }
 0x429   : > { %v5989_v59 = vpop.f32.mrf.mxu1 }
 0x42a   : > { %v1339_v60 = vadd.f32 %v7247_v55, %v1327_v58 }
 0x42b   : > { %v1323_v62 = vpop.f32.mrf.mxu1 }
 0x42c   : > { %v1328_v63 = vmul.f32 0.35355338, %v1323_v62  ;;  %v1341_v0 = vsel %vm1175_vm2, %v1339_v60, -inf }
 0x42d   : > { %1342 = vmax.xlane.f32.xlu1 %v1341_v0  ;;  %v5994_v1 = vpop.f32.mrf.mxu1 }
 0x42e   : > { %v1340_v2 = vadd.f32 %v7250_v61, %v1328_v63 }
 0x430   : > { %v1344_v3 = vsel %vm1175_vm2, %v1340_v2, -inf }
 0x431   : > { %1345 = vmax.xlane.f32.xlu0 %v1344_v3 }
 0x43e   : > { %1439 = vrot.lane.b32.xlu1 %v7225_v37, %s6744_s26 }
 0x442   : > { %1518 = vrot.lane.b32.xlu1 %v7227_v39, %s6745_s18 }
 0x446   : > { %1596 = vrot.lane.b32.xlu1 %v7225_v37, %s6745_s18 }
 0x4b6   : > { %v1343_v4 = vpop.xlane.xlu1 %1342 }
 0x4b7   : > { %v1347_v5 = vsub.f32 %v1339_v60, %v1343_v4 }
 0x4b9   : > { %v1349_v6 = vmul.f32 1.442695, %v1347_v5  ;;  %v1850_v5 = vld [vmem:[%s7309_s23 + $0x8] sm:$0xff] }
 0x4ba   : > { %v1440_v7 = vpop.permute.xlu1 %1439  ;;  %v1346_v8 = vpop.xlane.xlu0 %1345 }
 0x4bb   : > { %6365 = vpow2.f32 %v1349_v6  ;;  %v1348_v9 = vsub.f32 %v1340_v2, %v1346_v8  ;;  %6001 = vmatpush3.msra.mxu1 %v1440_v7 }
 0x4bc   : > { %6010 = vmatprep.subr.mxu1 %v6740_v34 }
 0x4bd   : > { %v1351_v10 = vmul.f32 1.442695, %v1348_v9 }
 0x4be   : > { %v1519_v15 = vpop.permute.xlu1 %1518 }
 0x4bf   : > { %6367 = vpow2.f32 %v1351_v10 }
 0x4c2   : > { %v1597_v16 = vpop.permute.xlu1 %1596 }
 0x4c8   : > { %v6366_v11 = vpop.eup %6365 }
 0x4c9   : > { %v1353_v12 = vsel %vm1175_vm2, %v6366_v11, 0.0 }
 0x4ca   : > { %1354 = vadd.xlane.f32.xlu0 %v1353_v12 }
 0x4cc   : > { %v6368_v13 = vpop.eup %6367 }
 0x4cd   : > { %v1356_v14 = vsel %vm1175_vm2, %v6368_v13, 0.0 }
 0x4ce   : > { %1357 = vadd.xlane.f32.xlu1 %v1356_v14 }
 0x4df   : > { %1594 = vrot.lane.b32.xlu1 %v7225_v37, %s6746_s4 }
 0x4e0   : > { %1363 = vrot.lane.b32.xlu0 %v7227_v39, %s6744_s26 }
 0x4e4   : > { %1516 = vrot.lane.b32.xlu0 %v7227_v39, %s6746_s4 }
 0x553   : > { %v1355_v17 = vpop.xlane.xlu0 %1354 }
 0x554   : > { %6369 = vrcp.f32 %v1355_v17 }
 0x557   : > { %v1358_v18 = vpop.xlane.xlu1 %1357  ;;  %v1364_v19 = vpop.permute.xlu0 %1363 }
 0x558   : > { %6371 = vrcp.f32 %v1358_v18  ;;  %5996 = vmatpush3.msra.mxu0 %v1364_v19 }
 0x559   : > { %6005 = vmatprep.subr.mxu0 %v6740_v34 }
 0x55b   : > { %v1517_v24 = vpop.permute.xlu0 %1516  ;;  %v1595_v25 = vpop.permute.xlu1 %1594 }
 0x561   : > { %v6370_v20 = vpop.eup %6369 }
 0x562   : > { %v1360_v21 = vmul.f32 %v6370_v20, %v6366_v11 }
 0x564   : > { %5998 = vmatmul.mubr.msk.f32.vlgmr.msra.gmra.mxu0 %vm1175_vm2, %v1360_v21 }
 0x565   : > { %v6372_v22 = vpop.eup %6371  ;;  %6006 = vmatpush3.xpose.msk.msra.mxu0 %vm1175_vm2, %v1519_v15  ;;  %6007 = vmatprep.mubr.msk.f32.mxu0 %vm6741_vm1, %v6740_v34 }
 0x566   : > { %v1362_v23 = vmul.f32 %v6372_v22, %v6368_v13  ;;  %6015 = vmatprep.subr.mxu0 %v6740_v34 }
 0x568   : > { %6003 = vmatmul.mubr.msk.f32.vlgmr.msra.gmra.mxu1 %vm1175_vm2, %v1362_v23  ;;  %6008 = vmatmul.mubr.msk.f32.vlgmr.msra.gmra.mxu0 %vm1175_vm2, %v1517_v24 }
 0x569   : > { %6011 = vmatpush3.xpose.msk.msra.mxu1 %vm1175_vm2, %v1597_v16  ;;  %6012 = vmatprep.mubr.msk.f32.mxu1 %vm6741_vm1, %v6740_v34 }
 0x56a   : > { %6020 = vmatprep.subr.mxu1 %v6740_v34  ;;  %6017 = vmatprep.mubr.msk.f32.mxu0 %vm6741_vm1, %v6740_v34 }
 0x56c   : > { %6013 = vmatmul.mubr.msk.f32.vlgmr.msra.gmra.mxu1 %vm1175_vm2, %v1595_v25 }
 0x56d   : > { %6022 = vmatprep.mubr.msk.f32.mxu1 %vm6741_vm1, %v6740_v34 }
 0x624   : > { %v1435_v26 = vpop.f32.mrf.mxu0 }
 0x626   : > { %v5999_v27 = vpop.f32.mrf.mxu0 }
 0x628   : > { %v1511_v28 = vpop.f32.mrf.mxu1  ;;  %v1590_v29 = vpop.f32.mrf.mxu0 }
 0x629   : > { %v1672_v30 = vmul.f32 0.35355338, %v1590_v29 }
 0x62a   : > { %v6004_v32 = vpop.f32.mrf.mxu1  ;;  %v6009_v35 = vpop.f32.mrf.mxu0 }
 0x62b   : > { %v1674_v36 = vadd.f32 %v1672_v30, %v7247_v55 }
 0x62c   : > { %v1668_v38 = vpop.f32.mrf.mxu1 }
 0x62d   : > { %v1673_v40 = vmul.f32 0.35355338, %v1668_v38  ;;  %v1676_v41 = vsel %vm1175_vm2, %v1674_v36, -inf }
 0x62e   : > { %1677 = vmax.xlane.f32.xlu0 %v1676_v41  ;;  %v6014_v42 = vpop.f32.mrf.mxu1 }
 0x62f   : > { %v1675_v43 = vadd.f32 %v1673_v40, %v7250_v61 }
 0x631   : > { %v1679_v44 = vsel %vm1175_vm2, %v1675_v43, -inf }
 0x632   : > { %1680 = vmax.xlane.f32.xlu1 %v1679_v44 }
 0x643   : > { %1774 = vrot.lane.b32.xlu1 %v7225_v37, %s6747_s24 }
 0x647   : > { %2015 = vrot.lane.b32.xlu1 %v7227_v39, %s6748_s22 }
 0x64b   : > { %2093 = vrot.lane.b32.xlu1 %v7225_v37, %s6748_s22 }
 0x64f   : > { %2091 = vrot.lane.b32.xlu1 %v7225_v37, %s7807_s9 }
 0x6b7   : > { %v1678_v45 = vpop.xlane.xlu0 %1677 }
 0x6b8   : > { %v1682_v46 = vsub.f32 %v1674_v36, %v1678_v45 }
 0x6ba   : > { %v1684_v47 = vmul.f32 1.442695, %v1682_v46 }
 0x6bb   : > { %v1681_v48 = vpop.xlane.xlu1 %1680 }
 0x6bc   : > { %6373 = vpow2.f32 %v1684_v47  ;;  %v1683_v49 = vsub.f32 %v1675_v43, %v1681_v48 }
 0x6be   : > { %v1686_v50 = vmul.f32 1.442695, %v1683_v49 }
 0x6bf   : > { %v1775_v51 = vpop.permute.xlu1 %1774 }
 0x6c0   : > { %6375 = vpow2.f32 %v1686_v50  ;;  %6021 = vmatpush3.msra.mxu1 %v1775_v51 }
 0x6c1   : > { %6030 = vmatprep.subr.mxu1 %v1515_v57 }
 0x6c3   : > { %v2016_v0 = vpop.permute.xlu1 %2015 }
 0x6c7   : > { %v2094_v3 = vpop.permute.xlu1 %2093 }
 0x6c9   : > { %v6374_v52 = vpop.eup %6373 }
 0x6ca   : > { %v1688_v53 = vsel %vm1175_vm2, %v6374_v52, 0.0 }
 0x6cb   : > { %1689 = vadd.xlane.f32.xlu0 %v1688_v53  ;;  %v2092_v4 = vpop.permute.xlu1 %2091 }
 0x6cd   : > { %v6376_v54 = vpop.eup %6375 }
 0x6ce   : > { %v1691_v56 = vsel %vm1175_vm2, %v6376_v54, 0.0 }
 0x6cf   : > { %1692 = vadd.xlane.f32.xlu0 %v1691_v56 }
 0x6e5   : > { %1698 = vrot.lane.b32.xlu0 %v7227_v39, %s6747_s24 }
 0x6e9   : > { %2013 = vrot.lane.b32.xlu0 %v7227_v39, %s7807_s9 }
 0x754   : > { %v1690_v58 = vpop.xlane.xlu0 %1689 }
 0x755   : > { %6377 = vrcp.f32 %v1690_v58 }
 0x758   : > { %v1693_v59 = vpop.xlane.xlu0 %1692 }
 0x759   : > { %6379 = vrcp.f32 %v1693_v59 }
 0x75c   : > { %v1699_v60 = vpop.permute.xlu0 %1698 }
 0x75d   : > { %6016 = vmatpush3.msra.mxu0 %v1699_v60 }
 0x75e   : > { %6025 = vmatprep.subr.mxu0 %v1850_v5 }
 0x760   : > { %v2014_v10 = vpop.permute.xlu0 %2013 }
 0x762   : > { %v6378_v62 = vpop.eup %6377 }
 0x763   : > { %v1695_v63 = vmul.f32 %v6378_v62, %v6374_v52  ;;  %v2347_v52 = vld [vmem:[%s7309_s23 + $0x10] sm:$0xff] }
 0x765   : > { %6018 = vmatmul.mubr.msk.f32.vlgmr.msra.gmra.mxu0 %vm1175_vm2, %v1695_v63 }
 0x766   : > { %v6380_v1 = vpop.eup %6379  ;;  %6026 = vmatpush3.msra.mxu0 %v1850_v5 }
 0x767   : > { %v1697_v2 = vmul.f32 %v6380_v1, %v6376_v54  ;;  %6035 = vmatprep.subr.mxu0 %v6740_v34 }
 0x769   : > { %6023 = vmatmul.mubr.msk.f32.vlgmr.msra.gmra.mxu1 %vm1175_vm2, %v1697_v2 }
 0x76a   : > { %6032 = vmatprep.mubr.msk.f32.mxu1 %vm1175_vm2, %v1435_v26  ;;  %6031 = vmatpush3.msra.mxu1 %v1515_v57 }
 0x76b   : > { %6040 = vmatprep.subr.mxu1 %v6740_v34 }
 0x76d   : > { %6033 = vmatmul.mubr.msk.f32.vlgmr.msra.gmra.mxu1 %vm1175_vm2, %v1511_v28 }
 0x76e   : > { %6041 = vmatpush3.xpose.msk.msra.mxu1 %vm1175_vm2, %v2094_v3  ;;  %6042 = vmatprep.mubr.msk.f32.mxu1 %vm6741_vm1, %v6740_v34 }
 0x76f   : > { %6050 = vmatprep.subr.mxu1 %v6740_v34 }
 0x771   : > { %6043 = vmatmul.mubr.msk.f32.vlgmr.msra.gmra.mxu1 %vm1175_vm2, %v2092_v4 }
 0x772   : > { %6052 = vmatprep.mubr.msk.f32.mxu1 %vm6741_vm1, %v6740_v34 }
 0x825   : > { %v1770_v6 = vpop.f32.mrf.mxu0 }
 0x826   : > { %6027 = vmatprep.mubr.msk.f32.mxu0 %vm1175_vm2, %v1770_v6 }
 0x827   : > { %v6019_v7 = vpop.f32.mrf.mxu0 }
 0x829   : > { %v1846_v8 = vpop.f32.mrf.mxu1 }
 0x82a   : > { %6028 = vmatmul.mubr.msk.f32.vlgmr.msra.gmra.mxu0 %vm1175_vm2, %v1846_v8 }
 0x82b   : > { %6036 = vmatpush3.xpose.msk.msra.mxu0 %vm1175_vm2, %v2016_v0  ;;  %v6024_v9 = vpop.f32.mrf.mxu1  ;;  %6037 = vmatprep.mubr.msk.f32.mxu0 %vm6741_vm1, %v6740_v34 }
 0x82c   : > { %6045 = vmatprep.subr.mxu0 %v6740_v34 }
 0x82d   : > { %v7332_v11 = vpop.f32.mrf.mxu1 }
 0x82e   : > { %6038 = vmatmul.mubr.msk.f32.vlgmr.msra.gmra.mxu0 %vm1175_vm2, %v2014_v10 }
 0x82f   : > { %v7335_v12 = vpop.f32.mrf.mxu1  ;;  %6047 = vmatprep.mubr.msk.f32.mxu0 %vm6741_vm1, %v6740_v34 }
 0x831   : > { %v2165_v13 = vpop.f32.mrf.mxu1 }
 0x832   : > { %v2170_v14 = vmul.f32 0.35355338, %v2165_v13 }
 0x833   : > { %v6044_v15 = vpop.f32.mrf.mxu1 }
 0x834   : > { %v2172_v16 = vadd.f32 %v2170_v14, %v7250_v61 }
 0x836   : > { %v2176_v17 = vsel %vm1175_vm2, %v2172_v16, -inf }
 0x837   : > { %2177 = vmax.xlane.f32.xlu1 %v2176_v17 }
 0x848   : > { %2271 = vrot.lane.b32.xlu1 %v7225_v37, %s7805_s3 }
 0x84c   : > { %2433 = vrot.lane.b32.xlu1 %v7227_v39, %s7802_s5 }
 0x850   : > { %2511 = vrot.lane.b32.xlu1 %v7225_v37, %s7802_s5  ;;  %s7418_s5 = scalar_lea.vmem %s7854_s1, %s7185_s25  ;;  %s7430_s1 = scalar_lea.vmem %s7855_s17, %s7212_s29 }
 0x851   : > { %s7857_s25 = sld [smem:[#allocation36_spill]] }
 0x854   : > { %2509 = vrot.lane.b32.xlu1 %v7225_v37, %s7800_s7 }
 0x8c0   : > { %v2178_v18 = vpop.xlane.xlu1 %2177 }
 0x8c1   : > { %v2180_v20 = vsub.f32 %v2172_v16, %v2178_v18 }
 0x8c3   : > { %v2183_v21 = vmul.f32 1.442695, %v2180_v20 }
 0x8c4   : > { %v2272_v19 = vpop.permute.xlu1 %2271 }
 0x8c5   : > { %6051 = vmatpush3.msra.mxu1 %v2272_v19  ;;  %6381 = vpow2.f32 %v2183_v21 }
 0x8c6   : > { %6060 = vmatprep.subr.mxu1 %v6740_v34 }
 0x8c8   : > { %v2434_v44 = vpop.permute.xlu1 %2433 }
 0x8cc   : > { %v2512_v59 = vpop.permute.xlu1 %2511 }
 0x8d0   : > { %v2510_v63 = vpop.permute.xlu1 %2509 }
 0x8d2   : > { %v6382_v29 = vpop.eup %6381 }
 0x8d3   : > { %v2188_v30 = vsel %vm1175_vm2, %v6382_v29, 0.0 }
 0x8ea   : > { %v7350_v22 = vpop.f32.mrf.mxu0 }
 0x8eb   : > { %v2010_v5 = vadd.f32 %v7332_v11, %v7350_v22 }
 0x8ec   : > { %v7352_v23 = vpop.f32.mrf.mxu0 }
 0x8ed   : > { %v2005_v7 = vadd.f32 %v7335_v12, %v7352_v23 }
 0x8ee   : > { %v2087_v24 = vpop.f32.mrf.mxu0 }
 0x8ef   : > { %v2169_v25 = vmul.f32 0.35355338, %v2087_v24 }
 0x8f0   : > { %v6039_v26 = vpop.f32.mrf.mxu0 }
 0x8f1   : > { %v2171_v27 = vadd.f32 %v2169_v25, %v7247_v55 }
 0x8f3   : > { %v2173_v28 = vsel %vm1175_vm2, %v2171_v27, -inf }
 0x8f4   : > { %2174 = vmax.xlane.f32.xlu0 %v2173_v28  ;;  %v2765_v28 = vld [vmem:[%s7309_s23 + $0x18] sm:$0xff] }
 0x8f8   : > { %2189 = vadd.xlane.f32.xlu0 %v2188_v30 }
 0x97d   : > { %v2175_v32 = vpop.xlane.xlu0 %2174 }
 0x97e   : > { %v2179_v35 = vsub.f32 %v2171_v27, %v2175_v32 }
 0x980   : > { %v2181_v36 = vmul.f32 1.442695, %v2179_v35 }
 0x981   : > { %v2190_v38 = vpop.xlane.xlu0 %2189 }
 0x982   : > { %6383 = vpow2.f32 %v2181_v36 }
 0x983   : > { %6385 = vrcp.f32 %v2190_v38 }
 0x98f   : > { %v6384_v40 = vpop.eup %6383 }
 0x990   : > { %v6386_v41 = vpop.eup %6385  ;;  %v2185_v42 = vsel %vm1175_vm2, %v6384_v40, 0.0 }
 0x991   : > { %2186 = vadd.xlane.f32.xlu0 %v2185_v42  ;;  %v2194_v43 = vmul.f32 %v6386_v41, %v6382_v29 }
 0x993   : > { %6053 = vmatmul.mubr.msk.f32.vlgmr.msra.gmra.mxu1 %vm1175_vm2, %v2194_v43 }
 0x994   : > { %6061 = vmatpush3.xpose.msk.msra.mxu1 %vm1175_vm2, %v2434_v44  ;;  %6062 = vmatprep.mubr.msk.f32.mxu1 %vm6741_vm1, %v6740_v34 }
 0x995   : > { %6070 = vmatprep.subr.mxu1 %v6740_v34 }
 0x9a7   : > { %2195 = vrot.lane.b32.xlu0 %v7227_v39, %s7805_s3  ;;  %s7859_s3 = sld [smem:[#allocation39_spill]] }
 0x9ab   : > { %2431 = vrot.lane.b32.xlu0 %v7227_v39, %s7800_s7 }
 0xa1a   : > { %v2187_v45 = vpop.xlane.xlu0 %2186 }
 0xa1b   : > { %6387 = vrcp.f32 %v2187_v45 }
 0xa1e   : > { %v2196_v46 = vpop.permute.xlu0 %2195 }
 0xa1f   : > { %6046 = vmatpush3.msra.mxu0 %v2196_v46 }
 0xa20   : > { %6055 = vmatprep.subr.mxu0 %v2347_v52 }
 0xa22   : > { %v2432_v47 = vpop.permute.xlu0 %2431 }
 0xa23   : > { %6063 = vmatmul.mubr.msk.f32.vlgmr.msra.gmra.mxu1 %vm1175_vm2, %v2432_v47 }
 0xa24   : > { %6072 = vmatprep.mubr.msk.f32.mxu1 %vm6741_vm1, %v6740_v34 }
 0xa28   : > { %v6388_v48 = vpop.eup %6387 }
 0xa29   : > { %v2192_v49 = vmul.f32 %v6388_v48, %v6384_v40 }
 0xa2b   : > { %6048 = vmatmul.mubr.msk.f32.vlgmr.msra.gmra.mxu0 %vm1175_vm2, %v2192_v49 }
 0xa2c   : > { %6056 = vmatpush3.msra.mxu0 %v2347_v52 }
 0xa2d   : > { %6065 = vmatprep.subr.mxu0 %v6740_v34 }
 0xa53   : > { %v2343_v50 = vpop.f32.mrf.mxu1 }
 0xa55   : > { %v6054_v51 = vpop.f32.mrf.mxu1 }
 0xae3   : > { %v2505_v53 = vpop.f32.mrf.mxu1 }
 0xae4   : > { %v2587_v54 = vmul.f32 0.35355338, %v2505_v53 }
 0xae5   : > { %v6064_v56 = vpop.f32.mrf.mxu1 }
 0xae6   : > { %v2589_v57 = vadd.f32 %v2587_v54, %v7247_v55 }
 0xae8   : > { %v2591_v58 = vsel %vm1175_vm2, %v2589_v57, -inf }
 0xae9   : > { %2592 = vmax.xlane.f32.xlu0 %v2591_v58  ;;  %v2906_v58 = vld [vmem:[%s7418_s5 + $0x10] sm:$0xff] }
 0xaeb   : > { %v2267_v60 = vpop.f32.mrf.mxu0 }
 0xaec   : > { %6057 = vmatprep.mubr.msk.f32.mxu0 %vm1175_vm2, %v2267_v60  ;;  %v2904_v60 = vld [vmem:[%s7418_s5] sm:$0xff] }
 0xaed   : > { %v6049_v62 = vpop.f32.mrf.mxu0  ;;  %6058 = vmatmul.mubr.msk.f32.vlgmr.msra.gmra.mxu0 %vm1175_vm2, %v2343_v50 }
 0xaee   : > { %6066 = vmatpush3.xpose.msk.msra.mxu0 %vm1175_vm2, %v2512_v59  ;;  %6067 = vmatprep.mubr.msk.f32.mxu0 %vm6741_vm1, %v6740_v34  ;;  %v2905_v59 = vld [vmem:[%s7418_s5 + $0x8] sm:$0xff] }
 0xaef   : > { %6075 = vmatprep.subr.mxu0 %v6740_v34 }
 0xaf1   : > { %6068 = vmatmul.mubr.msk.f32.vlgmr.msra.gmra.mxu0 %vm1175_vm2, %v2510_v63 }
 0xaf2   : > { %6077 = vmatprep.mubr.msk.f32.mxu0 %vm6741_vm1, %v6740_v34 }
 0xb72   : > { %v2593_v0 = vpop.xlane.xlu0 %2592 }
 0xb73   : > { %v2597_v1 = vsub.f32 %v2589_v57, %v2593_v0 }
 0xb75   : > { %v2599_v2 = vmul.f32 1.442695, %v2597_v1 }
 0xb77   : > { %6389 = vpow2.f32 %v2599_v2 }
 0xb84   : > { %v6390_v3 = vpop.eup %6389 }
 0xb85   : > { %v2603_v4 = vsel %vm1175_vm2, %v6390_v3, 0.0 }
 0xb86   : > { %2604 = vadd.xlane.f32.xlu0 %v2603_v4 }
 0xbad   : > { %v6059_v6 = vpop.f32.mrf.mxu0 }
 0xbae   : > { %v2430_v8 = vadd.f32 %v6059_v6, %v2010_v5  ;;  %v5739_v5 = vld [vmem:[%s7804_s27] ss:$0 sm:$0xff]  ;;  %s5836_s27 = sshll.u32 %s7182_s2, 7 }
 0xbaf   : > { %v2420_v9 = vpop.f32.mrf.mxu0 }
 0xbb0   : > { %v2429_v10 = vadd.f32 %v2420_v9, %v2005_v7 }
 0xbb1   : > { %v2583_v13 = vpop.f32.mrf.mxu0 }
 0xbb2   : > { %v2588_v14 = vmul.f32 0.35355338, %v2583_v13 }
 0xbb3   : > { %v6069_v15 = vpop.f32.mrf.mxu0 }
 0xbb4   : > { %v2590_v16 = vadd.f32 %v2588_v14, %v7250_v61 }
 0xbb6   : > { %v2594_v17 = vsel %vm1175_vm2, %v2590_v16, -inf }
 0xbb7   : > { %2595 = vmax.xlane.f32.xlu1 %v2594_v17 }
 0xbc8   : > { %2689 = vrot.lane.b32.xlu1 %v7225_v37, %s7798_s19 }
 0xc0f   : > { %v2605_v22 = vpop.xlane.xlu0 %2604 }
 0xc40   : > { %v2596_v11 = vpop.xlane.xlu1 %2595 }
 0xc41   : > { %v2598_v18 = vsub.f32 %v2590_v16, %v2596_v11 }
 0xc43   : > { %v2601_v19 = vmul.f32 1.442695, %v2598_v18 }
 0xc44   : > { %v2690_v20 = vpop.permute.xlu1 %2689 }
 0xc45   : > { %6391 = vpow2.f32 %v2601_v19  ;;  %6076 = vmatpush3.msra.mxu0 %v2690_v20 }
 0xc46   : > { %6393 = vrcp.f32 %v2605_v22 }
 0xc52   : > { %v6392_v12 = vpop.eup %6391 }
 0xc53   : > { %v2606_v21 = vsel %vm1175_vm2, %v6392_v12, 0.0  ;;  %v6394_v24 = vpop.eup %6393 }
 0xc54   : > { %2607 = vadd.xlane.f32.xlu0 %v2606_v21  ;;  %v2610_v25 = vmul.f32 %v6394_v24, %v6390_v3 }
 0xc6a   : > { %2613 = vrot.lane.b32.xlu0 %v7227_v39, %s7798_s19  ;;  %s7853_s19 = sld [smem:[#allocation33_spill]] }
 0xc70   : > { %s7405_s7 = scalar_lea.vmem %s7853_s19, %s7212_s29  ;;  %s7856_s19 = sld [smem:[#allocation37_spill]] }
 0xc71   : > { %v5738_v36 = vld [vmem:[%s7405_s7] ss:$0 sm:$0xff] }
 0xc76   : > { %s7445_s17 = scalar_lea.vmem %s7856_s19, %s5836_s27  ;;  %s7460_s19 = scalar_lea.vmem %s7857_s25, %s7212_s29 }
 0xc77   : > { %v3021_v16 = vld [vmem:[%s7445_s17 + $0x38] sm:$0xff]  ;;  %v3020_v17 = vld [vmem:[%s7445_s17 + $0x30] sm:$0xff]  ;;  %v3019_v11 = vld [vmem:[%s7445_s17 + $0x28] sm:$0xff]  ;;  %s7858_s25 = sld [smem:[#allocation38_spill]] }
 0xc78   : > { %v3018_v18 = vld [vmem:[%s7445_s17 + $0x20] sm:$0xff]  ;;  %v3017_v19 = vld [vmem:[%s7445_s17 + $0x18] sm:$0xff]  ;;  %v3016_v20 = vld [vmem:[%s7445_s17 + $0x10] sm:$0xff] }
 0xc79   : > { %v3014_v21 = vld [vmem:[%s7445_s17] sm:$0xff] }
 0xc7a   : > { %v5741_v22 = vld [vmem:[%s7460_s19] ss:$0 sm:$0xff] }
 0xc7d   : > { %s7471_s9 = scalar_lea.vmem %s7858_s25, %s7212_s29  ;;  %s7491_s25 = scalar_lea.vmem %s7859_s3, %s7212_s29 }
 0xc7e   : > { %s7860_s29 = smov 112   ;;  %s7868_s3 = sld [smem:[#allocation41_spill]] }
 0xcdd   : > { %v2608_v23 = vpop.xlane.xlu0 %2607 }
 0xcde   : > { %6395 = vrcp.f32 %v2608_v23 }
 0xce1   : > { %v2614_v37 = vpop.permute.xlu0 %2613 }
 0xce2   : > { %6071 = vmatpush3.msra.mxu1 %v2614_v37 }
 0xce3   : > { %6073 = vmatmul.mubr.msk.f32.vlgmr.msra.gmra.mxu1 %vm1175_vm2, %v2610_v25  ;;  %6080 = vmatprep.subr.mxu1 %v2765_v28 }
 0xce4   : > { %6081 = vmatpush3.msra.mxu1 %v2765_v28 }
 0xce5   : > { %6096 = vmatprep.subr.mxu1 %v3021_v16 }
 0xceb   : > { %v6396_v26 = vpop.eup %6395 }
 0xcec   : > { %v2612_v27 = vmul.f32 %v6396_v26, %v6392_v12  ;;  %v3015_v12 = vld [vmem:[%s7445_s17 + $0x8] sm:$0xff] }
 0xcee   : > { %6078 = vmatmul.mubr.msk.f32.vlgmr.msra.gmra.mxu0 %vm1175_vm2, %v2612_v27 }
 0xda3   : > { %v2685_v29 = vpop.f32.mrf.mxu1 }
 0xda4   : > { %6082 = vmatprep.mubr.msk.f32.mxu1 %vm1175_vm2, %v2685_v29 }
 0xda5   : > { %v6074_v39 = vpop.f32.mrf.mxu1 }
 0xdae   : > { %v2761_v30 = vpop.f32.mrf.mxu0 }
 0xdaf   : > { %6083 = vmatmul.mubr.msk.f32.vlgmr.msra.gmra.mxu1 %vm1175_vm2, %v2761_v30 }
 0xdb0   : > { %v6079_v32 = vpop.f32.mrf.mxu0  ;;  %6097 = vmatpush3.msra.mxu1 %v3021_v16  ;;  %v5747_v16 = vld [vmem:[%s822_s10] ss:$0 sm:$0xff] }
 0xdb1   : > { %6098 = vmatprep.subr.mxu1 %v3020_v17 }
 0xdb2   : > { %6099 = vmatpush3.msra.mxu1 %v3020_v17 }
 0xdb3   : > { %6100 = vmatprep.subr.mxu1 %v3019_v11 }
 0xdb4   : > { %6101 = vmatpush3.msra.mxu1 %v3019_v11 }
 0xdb5   : > { %6102 = vmatprep.subr.mxu1 %v3018_v18 }
 0xdb6   : > { %6103 = vmatpush3.msra.mxu1 %v3018_v18 }
 0xdb7   : > { %6104 = vmatprep.subr.mxu1 %v3017_v19 }
 0xdb8   : > { %6105 = vmatpush3.msra.mxu1 %v3017_v19 }
 0xdb9   : > { %6106 = vmatprep.subr.mxu1 %v3016_v20 }
 0xdba   : > { %6107 = vmatpush3.msra.mxu1 %v3016_v20  ;;  %v5748_v20 = vld [vmem:[%s7491_s25] ss:$0 sm:$0xff] }
 0xdbb   : > { %6108 = vmatprep.subr.mxu1 %v3015_v12 }
 0xdbc   : > { %6109 = vmatpush3.msra.mxu1 %v3015_v12 }
 0xdbd   : > { %6110 = vmatprep.subr.mxu1 %v3014_v21 }
 0xdbe   : > { %6111 = vmatpush3.msra.mxu1 %v3014_v21 }
 0xdbf   : > { %6131 = vmatprep.subr.mxu1 %v6740_v34 }
 0xe6f   : > { %v6084_v35 = vpop.f32.mrf.mxu1 }
 0xe70   : > { %v2848_v38 = vadd.f32 %v6084_v35, %v2430_v8 }
 0xe71   : > { %v2838_v40 = vpop.f32.mrf.mxu1 }
 0xe72   : > { %v2857_v41 = vadd.f32 %v5738_v36, %v2848_v38  ;;  %v2847_v42 = vadd.f32 %v2838_v40, %v2429_v10  ;;  %v5740_v10 = vld [vmem:[%s7430_s1] ss:$0 sm:$0xff] }
 0xe74   : > { %v2856_v43 = vadd.f32 %v5738_v36, %v2847_v42  ;;  %v2859_v44 = vadd.f32 %v2857_v41, %v7205_v33 }
 0xe76   : > { %v2865_v45 = vsel %vm1010_vm0, %v2859_v44, 0.0  ;;  %v2858_v46 = vadd.f32 %v2856_v43, %v7201_v31  ;;  %v2907_v31 = vld [vmem:[%s7418_s5 + $0x18] sm:$0xff] }
 0xe77   : > { %2866 = vadd.xlane.f32.xlu0 %v2865_v45  ;;  %6085 = vmatprep.subr.mxu0 %v2907_v31 }
 0xe78   : > { %v2862_v47 = vsel %vm1010_vm0, %v2858_v46, 0.0  ;;  %6086 = vmatpush3.msra.mxu0 %v2907_v31 }
 0xe79   : > { %2863 = vadd.xlane.f32.xlu1 %v2862_v47  ;;  %6087 = vmatprep.subr.mxu0 %v2906_v58 }
 0xe7a   : > { %6088 = vmatpush3.msra.mxu0 %v2906_v58 }
 0xe7b   : > { %6089 = vmatprep.subr.mxu0 %v2905_v59 }
 0xe7c   : > { %6090 = vmatpush3.msra.mxu0 %v2905_v59 }
 0xe7d   : > { %6091 = vmatprep.subr.mxu0 %v2904_v60 }
 0xe7e   : > { %6092 = vmatpush3.msra.mxu0 %v2904_v60 }
 0xf00   : > { %v2867_v48 = vpop.xlane.xlu0 %2866 }
 0xf01   : > { %v2869_v49 = vmul.f32 0.03125, %v2867_v48  ;;  %v5744_v48 = vld [vmem:[%s7471_s9] ss:$0 sm:$0xff] }
 0xf02   : > { %v2864_v50 = vpop.xlane.xlu1 %2863 }
 0xf03   : > { %v2871_v51 = vsub.f32 %v2859_v44, %v2869_v49  ;;  %v2868_v52 = vmul.f32 0.03125, %v2864_v50 }
 0xf05   : > { %v2870_v53 = vsub.f32 %v2858_v46, %v2868_v52  ;;  %v2873_v54 = vmul.f32 %v2871_v51, %v2871_v51 }
 0xf07   : > { %v2877_v56 = vsel %vm1010_vm0, %v2873_v54, 0.0  ;;  %v2872_v57 = vmul.f32 %v2870_v53, %v2870_v53 }
 0xf08   : > { %2878 = vadd.xlane.f32.xlu1 %v2877_v56 }
 0xf09   : > { %v2874_v33 = vsel %vm1010_vm0, %v2872_v57, 0.0 }
 0xf0a   : > { %2875 = vadd.xlane.f32.xlu0 %v2874_v33 }
 0xf91   : > { %v2879_v62 = vpop.xlane.xlu1 %2878 }
 0xf92   : > { %v2881_v63 = vmul.f32 0.03125, %v2879_v62 }
 0xf93   : > { %v2876_v0 = vpop.xlane.xlu0 %2875 }
 0xf94   : > { %v2883_v1 = vadd.f32 1e-12, %v2881_v63  ;;  %v2880_v2 = vmul.f32 0.03125, %v2876_v0 }
 0xf96   : > { %6397 = vrsqrt.f32 %v2883_v1  ;;  %v2882_v3 = vadd.f32 1e-12, %v2880_v2 }
 0xf98   : > { %6399 = vrsqrt.f32 %v2882_v3  ;;  %v5752_v3 = vld [vmem:[%s7191_s11 + $0x38] sm:$0xff] }
 0xf99   : > { %6115 = vmatprep.subr.mxu0 %v5752_v3 }
 0xfa3   : > { %v6398_v4 = vpop.eup %6397 }
 0xfa4   : > { %v2887_v6 = vmul.f32 %v6398_v4, %v2871_v51  ;;  %v5751_v4 = vld [vmem:[%s7191_s11 + $0x30] sm:$0xff] }
 0xfa5   : > { %v6400_v7 = vpop.eup %6399 }
 0xfa6   : > { %v2886_v8 = vmul.f32 %v6400_v7, %v2870_v53  ;;  %v2895_v9 = vmul.f32 %v5739_v5, %v2887_v6  ;;  %v5749_v6 = vld [vmem:[%s7191_s11 + $0x20] sm:$0xff] }
 0xfa8   : > { %v2894_v13 = vmul.f32 %v5739_v5, %v2886_v8  ;;  %v7435_v15 = vadd.f32 %v5740_v10, %v2895_v9  ;;  %v5750_v5 = vld [vmem:[%s7191_s11 + $0x28] sm:$0xff] }
 0xfaa   : > { %v7433_v14 = vadd.f32 %v5740_v10, %v2894_v13 }
 0xfac   : > { %6093 = vmatprep.mubr.msk.f32.mxu0 %vm1010_vm0, %v7433_v14 }
 0xfad   : > { %6094 = vmatmul.mubr.msk.f32.vlgmr.msra.gmra.mxu0 %vm1010_vm0, %v7435_v15 }
 0xfae   : > { %6116 = vmatpush3.msra.mxu0 %v5752_v3 }
 0xfaf   : > { %6117 = vmatprep.subr.mxu0 %v5751_v4 }
 0xfb0   : > { %6118 = vmatpush3.msra.mxu0 %v5751_v4 }
 0xfb1   : > { %6119 = vmatprep.subr.mxu0 %v5750_v5 }
 0xfb2   : > { %6120 = vmatpush3.msra.mxu0 %v5750_v5 }
 0xfb3   : > { %6121 = vmatprep.subr.mxu0 %v5749_v6 }
 0xfb4   : > { %6122 = vmatpush3.msra.mxu0 %v5749_v6 }
 0xfb5   : > { %6126 = vmatprep.subr.mxu0 %v6740_v34 }
0x106d   : > { %v6095_v23 = vpop.f32.mrf.mxu0 }
0x106e   : > { %v2993_v24 = vadd.f32 %v6095_v23, %v5741_v22  ;;  %v5754_v23 = vld [vmem:[%s7222_s6 + $0x1] ss:$0 sm:$0xff]  ;;  %s7861_s6 = smov 48  }
0x106f   : > { %v2987_v37 = vpop.f32.mrf.mxu0 }
0x1070   : > { %v2997_v25 = vmul.f32 %v2993_v24, %v2993_v24  ;;  %v2988_v26 = vadd.f32 %v5741_v22, %v2987_v37 }
0x1072   : > { %v2999_v27 = vmul.f32 %v2997_v25, %v2993_v24  ;;  %v2996_v28 = vmul.f32 %v2988_v26, %v2988_v26 }
0x1074   : > { %v3001_v29 = vmul.f32 0.044715, %v2999_v27  ;;  %v2998_v39 = vmul.f32 %v2996_v28, %v2988_v26 }
0x1076   : > { %v3003_v30 = vadd.f32 %v3001_v29, %v2993_v24  ;;  %v3000_v32 = vmul.f32 0.044715, %v2998_v39 }
0x1078   : > { %v3005_v35 = vmul.f32 0.7978846, %v3003_v30  ;;  %v3002_v36 = vadd.f32 %v3000_v32, %v2988_v26 }
0x107a   : > { %6401 = vtanh.f32 %v3005_v35  ;;  %v3004_v38 = vmul.f32 0.7978846, %v3002_v36 }
0x107c   : > { %6403 = vtanh.f32 %v3004_v38 }
0x1087   : > { %v6402_v40 = vpop.eup %6401 }
0x1088   : > { %v3009_v41 = vadd.f32 1.0, %v6402_v40 }
0x1089   : > { %v6404_v42 = vpop.eup %6403 }
0x108a   : > { %v3008_v43 = vadd.f32 1.0, %v6404_v42  ;;  %v3011_v44 = vmul.f32 0.5, %v3009_v41 }
0x108c   : > { %v3010_v45 = vmul.f32 0.5, %v3008_v43  ;;  %v3013_v47 = vmul.f32 %v3011_v44, %v2993_v24 }
0x108e   : > { %v3012_v46 = vmul.f32 %v3010_v45, %v2988_v26 }
0x1090   : > { %6112 = vmatprep.mubr.msk.f32.mxu1 %vm3029_vm3, %v3012_v46 }
0x1091   : > { %6113 = vmatmul.mubr.msk.f32.vlgmr.msra.gmra.mxu1 %vm3029_vm3, %v3013_v47 }
0x1092   : > { %6133 = vmatprep.mubr.msk.f32.mxu1 %vm6741_vm1, %v6740_v34 }
0x1151   : > { %v6114_v49 = vpop.f32.mrf.mxu1 }
0x1152   : > { %v3108_v50 = vadd.f32 %v6114_v49, %v5744_v48 }
0x1153   : > { %v3102_v51 = vpop.f32.mrf.mxu1 }
0x1154   : > { %v3103_v52 = vadd.f32 %v5744_v48, %v3102_v51  ;;  %v3112_v53 = vadd.f32 %v3108_v50, %v7435_v15 }
0x1156   : > { %v3118_v54 = vsel %vm1010_vm0, %v3112_v53, 0.0  ;;  %v3111_v56 = vadd.f32 %v3103_v52, %v7433_v14 }
0x1157   : > { %3119 = vadd.xlane.f32.xlu1 %v3118_v54 }
0x1158   : > { %v3115_v57 = vsel %vm1010_vm0, %v3111_v56, 0.0 }
0x1159   : > { %3116 = vadd.xlane.f32.xlu0 %v3115_v57 }
0x11e0   : > { %v3120_v33 = vpop.xlane.xlu1 %3119 }
0x11e1   : > { %v3122_v31 = vmul.f32 0.03125, %v3120_v33 }
0x11e2   : > { %v3117_v58 = vpop.xlane.xlu0 %3116 }
0x11e3   : > { %v3124_v59 = vsub.f32 %v3112_v53, %v3122_v31  ;;  %v3121_v60 = vmul.f32 0.03125, %v3117_v58 }
0x11e5   : > { %v3123_v62 = vsub.f32 %v3111_v56, %v3121_v60  ;;  %v3126_v63 = vmul.f32 %v3124_v59, %v3124_v59 }
0x11e7   : > { %v3130_v0 = vsel %vm1010_vm0, %v3126_v63, 0.0  ;;  %v3125_v1 = vmul.f32 %v3123_v62, %v3123_v62 }
0x11e8   : > { %3131 = vadd.xlane.f32.xlu1 %v3130_v0 }
0x11e9   : > { %v3127_v2 = vsel %vm1010_vm0, %v3125_v1, 0.0 }
0x11ea   : > { %3128 = vadd.xlane.f32.xlu0 %v3127_v2 }
0x1271   : > { %v3132_v7 = vpop.xlane.xlu1 %3131 }
0x1272   : > { %v3134_v8 = vmul.f32 0.03125, %v3132_v7 }
0x1273   : > { %v3129_v9 = vpop.xlane.xlu0 %3128 }
0x1274   : > { %v3136_v10 = vadd.f32 1e-12, %v3134_v8  ;;  %v3133_v13 = vmul.f32 0.03125, %v3129_v9 }
0x1276   : > { %6405 = vrsqrt.f32 %v3136_v10  ;;  %v3135_v14 = vadd.f32 1e-12, %v3133_v13 }
0x1278   : > { %6407 = vrsqrt.f32 %v3135_v14 }
0x1283   : > { %v6406_v15 = vpop.eup %6405 }
0x1284   : > { %v3140_v17 = vmul.f32 %v6406_v15, %v3124_v59 }
0x1285   : > { %v6408_v11 = vpop.eup %6407 }
0x1286   : > { %v3139_v18 = vmul.f32 %v6408_v11, %v3123_v62  ;;  %v3148_v19 = vmul.f32 %v5747_v16, %v3140_v17 }
0x1288   : > { %v3147_v12 = vmul.f32 %v5747_v16, %v3139_v18  ;;  %v7496_v22 = vadd.f32 %v5748_v20, %v3148_v19 }
0x128a   : > { %v7494_v21 = vadd.f32 %v5748_v20, %v3147_v12 }
0x128c   : > { %6123 = vmatprep.mubr.msk.f32.mxu0 %vm1010_vm0, %v7494_v21 }
0x128d   : > { %6124 = vmatmul.mubr.msk.f32.vlgmr.msra.gmra.mxu0 %vm1010_vm0, %v7496_v22 }
0x128e   : > { %6128 = vmatprep.mubr.msk.f32.mxu0 %vm6741_vm1, %v6740_v34 }
0x134d   : > { %v6125_v24 = vpop.f32.mrf.mxu0 }
0x134e   : > { %v7505_v37 = vadd.f32 %v6125_v24, %v5754_v23 }
0x134f   : > { %v3242_v25 = vpop.f32.mrf.mxu0 }
0x1350   : > { %v7507_v26 = vadd.f32 %v5754_v23, %v3242_v25  ;;  %3329 = vrot.lane.b32.xlu1 %v7505_v37, %s6742_s21 }
0x1352   : > { %3252 = vrot.lane.b32.xlu0 %v7507_v26, %s6742_s21  ;;  %s7862_s21 = smov 72  }
0x13c2   : > { %v3330_v27 = vpop.permute.xlu1 %3329 }
0x13c3   : > { %6132 = vmatpush3.xpose.msk.msra.mxu1 %vm1175_vm2, %v3330_v27 }
0x13c4   : > { %v3253_v28 = vpop.permute.xlu0 %3252  ;;  %6141 = vmatprep.subr.mxu1 %v6740_v34 }
0x13c5   : > { %6127 = vmatpush3.xpose.msk.msra.mxu0 %vm1175_vm2, %v3253_v28 }
0x13c6   : > { %6134 = vmatmul.mubr.msk.f32.vlgmr.msra.gmra.mxu1 %vm1175_vm2, %v7505_v37  ;;  %6136 = vmatprep.subr.mxu0 %v6740_v34 }
0x13c7   : > { %6143 = vmatprep.mubr.msk.f32.mxu1 %vm6741_vm1, %v6740_v34 }
0x13c8   : > { %6129 = vmatmul.mubr.msk.f32.vlgmr.msra.gmra.mxu0 %vm1175_vm2, %v7507_v26 }
0x13c9   : > { %6138 = vmatprep.mubr.msk.f32.mxu0 %vm6741_vm1, %v6740_v34 }
0x1486   : > { %v3401_v29 = vpop.f32.mrf.mxu1 }
0x1487   : > { %v3406_v39 = vmul.f32 0.35355338, %v3401_v29  ;;  %v5763_v29 = vld [vmem:[%s7309_s23 + $0x20] sm:$0xff] }
0x1488   : > { %v3324_v30 = vpop.f32.mrf.mxu0  ;;  %v6135_v32 = vpop.f32.mrf.mxu1 }
0x1489   : > { %v3405_v35 = vmul.f32 0.35355338, %v3324_v30  ;;  %v3408_v36 = vadd.f32 %v3406_v39, %v7250_v61 }
0x148a   : > { %v6130_v38 = vpop.f32.mrf.mxu0 }
0x148b   : > { %v3412_v40 = vsel %vm1175_vm2, %v3408_v36, -inf  ;;  %v3407_v41 = vadd.f32 %v3405_v35, %v7247_v55 }
0x148c   : > { %3413 = vmax.xlane.f32.xlu0 %v3412_v40 }
0x148d   : > { %v3409_v42 = vsel %vm1175_vm2, %v3407_v41, -inf }
0x148e   : > { %3410 = vmax.xlane.f32.xlu1 %v3409_v42 }
0x1515   : > { %v3414_v43 = vpop.xlane.xlu0 %3413 }
0x1516   : > { %v3416_v44 = vsub.f32 %v3408_v36, %v3414_v43 }
0x1517   : > { %v3411_v45 = vpop.xlane.xlu1 %3410 }
0x1518   : > { %v3419_v46 = vmul.f32 1.442695, %v3416_v44  ;;  %v3415_v47 = vsub.f32 %v3407_v41, %v3411_v45  ;;  %v5770_v44 = vld [vmem:[%s7309_s23 + $0x28] sm:$0xff] }
0x151a   : > { %6409 = vpow2.f32 %v3419_v46  ;;  %v3417_v48 = vmul.f32 1.442695, %v3415_v47 }
0x151c   : > { %6411 = vpow2.f32 %v3417_v48 }
0x1527   : > { %v6410_v49 = vpop.eup %6409 }
0x1528   : > { %v3424_v50 = vsel %vm1175_vm2, %v6410_v49, 0.0 }
0x1529   : > { %v6412_v51 = vpop.eup %6411  ;;  %3425 = vadd.xlane.f32.xlu1 %v3424_v50 }
0x152a   : > { %v3421_v52 = vsel %vm1175_vm2, %v6412_v51, 0.0 }
0x152b   : > { %3422 = vadd.xlane.f32.xlu0 %v3421_v52 }
0x153a   : > { %3507 = vrot.lane.b32.xlu1 %v7505_v37, %s6744_s26 }
0x153e   : > { %3587 = vrot.lane.b32.xlu1 %v7507_v26, %s6745_s18 }
0x1541   : > { %3431 = vrot.lane.b32.xlu0 %v7507_v26, %s6744_s26  ;;  %s7863_s26 = smov 104  }
0x1542   : > { %3665 = vrot.lane.b32.xlu1 %v7505_v37, %s6745_s18  ;;  %s7864_s18 = smov 40  }
0x1545   : > { %3585 = vrot.lane.b32.xlu0 %v7507_v26, %s6746_s4 }
0x1546   : > { %3663 = vrot.lane.b32.xlu1 %v7505_v37, %s6746_s4  ;;  %s7865_s4 = scalar_lea.vmem [#allocation10], %s7157_s20 }
0x15b2   : > { %v3426_v53 = vpop.xlane.xlu1 %3425 }
0x15b3   : > { %6413 = vrcp.f32 %v3426_v53 }
0x15b4   : > { %v3423_v54 = vpop.xlane.xlu0 %3422 }
0x15b5   : > { %6415 = vrcp.f32 %v3423_v54 }
0x15b6   : > { %v3508_v56 = vpop.permute.xlu1 %3507 }
0x15b7   : > { %6142 = vmatpush3.msra.mxu1 %v3508_v56 }
0x15b8   : > { %v3432_v57 = vpop.permute.xlu0 %3431  ;;  %6151 = vmatprep.subr.mxu1 %v6740_v34 }
0x15b9   : > { %6137 = vmatpush3.msra.mxu0 %v3432_v57 }
0x15ba   : > { %v3588_v33 = vpop.permute.xlu1 %3587  ;;  %6146 = vmatprep.subr.mxu0 %v6740_v34 }
0x15bc   : > { %v3586_v0 = vpop.permute.xlu0 %3585 }
0x15be   : > { %v3666_v58 = vpop.permute.xlu1 %3665 }
0x15c0   : > { %v6414_v31 = vpop.eup %6413 }
0x15c1   : > { %v3430_v59 = vmul.f32 %v6414_v31, %v6410_v49 }
0x15c2   : > { %v6416_v60 = vpop.eup %6415  ;;  %v3664_v63 = vpop.permute.xlu1 %3663 }
0x15c3   : > { %6144 = vmatmul.mubr.msk.f32.vlgmr.msra.gmra.mxu1 %vm1175_vm2, %v3430_v59  ;;  %v3428_v62 = vmul.f32 %v6416_v60, %v6412_v51 }
0x15c4   : > { %6152 = vmatpush3.xpose.msk.msra.mxu1 %vm1175_vm2, %v3666_v58  ;;  %6153 = vmatprep.mubr.msk.f32.mxu1 %vm6741_vm1, %v6740_v34 }
0x15c5   : > { %6139 = vmatmul.mubr.msk.f32.vlgmr.msra.gmra.mxu0 %vm1175_vm2, %v3428_v62  ;;  %6161 = vmatprep.subr.mxu1 %v6740_v34 }
0x15c6   : > { %6147 = vmatpush3.xpose.msk.msra.mxu0 %vm1175_vm2, %v3588_v33  ;;  %6148 = vmatprep.mubr.msk.f32.mxu0 %vm6741_vm1, %v6740_v34 }
0x15c7   : > { %6154 = vmatmul.mubr.msk.f32.vlgmr.msra.gmra.mxu1 %vm1175_vm2, %v3664_v63  ;;  %6156 = vmatprep.subr.mxu0 %v6740_v34 }
0x15c8   : > { %6163 = vmatprep.mubr.msk.f32.mxu1 %vm6741_vm1, %v6740_v34 }
0x15c9   : > { %6149 = vmatmul.mubr.msk.f32.vlgmr.msra.gmra.mxu0 %vm1175_vm2, %v3586_v0 }
0x15ca   : > { %6158 = vmatprep.mubr.msk.f32.mxu0 %vm6741_vm1, %v6740_v34 }
0x1683   : > { %v3579_v1 = vpop.f32.mrf.mxu1 }
0x1685   : > { %v3503_v2 = vpop.f32.mrf.mxu0  ;;  %v6145_v3 = vpop.f32.mrf.mxu1 }
0x1687   : > { %v6140_v4 = vpop.f32.mrf.mxu0  ;;  %v3737_v5 = vpop.f32.mrf.mxu1 }
0x1688   : > { %v3742_v6 = vmul.f32 0.35355338, %v3737_v5 }
0x1689   : > { %v3659_v7 = vpop.f32.mrf.mxu0  ;;  %v6155_v8 = vpop.f32.mrf.mxu1 }
0x168a   : > { %v3741_v9 = vmul.f32 0.35355338, %v3659_v7  ;;  %v3744_v10 = vadd.f32 %v3742_v6, %v7250_v61 }
0x168b   : > { %v6150_v13 = vpop.f32.mrf.mxu0 }
0x168c   : > { %v3748_v14 = vsel %vm1175_vm2, %v3744_v10, -inf  ;;  %v3743_v15 = vadd.f32 %v3741_v9, %v7247_v55 }
0x168d   : > { %3749 = vmax.xlane.f32.xlu1 %v3748_v14 }
0x168e   : > { %v3745_v16 = vsel %vm1175_vm2, %v3743_v15, -inf }
0x168f   : > { %3746 = vmax.xlane.f32.xlu0 %v3745_v16 }
0x169e   : > { %3843 = vrot.lane.b32.xlu1 %v7505_v37, %s6747_s24 }
0x16a2   : > { %4084 = vrot.lane.b32.xlu1 %v7507_v26, %s6748_s22 }
0x16a6   : > { %4162 = vrot.lane.b32.xlu1 %v7505_v37, %s6748_s22 }
0x16aa   : > { %4160 = vrot.lane.b32.xlu1 %v7505_v37, %s7860_s29 }
0x1716   : > { %v3750_v17 = vpop.xlane.xlu1 %3749 }
0x1717   : > { %v3752_v11 = vsub.f32 %v3744_v10, %v3750_v17 }
0x1718   : > { %v3747_v18 = vpop.xlane.xlu0 %3746 }
0x1719   : > { %v3755_v19 = vmul.f32 1.442695, %v3752_v11  ;;  %v3751_v20 = vsub.f32 %v3743_v15, %v3747_v18 }
0x171a   : > { %v3844_v12 = vpop.permute.xlu1 %3843 }
0x171b   : > { %6417 = vpow2.f32 %v3755_v19  ;;  %v3753_v23 = vmul.f32 1.442695, %v3751_v20  ;;  %6162 = vmatpush3.msra.mxu1 %v3844_v12 }
0x171c   : > { %6171 = vmatprep.subr.mxu1 %v5763_v29 }
0x171d   : > { %6419 = vpow2.f32 %v3753_v23 }
0x171e   : > { %v4085_v35 = vpop.permute.xlu1 %4084 }
0x1722   : > { %v4163_v41 = vpop.permute.xlu1 %4162 }
0x1726   : > { %v4161_v43 = vpop.permute.xlu1 %4160 }
0x1728   : > { %v6418_v24 = vpop.eup %6417 }
0x1729   : > { %v3760_v25 = vsel %vm1175_vm2, %v6418_v24, 0.0 }
0x172a   : > { %v6420_v27 = vpop.eup %6419  ;;  %3761 = vadd.xlane.f32.xlu0 %v3760_v25 }
0x172b   : > { %v3757_v28 = vsel %vm1175_vm2, %v6420_v27, 0.0 }
0x172e   : > { %3758 = vadd.xlane.f32.xlu0 %v3757_v28 }
0x1744   : > { %3767 = vrot.lane.b32.xlu0 %v7507_v26, %s6747_s24  ;;  %s5685_s24 = sshll.u32 %s7147_s15, 5 }
0x1745   : > { %s831_s22 = scalar_lea.vmem [#allocation13], %s5685_s24 }
0x1748   : > { %4082 = vrot.lane.b32.xlu0 %v7507_v26, %s7860_s29  ;;  %s5326_s29 = scalar_lea.sflag [#allocation4], %s7147_s15 }
0x17b3   : > { %v3762_v39 = vpop.xlane.xlu0 %3761 }
0x17b4   : > { %6421 = vrcp.f32 %v3762_v39 }
0x17b7   : > { %v3759_v30 = vpop.xlane.xlu0 %3758 }
0x17b8   : > { %6423 = vrcp.f32 %v3759_v30 }
0x17bb   : > { %v3768_v32 = vpop.permute.xlu0 %3767 }
0x17bc   : > { %6157 = vmatpush3.msra.mxu0 %v3768_v32 }
0x17bd   : > { %6166 = vmatprep.subr.mxu0 %v5770_v44 }
0x17bf   : > { %v4083_v52 = vpop.permute.xlu0 %4082 }
0x17c1   : > { %v6422_v36 = vpop.eup %6421 }
0x17c2   : > { %v3766_v38 = vmul.f32 %v6422_v36, %v6418_v24  ;;  %v5781_v24 = vld [vmem:[%s7309_s23 + $0x30] sm:$0xff] }
0x17c4   : > { %6164 = vmatmul.mubr.msk.f32.vlgmr.msra.gmra.mxu1 %vm1175_vm2, %v3766_v38 }
0x17c5   : > { %v6424_v40 = vpop.eup %6423  ;;  %6173 = vmatprep.mubr.msk.f32.mxu1 %vm1175_vm2, %v3503_v2  ;;  %6172 = vmatpush3.msra.mxu1 %v5763_v29 }
0x17c6   : > { %6181 = vmatprep.subr.mxu1 %v6740_v34  ;;  %v3764_v42 = vmul.f32 %v6424_v40, %v6420_v27 }
0x17c8   : > { %6159 = vmatmul.mubr.msk.f32.vlgmr.msra.gmra.mxu0 %vm1175_vm2, %v3764_v42  ;;  %6174 = vmatmul.mubr.msk.f32.vlgmr.msra.gmra.mxu1 %vm1175_vm2, %v3579_v1 }
0x17c9   : > { %6182 = vmatpush3.xpose.msk.msra.mxu1 %vm1175_vm2, %v4163_v41  ;;  %6183 = vmatprep.mubr.msk.f32.mxu1 %vm6741_vm1, %v6740_v34 }
0x17ca   : > { %6191 = vmatprep.subr.mxu1 %v6740_v34  ;;  %6167 = vmatpush3.msra.mxu0 %v5770_v44 }
0x17cb   : > { %6176 = vmatprep.subr.mxu0 %v6740_v34 }
0x17cc   : > { %6184 = vmatmul.mubr.msk.f32.vlgmr.msra.gmra.mxu1 %vm1175_vm2, %v4161_v43 }
0x17cd   : > { %6193 = vmatprep.mubr.msk.f32.mxu1 %vm6741_vm1, %v6740_v34 }
0x1884   : > { %v3915_v45 = vpop.f32.mrf.mxu1 }
0x1886   : > { %v6165_v46 = vpop.f32.mrf.mxu1 }
0x1888   : > { %v3839_v47 = vpop.f32.mrf.mxu0  ;;  %v7594_v48 = vpop.f32.mrf.mxu1 }
0x1889   : > { %6168 = vmatprep.mubr.msk.f32.mxu0 %vm1175_vm2, %v3839_v47 }
0x188a   : > { %v6160_v49 = vpop.f32.mrf.mxu0  ;;  %6169 = vmatmul.mubr.msk.f32.vlgmr.msra.gmra.mxu0 %vm1175_vm2, %v3915_v45  ;;  %v7598_v50 = vpop.f32.mrf.mxu1 }
0x188b   : > { %6177 = vmatpush3.xpose.msk.msra.mxu0 %vm1175_vm2, %v4085_v35  ;;  %6178 = vmatprep.mubr.msk.f32.mxu0 %vm6741_vm1, %v6740_v34 }
0x188c   : > { %v4234_v51 = vpop.f32.mrf.mxu1  ;;  %6186 = vmatprep.subr.mxu0 %v6740_v34 }
0x188d   : > { %v4239_v53 = vmul.f32 0.35355338, %v4234_v51 }
0x188e   : > { %6179 = vmatmul.mubr.msk.f32.vlgmr.msra.gmra.mxu0 %vm1175_vm2, %v4083_v52  ;;  %v6185_v54 = vpop.f32.mrf.mxu1 }
0x188f   : > { %v4241_v56 = vadd.f32 %v4239_v53, %v7250_v61  ;;  %6188 = vmatprep.mubr.msk.f32.mxu0 %vm6741_vm1, %v6740_v34 }
0x1891   : > { %v4245_v57 = vsel %vm1175_vm2, %v4241_v56, -inf }
0x1892   : > { %4246 = vmax.xlane.f32.xlu1 %v4245_v57 }
0x18a3   : > { %4340 = vrot.lane.b32.xlu1 %v7505_v37, %s7861_s6 }
0x18a7   : > { %4502 = vrot.lane.b32.xlu1 %v7507_v26, %s7862_s21 }
0x18ab   : > { %4580 = vrot.lane.b32.xlu1 %v7505_v37, %s7862_s21 }
0x18af   : > { %4578 = vrot.lane.b32.xlu1 %v7505_v37, %s7863_s26 }
0x191b   : > { %v4247_v33 = vpop.xlane.xlu1 %4246 }
0x191c   : > { %v4249_v58 = vsub.f32 %v4241_v56, %v4247_v33 }
0x191e   : > { %v4252_v59 = vmul.f32 1.442695, %v4249_v58 }
0x191f   : > { %v4341_v31 = vpop.permute.xlu1 %4340 }
0x1920   : > { %6192 = vmatpush3.msra.mxu1 %v4341_v31  ;;  %6425 = vpow2.f32 %v4252_v59 }
0x1921   : > { %6201 = vmatprep.subr.mxu1 %v6740_v34 }
0x1923   : > { %v4503_v16 = vpop.permute.xlu1 %4502 }
0x1927   : > { %v4581_v30 = vpop.permute.xlu1 %4580 }
0x192b   : > { %v4579_v36 = vpop.permute.xlu1 %4578 }
0x192d   : > { %v6426_v4 = vpop.eup %6425 }
0x192e   : > { %v4257_v5 = vsel %vm1175_vm2, %v6426_v4, 0.0 }
0x194a   : > { %v7618_v60 = vpop.f32.mrf.mxu0 }
0x194b   : > { %v4079_v43 = vadd.f32 %v7594_v48, %v7618_v60 }
0x194c   : > { %v7620_v62 = vpop.f32.mrf.mxu0 }
0x194d   : > { %v4074_v45 = vadd.f32 %v7598_v50, %v7620_v62 }
0x194e   : > { %v4156_v63 = vpop.f32.mrf.mxu0 }
0x194f   : > { %v4238_v0 = vmul.f32 0.35355338, %v4156_v63 }
0x1950   : > { %v6180_v1 = vpop.f32.mrf.mxu0 }
0x1951   : > { %v4240_v2 = vadd.f32 %v4238_v0, %v7247_v55  ;;  %v5790_v1 = vld [vmem:[%s7309_s23 + $0x38] sm:$0xff] }
0x1953   : > { %v4242_v3 = vsel %vm1175_vm2, %v4240_v2, -inf }
0x1954   : > { %4243 = vmax.xlane.f32.xlu0 %v4242_v3 }
0x1958   : > { %4258 = vadd.xlane.f32.xlu0 %v4257_v5 }
0x19dd   : > { %v4244_v6 = vpop.xlane.xlu0 %4243 }
0x19de   : > { %v4248_v7 = vsub.f32 %v4240_v2, %v4244_v6  ;;  %v5794_v6 = vld [vmem:[%s7405_s7 + $0x1] ss:$0 sm:$0xff]  ;;  %s7867_s7 = sld [smem:[#allocation24_spill]] }
0x19e0   : > { %v4250_v8 = vmul.f32 1.442695, %v4248_v7 }
0x19e1   : > { %v4259_v9 = vpop.xlane.xlu0 %4258 }
0x19e2   : > { %6427 = vpow2.f32 %v4250_v8 }
0x19e3   : > { %6429 = vrcp.f32 %v4259_v9 }
0x19e4   : > { %p7869_p11 = scmp.ne.s32.totalorder %s7867_s7, 0 }
0x19ef   : > { %v6428_v10 = vpop.eup %6427 }
0x19f0   : > { %v6430_v13 = vpop.eup %6429  ;;  %v4254_v14 = vsel %vm1175_vm2, %v6428_v10, 0.0 }
0x19f1   : > { %4255 = vadd.xlane.f32.xlu0 %v4254_v14  ;;  %v4263_v15 = vmul.f32 %v6430_v13, %v6426_v4 }
0x19f3   : > { %6194 = vmatmul.mubr.msk.f32.vlgmr.msra.gmra.mxu1 %vm1175_vm2, %v4263_v15 }
0x19f4   : > { %6202 = vmatpush3.xpose.msk.msra.mxu1 %vm1175_vm2, %v4503_v16  ;;  %6203 = vmatprep.mubr.msk.f32.mxu1 %vm6741_vm1, %v6740_v34 }
0x19f5   : > { %6211 = vmatprep.subr.mxu1 %v6740_v34 }
0x1a07   : > { %4264 = vrot.lane.b32.xlu0 %v7507_v26, %s7861_s6  ;;  %s6754_s6 = smov [#allocation14]  }
0x1a08   : > { %s6655_s21 = sshll.u32 %s6754_s6, 4  ;;  %s6656_s21 = int_to_ptr.vmem [resolvable:$false] %s6655_s21 }
0x1a0b   : > { %4500 = vrot.lane.b32.xlu0 %v7507_v26, %s7863_s26 }
0x1a7a   : > { %v4256_v17 = vpop.xlane.xlu0 %4255 }
0x1a7b   : > { %6431 = vrcp.f32 %v4256_v17 }
0x1a7e   : > { %v4265_v11 = vpop.permute.xlu0 %4264 }
0x1a7f   : > { %6187 = vmatpush3.msra.mxu0 %v4265_v11 }
0x1a80   : > { %6196 = vmatprep.subr.mxu0 %v5781_v24 }
0x1a82   : > { %v4501_v18 = vpop.permute.xlu0 %4500 }
0x1a83   : > { %6204 = vmatmul.mubr.msk.f32.vlgmr.msra.gmra.mxu1 %vm1175_vm2, %v4501_v18 }
0x1a84   : > { %6213 = vmatprep.mubr.msk.f32.mxu1 %vm6741_vm1, %v6740_v34 }
0x1a88   : > { %v6432_v19 = vpop.eup %6431 }
0x1a89   : > { %v4261_v20 = vmul.f32 %v6432_v19, %v6428_v10 }
0x1a8b   : > { %6189 = vmatmul.mubr.msk.f32.vlgmr.msra.gmra.mxu0 %vm1175_vm2, %v4261_v20 }
0x1a8c   : > { %6197 = vmatpush3.msra.mxu0 %v5781_v24 }
0x1a8d   : > { %6206 = vmatprep.subr.mxu0 %v6740_v34 }
0x1ab3   : > { %v4412_v12 = vpop.f32.mrf.mxu1 }
0x1ab5   : > { %v6195_v23 = vpop.f32.mrf.mxu1 }
0x1b43   : > { %v4574_v25 = vpop.f32.mrf.mxu1 }
0x1b44   : > { %v4656_v27 = vmul.f32 0.35355338, %v4574_v25 }
0x1b45   : > { %v6205_v28 = vpop.f32.mrf.mxu1 }
0x1b46   : > { %v4658_v29 = vadd.f32 %v4656_v27, %v7247_v55  ;;  %v5802_v27 = vld [vmem:[%s7418_s5 + $0x38] sm:$0xff]  ;;  %v5801_v28 = vld [vmem:[%s7418_s5 + $0x30] sm:$0xff] }
0x1b48   : > { %v4660_v39 = vsel %vm1175_vm2, %v4658_v29, -inf }
0x1b49   : > { %4661 = vmax.xlane.f32.xlu0 %v4660_v39  ;;  %v5799_v39 = vld [vmem:[%s7418_s5 + $0x20] sm:$0xff] }
0x1b4b   : > { %v4336_v32 = vpop.f32.mrf.mxu0 }
0x1b4c   : > { %6198 = vmatprep.mubr.msk.f32.mxu0 %vm1175_vm2, %v4336_v32 }
0x1b4d   : > { %v6190_v35 = vpop.f32.mrf.mxu0  ;;  %6199 = vmatmul.mubr.msk.f32.vlgmr.msra.gmra.mxu0 %vm1175_vm2, %v4412_v12 }
0x1b4e   : > { %6207 = vmatpush3.xpose.msk.msra.mxu0 %vm1175_vm2, %v4581_v30  ;;  %6208 = vmatprep.mubr.msk.f32.mxu0 %vm6741_vm1, %v6740_v34 }
0x1b4f   : > { %6216 = vmatprep.subr.mxu0 %v6740_v34 }
0x1b51   : > { %6209 = vmatmul.mubr.msk.f32.vlgmr.msra.gmra.mxu0 %vm1175_vm2, %v4579_v36 }
0x1b52   : > { %6218 = vmatprep.mubr.msk.f32.mxu0 %vm6741_vm1, %v6740_v34 }
0x1bd2   : > { %v4662_v55 = vpop.xlane.xlu0 %4661 }
0x1bd3   : > { %v4666_v38 = vsub.f32 %v4658_v29, %v4662_v55  ;;  %v5800_v29 = vld [vmem:[%s7418_s5 + $0x28] sm:$0xff]  ;;  %s7866_s5 = sld [smem:[#allocation40_spill]] }
0x1bd5   : > { %v4668_v40 = vmul.f32 1.442695, %v4666_v38 }
0x1bd7   : > { %6433 = vpow2.f32 %v4668_v40 }
0x1be4   : > { %v6434_v41 = vpop.eup %6433 }
0x1be5   : > { %v4672_v42 = vsel %vm1175_vm2, %v6434_v41, 0.0 }
0x1be6   : > { %4673 = vadd.xlane.f32.xlu0 %v4672_v42 }
0x1c0d   : > { %v6200_v44 = vpop.f32.mrf.mxu0 }
0x1c0e   : > { %v4499_v46 = vadd.f32 %v6200_v44, %v4079_v43 }
0x1c0f   : > { %v4489_v47 = vpop.f32.mrf.mxu0 }
0x1c10   : > { %v4498_v49 = vadd.f32 %v4489_v47, %v4074_v45 }
0x1c11   : > { %v4652_v51 = vpop.f32.mrf.mxu0 }
0x1c12   : > { %v4657_v52 = vmul.f32 0.35355338, %v4652_v51 }
0x1c13   : > { %v6210_v53 = vpop.f32.mrf.mxu0 }
0x1c14   : > { %v4659_v54 = vadd.f32 %v4657_v52, %v7250_v61  ;;  %v5814_v52 = vld [vmem:[%s7445_s17 + $0x78] sm:$0xff]  ;;  %v5813_v53 = vld [vmem:[%s7445_s17 + $0x70] sm:$0xff] }
0x1c16   : > { %v4663_v56 = vsel %vm1175_vm2, %v4659_v54, -inf }
0x1c17   : > { %4664 = vmax.xlane.f32.xlu1 %v4663_v56  ;;  %v5811_v56 = vld [vmem:[%s7445_s17 + $0x60] sm:$0xff] }
0x1c28   : > { %4758 = vrot.lane.b32.xlu1 %v7505_v37, %s7864_s18 }
0x1c6f   : > { %v4674_v61 = vpop.xlane.xlu0 %4673 }
0x1ca0   : > { %v4665_v57 = vpop.xlane.xlu1 %4664 }
0x1ca1   : > { %v4667_v48 = vsub.f32 %v4659_v54, %v4665_v57  ;;  %v5812_v54 = vld [vmem:[%s7445_s17 + $0x68] sm:$0xff]  ;;  %v5810_v57 = vld [vmem:[%s7445_s17 + $0x58] sm:$0xff] }
0x1ca3   : > { %v4670_v33 = vmul.f32 1.442695, %v4667_v48  ;;  %v5809_v48 = vld [vmem:[%s7445_s17 + $0x50] sm:$0xff] }
0x1ca4   : > { %v4759_v31 = vpop.permute.xlu1 %4758 }
0x1ca5   : > { %6435 = vpow2.f32 %v4670_v33  ;;  %6217 = vmatpush3.msra.mxu0 %v4759_v31  ;;  %v5808_v33 = vld [vmem:[%s7445_s17 + $0x48] sm:$0xff]  ;;  %v5807_v31 = vld [vmem:[%s7445_s17 + $0x40] sm:$0xff]  ;;  %s958_s17 = scalar_lea.vmem [#allocation14], %s7157_s20 }
0x1ca6   : > { %6437 = vrcp.f32 %v4674_v61  ;;  %6226 = vmatprep.subr.mxu0 %v5802_v27 }
0x1cb2   : > { %v6436_v50 = vpop.eup %6435 }
0x1cb3   : > { %v4675_v58 = vsel %vm1175_vm2, %v6436_v50, 0.0  ;;  %v6438_v60 = vpop.eup %6437 }
0x1cb4   : > { %4676 = vadd.xlane.f32.xlu0 %v4675_v58  ;;  %v4679_v62 = vmul.f32 %v6438_v60, %v6434_v41  ;;  %v5797_v41 = vld [vmem:[%s7865_s4 + $0x1] ss:$0 sm:$0xff] }
0x1cca   : > { %4682 = vrot.lane.b32.xlu0 %v7507_v26, %s7864_s18 }
0x1d3d   : > { %v4677_v59 = vpop.xlane.xlu0 %4676 }
0x1d3e   : > { %6439 = vrcp.f32 %v4677_v59 }
0x1d41   : > { %v4683_v37 = vpop.permute.xlu0 %4682 }
0x1d42   : > { %6212 = vmatpush3.msra.mxu1 %v4683_v37 }
0x1d43   : > { %6214 = vmatmul.mubr.msk.f32.vlgmr.msra.gmra.mxu1 %vm1175_vm2, %v4679_v62  ;;  %6221 = vmatprep.subr.mxu1 %v5790_v1 }
0x1d44   : > { %6222 = vmatpush3.msra.mxu1 %v5790_v1 }
0x1d45   : > { %6237 = vmatprep.subr.mxu1 %v5814_v52 }
0x1d4b   : > { %v6440_v63 = vpop.eup %6439 }
0x1d4c   : > { %v4681_v0 = vmul.f32 %v6440_v63, %v6436_v50  ;;  %v5804_v50 = vld [vmem:[%s7460_s19 + $0x1] ss:$0 sm:$0xff]  ;;  %s5339_s19 = sshll.u32 %s958_s17, 4  ;;  %s5340_s19 = int_to_ptr.vmem [resolvable:$true] %s5339_s19 }
0x1d4d   : > { %p6658_p7 = scmp.lt.s32.totalorder %s5340_s19, %s6656_s21 }
0x1d4e   : > { %6219 = vmatmul.mubr.msk.f32.vlgmr.msra.gmra.mxu0 %vm1175_vm2, %v4681_v0 }
0x1d4f   : > { %6227 = vmatpush3.msra.mxu0 %v5802_v27 }
0x1d50   : > { %6228 = vmatprep.subr.mxu0 %v5801_v28 }
0x1d51   : > { %6229 = vmatpush3.msra.mxu0 %v5801_v28 }
0x1d52   : > { %6230 = vmatprep.subr.mxu0 %v5800_v29 }
0x1d53   : > { %6231 = vmatpush3.msra.mxu0 %v5800_v29 }
0x1d54   : > { %6232 = vmatprep.subr.mxu0 %v5799_v39 }
0x1d55   : > { %6233 = vmatpush3.msra.mxu0 %v5799_v39 }
0x1d56   : > { %6256 = vmatprep.subr.mxu0 %v6740_v34 }
0x1e03   : > { %v4754_v2 = vpop.f32.mrf.mxu1 }
0x1e04   : > { %6223 = vmatprep.mubr.msk.f32.mxu1 %vm1175_vm2, %v4754_v2 }
0x1e05   : > { %v6215_v26 = vpop.f32.mrf.mxu1 }
0x1e0e   : > { %v4830_v3 = vpop.f32.mrf.mxu0 }
0x1e0f   : > { %6224 = vmatmul.mubr.msk.f32.vlgmr.msra.gmra.mxu1 %vm1175_vm2, %v4830_v3 }
0x1e10   : > { %v6220_v4 = vpop.f32.mrf.mxu0  ;;  %6238 = vmatpush3.msra.mxu1 %v5814_v52 }
0x1e11   : > { %6239 = vmatprep.subr.mxu1 %v5813_v53 }
0x1e12   : > { %6240 = vmatpush3.msra.mxu1 %v5813_v53  ;;  %v5822_v53 = vld [vmem:[%s7491_s25 + $0x1] ss:$0 sm:$0xff] }
0x1e13   : > { %6241 = vmatprep.subr.mxu1 %v5812_v54 }
0x1e14   : > { %6242 = vmatpush3.msra.mxu1 %v5812_v54 }
0x1e15   : > { %6243 = vmatprep.subr.mxu1 %v5811_v56 }
0x1e16   : > { %6244 = vmatpush3.msra.mxu1 %v5811_v56 }
0x1e17   : > { %6245 = vmatprep.subr.mxu1 %v5810_v57 }
0x1e18   : > { %6246 = vmatpush3.msra.mxu1 %v5810_v57 }
0x1e19   : > { %6247 = vmatprep.subr.mxu1 %v5809_v48 }
0x1e1a   : > { %6248 = vmatpush3.msra.mxu1 %v5809_v48 }
0x1e1b   : > { %6249 = vmatprep.subr.mxu1 %v5808_v33 }
0x1e1c   : > { %6250 = vmatpush3.msra.mxu1 %v5808_v33 }
0x1e1d   : > { %6251 = vmatprep.subr.mxu1 %v5807_v31 }
0x1e1e   : > { %6252 = vmatpush3.msra.mxu1 %v5807_v31 }
0x1ecf   : > { %v6225_v5 = vpop.f32.mrf.mxu1 }
0x1ed0   : > { %v4917_v7 = vadd.f32 %v6225_v5, %v4499_v46  ;;  %v5798_v46 = vld [vmem:[%s7430_s1 + $0x1] ss:$0 sm:$0xff]  ;;  %s5826_s1 = sshll.u32 %s6871_s0, 5  ;;  %s6657_s0 = scalar_lea.vmem %s6656_s21, 64 }
0x1ed1   : > { %v4907_v8 = vpop.f32.mrf.mxu1  ;;  %s7725_s25 = scalar_lea.hbm %s7868_s3, %s5826_s1 }
0x1ed2   : > { %v4927_v9 = vadd.f32 %v5794_v6, %v4917_v7  ;;  %v4916_v10 = vadd.f32 %v4907_v8, %v4498_v49 }
0x1ed4   : > { %v4926_v13 = vadd.f32 %v5794_v6, %v4916_v10  ;;  %v4929_v14 = vadd.f32 %v4927_v9, %v7496_v22 }
0x1ed6   : > { %v4937_v15 = vsel %vm1010_vm0, %v4929_v14, 0.0  ;;  %v4928_v16 = vadd.f32 %v4926_v13, %v7494_v21 }
0x1ed7   : > { %4938 = vadd.xlane.f32.xlu0 %v4937_v15 }
0x1ed8   : > { %v4934_v17 = vsel %vm1010_vm0, %v4928_v16, 0.0 }
0x1ed9   : > { %4935 = vadd.xlane.f32.xlu1 %v4934_v17 }
0x1f60   : > { %v4939_v11 = vpop.xlane.xlu0 %4938 }
0x1f61   : > { %v4941_v18 = vmul.f32 0.03125, %v4939_v11 }
0x1f62   : > { %v4936_v19 = vpop.xlane.xlu1 %4935 }
0x1f63   : > { %v4943_v20 = vsub.f32 %v4929_v14, %v4941_v18  ;;  %v4940_v12 = vmul.f32 0.03125, %v4936_v19 }
0x1f65   : > { %v4942_v23 = vsub.f32 %v4928_v16, %v4940_v12  ;;  %v4945_v24 = vmul.f32 %v4943_v20, %v4943_v20  ;;  %v5816_v16 = vld [vmem:[%s7471_s9 + $0x1] ss:$0 sm:$0xff] }
0x1f67   : > { %v4949_v22 = vsel %vm1010_vm0, %v4945_v24, 0.0  ;;  %v4944_v25 = vmul.f32 %v4942_v23, %v4942_v23 }
0x1f68   : > { %4950 = vadd.xlane.f32.xlu1 %v4949_v22 }
0x1f69   : > { %v4946_v21 = vsel %vm1010_vm0, %v4944_v25, 0.0 }
0x1f6a   : > { %4947 = vadd.xlane.f32.xlu0 %v4946_v21 }
0x1ff1   : > { %v4951_v30 = vpop.xlane.xlu1 %4950 }
0x1ff2   : > { %v4953_v32 = vmul.f32 0.03125, %v4951_v30 }
0x1ff3   : > { %v4948_v35 = vpop.xlane.xlu0 %4947 }
0x1ff4   : > { %v4955_v36 = vadd.f32 1e-12, %v4953_v32  ;;  %v4952_v55 = vmul.f32 0.03125, %v4948_v35 }
0x1ff6   : > { %6441 = vrsqrt.f32 %v4955_v36  ;;  %v4954_v38 = vadd.f32 1e-12, %v4952_v55  ;;  %v5237_v36 = vld [vmem:[%s831_s22 + $0x18] sm:$0xff]  ;;  %v5236_v55 = vld [vmem:[%s831_s22 + $0x10] sm:$0xff] }
0x1ff8   : > { %6443 = vrsqrt.f32 %v4954_v38  ;;  %v5235_v38 = vld [vmem:[%s831_s22 + $0x8] sm:$0xff] }
0x2003   : > { %v6442_v40 = vpop.eup %6441 }
0x2004   : > { %v4959_v42 = vmul.f32 %v6442_v40, %v4943_v20  ;;  %v5234_v40 = vld [vmem:[%s831_s22] sm:$0xff] }
0x2005   : > { %v6444_v43 = vpop.eup %6443 }
0x2006   : > { %v4958_v44 = vmul.f32 %v6444_v43, %v4942_v23  ;;  %v4967_v45 = vmul.f32 %v5797_v41, %v4959_v42 }
0x2008   : > { %v4966_v47 = vmul.f32 %v5797_v41, %v4958_v44  ;;  %v4975_v51 = vadd.f32 %v5798_v46, %v4967_v45 }
0x200a   : > { %v7684_v49 = vadd.f32 %v5798_v46, %v4966_v47 }
0x200c   : > { %6234 = vmatprep.mubr.msk.f32.mxu0 %vm1010_vm0, %v7684_v49 }
0x200d   : > { %6235 = vmatmul.mubr.msk.f32.vlgmr.msra.gmra.mxu0 %vm1010_vm0, %v4975_v51 }
0x200e   : > { %6264 = vmatprep.mubr.msk.f32.mxu0 %vm6741_vm1, %v6740_v34  ;;  %6257 = vmatpush3.msra.mxu0 %v5237_v36 }
0x200f   : > { %6258 = vmatprep.subr.mxu0 %v6740_v34 }
0x2010   : > { %6259 = vmatpush3.msra.mxu0 %v5236_v55 }
0x2011   : > { %6260 = vmatprep.subr.mxu0 %v6740_v34 }
0x2012   : > { %6261 = vmatpush3.msra.mxu0 %v5235_v38 }
0x2013   : > { %6262 = vmatprep.subr.mxu0 %v6740_v34 }
0x2014   : > { %6263 = vmatpush3.msra.mxu0 %v5234_v40 }
0x20cd   : > { %v6236_v58 = vpop.f32.mrf.mxu0 }
0x20ce   : > { %v5067_v61 = vadd.f32 %v6236_v58, %v5804_v50 }
0x20cf   : > { %v5061_v59 = vpop.f32.mrf.mxu0 }
0x20d0   : > { %v5071_v60 = vmul.f32 %v5067_v61, %v5067_v61  ;;  %v5062_v37 = vadd.f32 %v5804_v50, %v5061_v59 }
0x20d2   : > { %v5073_v62 = vmul.f32 %v5071_v60, %v5067_v61  ;;  %v5070_v63 = vmul.f32 %v5062_v37, %v5062_v37 }
0x20d4   : > { %v5075_v0 = vmul.f32 0.044715, %v5073_v62  ;;  %v5072_v1 = vmul.f32 %v5070_v63, %v5062_v37 }
0x20d6   : > { %v5077_v2 = vadd.f32 %v5075_v0, %v5067_v61  ;;  %v5074_v26 = vmul.f32 0.044715, %v5072_v1 }
0x20d8   : > { %v5079_v3 = vmul.f32 0.7978846, %v5077_v2  ;;  %v5076_v4 = vadd.f32 %v5074_v26, %v5062_v37 }
0x20da   : > { %6445 = vtanh.f32 %v5079_v3  ;;  %v5078_v5 = vmul.f32 0.7978846, %v5076_v4 }
0x20dc   : > { %6447 = vtanh.f32 %v5078_v5 }
0x20e7   : > { %v6446_v6 = vpop.eup %6445 }
0x20e8   : > { %v5083_v7 = vadd.f32 1.0, %v6446_v6 }
0x20e9   : > { %v6448_v8 = vpop.eup %6447 }
0x20ea   : > { %v5082_v9 = vadd.f32 1.0, %v6448_v8  ;;  %v5085_v10 = vmul.f32 0.5, %v5083_v7 }
0x20ec   : > { %v5084_v13 = vmul.f32 0.5, %v5082_v9  ;;  %v5087_v15 = vmul.f32 %v5085_v10, %v5067_v61 }
0x20ee   : > { %v5086_v14 = vmul.f32 %v5084_v13, %v5062_v37 }
0x20f0   : > { %6253 = vmatprep.mubr.msk.f32.mxu1 %vm3029_vm3, %v5086_v14 }
0x20f1   : > { %6254 = vmatmul.mubr.msk.f32.vlgmr.msra.gmra.mxu1 %vm3029_vm3, %v5087_v15 }
0x21b1   : > { %v6255_v17 = vpop.f32.mrf.mxu1 }
0x21b2   : > { %v5183_v11 = vadd.f32 %v6255_v17, %v5816_v16 }
0x21b3   : > { %v5177_v18 = vpop.f32.mrf.mxu1 }
0x21b4   : > { %v5178_v19 = vadd.f32 %v5816_v16, %v5177_v18  ;;  %v5187_v20 = vadd.f32 %v5183_v11, %v4975_v51 }
0x21b6   : > { %v5195_v12 = vsel %vm1010_vm0, %v5187_v20, 0.0  ;;  %v5186_v23 = vadd.f32 %v5178_v19, %v7684_v49  ;;  %v5821_v49 = vld [vmem:[%s822_s10 + $0x1] ss:$0 sm:$0xff]  ;;  %s1005_s10 = scalar_lea.vmem %s7866_s5, %s7182_s2  ;;  %s6651_s2 = scalar_lea.vmem %s5340_s19, 32 }
0x21b7   : > { %5196 = vadd.xlane.f32.xlu0 %v5195_v12  ;;  %v5823_v50 = vld [vmem:[%s1005_s10] ss:$0 sm:$0xff]  ;;  %p6652_p3 = scmp.ne.s32.totalorder %s5340_s19, %s6651_s2  ;;  %p6659_p8 = scmp.lt.s32.totalorder %s6657_s0, %s6651_s2 }
0x21b8   : > { %v5192_v24 = vsel %vm1010_vm0, %v5186_v23, 0.0 }
0x21b9   : > { %5193 = vadd.xlane.f32.xlu1 %v5192_v24  ;;  %p6653_p4 = pnand %p6652_p3, %p7869_p11  ;;  %p6660_p10 = por %p6659_p8, %p6658_p7 }
0x21bb   : > { %p6654_p5 = pneg %p6653_p4 }
0x21bd   : > { %p6661_p0 = pnand %p6660_p10, %p6654_p5 }
0x2240   : > { %v5197_v22 = vpop.xlane.xlu0 %5196 }
0x2241   : > { %v5199_v25 = vmul.f32 0.03125, %v5197_v22 }
0x2242   : > { %v5194_v21 = vpop.xlane.xlu1 %5193 }
0x2243   : > { %v5201_v27 = vsub.f32 %v5187_v20, %v5199_v25  ;;  %v5198_v28 = vmul.f32 0.03125, %v5194_v21 }
0x2245   : > { %v5200_v29 = vsub.f32 %v5186_v23, %v5198_v28  ;;  %v5203_v39 = vmul.f32 %v5201_v27, %v5201_v27 }
0x2247   : > { %v5207_v30 = vsel %vm1010_vm0, %v5203_v39, 0.0  ;;  %v5202_v32 = vmul.f32 %v5200_v29, %v5200_v29 }
0x2248   : > { %5208 = vadd.xlane.f32.xlu0 %v5207_v30 }
0x2249   : > { %v5204_v35 = vsel %vm1010_vm0, %v5202_v32, 0.0 }
0x224a   : > { %5205 = vadd.xlane.f32.xlu1 %v5204_v35 }
0x22d1   : > { %v5209_v41 = vpop.xlane.xlu0 %5208 }
0x22d2   : > { %v5211_v42 = vmul.f32 0.03125, %v5209_v41 }
0x22d3   : > { %v5206_v43 = vpop.xlane.xlu1 %5205 }
0x22d4   : > { %v5213_v44 = vadd.f32 1e-12, %v5211_v42  ;;  %v5210_v45 = vmul.f32 0.03125, %v5206_v43 }
0x22d6   : > { %6449 = vrsqrt.f32 %v5213_v44  ;;  %v5212_v46 = vadd.f32 1e-12, %v5210_v45 }
0x22d8   : > { %6451 = vrsqrt.f32 %v5212_v46 }
0x22e3   : > { %v6450_v47 = vpop.eup %6449 }
0x22e4   : > { %v5217_v51 = vmul.f32 %v6450_v47, %v5201_v27 }
0x22e5   : > { %v6452_v52 = vpop.eup %6451 }
0x22e6   : > { %v5216_v54 = vmul.f32 %v6452_v52, %v5200_v29  ;;  %v5225_v34 = vmul.f32 %v5821_v49, %v5217_v51 }
0x22e8   : > { %v5224_v56 = vmul.f32 %v5821_v49, %v5216_v54  ;;  %v5233_v57 = vadd.f32 %v5822_v53, %v5225_v34 }
0x22ea   : > { %v5232_v48 = vadd.f32 %v5822_v53, %v5224_v56  ;;  %v5247_v33 = vrot.slane %v5233_v57, 7 }
0x22ec   : > { %v5249_v31 = vsel %vm5248_vm4, %v5247_v33, %v5232_v48 }
0x22ed   : > { %6265 = vmatmul.mubr.msk.f32.vlgmr.msra.gmra.mxu0 %vm1010_vm0, %v5249_v31 }
0x23ad   : > { %v5318_v58 = vpop.f32.mrf.mxu0 }
0x23ae   : > { %v5319_v61 = vadd.f32 %v5823_v50, %v5318_v58 }
0x23af   : > { %v6266_v59 = vpop.f32.mrf.mxu0 }
0x23b0   : > { %6453 = vtanh.f32 %v5319_v61 }
0x23bd   : > { %v6454_v60 = vpop.eup %6453 }
0x23be   : > { %5324 = vst.msk [vmem:[%s958_s17] sm:$0x3] %vm5323_vm5, %v6454_v60 }
0x23bf   : > { %6664 = shalt.err (!%p6661_p0)
}
0x23c0   : > { %s6665_s20 = scalar_lea.hbm %s7725_s25, 32  ;;  %s6669_s18 = scalar_lea.hbm %s7868_s3, 64 }
0x23c1   : > { %p6666_p2 = scmp.ne.s32.totalorder %s7725_s25, %s6665_s20  ;;  %p6670_p1 = scmp.lt.s32.totalorder %s7725_s25, %s7868_s3 }
0x23c2   : > { %p6671_p12 = scmp.lt.s32.totalorder %s6669_s18, %s6665_s20 }
0x23c3   : > { %p6667_p6 = pnand %p6666_p2, %p7869_p11 }
0x23c4   : > { %p6672_p13 = por %p6671_p12, %p6670_p1 }
0x23c5   : > { %p6668_p9 = pneg %p6667_p6 }
0x23c7   : > { %p6673_p3 = pnand %p6672_p13, %p6668_p9 }
0x23c9   : > { %6676 = shalt.err (!%p6673_p3)
}
0x23ca   : > { %6281 = dma.vmem_to_hbm [thread:$0]  (%p7869_p11), %s5340_s19, 32, %s7725_s25, %s5326_s29  }
0x23cb PF: > { %s7870_s22 = sld [smem:[#allocation20_spill]]  ;;  %p7873_p5 = scmp.ge.s32.totalorder %s6727_s30, 2 }
0x23cc   : > { %s7871_s9 = sld [smem:[#allocation25_spill]] }
0x23d1   : > { %s5351_s23 = sand.u32 1, %s7870_s22  }
0x23d2   : > { %p7872_p4 = scmp.ne.s32.totalorder %s7871_s9, 0  ;;  %s5352_s5 = scalar_lea.sflag [#allocation4], %s5351_s23 }
0x23d4   : > { %p6306_p7 = pnand %p7873_p5, %p7872_p4 }
0x23d6   : > { %p6307_p8 = pneg %p6306_p7 }
0x23d8   : > { %6710 = dma.done.wait (%p6307_p8), %s5352_s5, 32  }
0x23d9   : > { %6712 = vsyncadd (%p6307_p8), %s5352_s5, 4294967264  ;;  %s7874_s30 = sld [smem:[#allocation22_spill]]  ;;  %s7877_s27 = smov %s6719_s28 }
0x23da   : > { %s7875_s10 = sld [smem:[#allocation21_spill]] }
0x23db   : > { %s7876_s29 = sld [smem:[#allocation23_spill]] }
0x23df   : > { %p40_p10 = scmp.ge.s32.totalorder %s7874_s30, 4  }
0x23e0   : > { %s7878_s28 = smov %s7875_s10 }
0x23e1   :  { %42 = sbr.rel (!%p40_p10) target bundleno = 28 (0x1c), region = 254 }
0x23e6   :  { %5357 = vsyncpa [#allocation3], 1 }
0x23e7   :  { %5359 = vsyncpa [#allocation3 + $0x1], 1 }
0x23e8   :  { %5360 = vsyncpa [#allocation6], 1 }
0x23e9   :  { %5362 = vsyncpa [#allocation6 + $0x1], 1 }
0x23ea   :  { %5363 = vsyncpa [#allocation9], 1 }
0x23eb   :  { %5365 = vsyncpa [#allocation9 + $0x1], 1 }
0x23ec   :  { %5366 = vsyncpa [#allocation12], 1 }
0x23ed   :  { %5368 = vsyncpa [#allocation12 + $0x1], 1 }
0x23ee   :  { %5369 = vsyncpa [#allocation4], 1 }
0x23ef   :  { %5371 = vsyncpa [#allocation4 + $0x1], 1 }

</bundles_post_ra>
